<compile_context>
chip_gen: v6e
topology: v6e:2x2x1
jax: 0.10.0
libtpu: 0.0.40
codegen_flags: <defaults>
</compile_context>

<pallas_src>
import jax
import jax.numpy as jnp
from jax.experimental import pallas as pl
from jax.experimental.pallas import tpu as pltpu


def _round_up(x, m):
    return ((x + m - 1) // m) * m


def _make_kernel(use_dot_general):
    """Build the kernel body; `use_dot_general` selects the contraction form."""

    def bmv_last(mat, vec):
        """(Bb, R, C) . (Bb, C) -> (Bb, R); contract over the last axis, f32 acc."""
        vec = vec.astype(mat.dtype)
        if use_dot_general:
            return jax.lax.dot_general(
                mat, vec, (((2,), (1,)), ((0,), (0,))),
                preferred_element_type=jnp.float32)
        # Fallback: singleton-q einsum (proven lowering path).
        return jnp.einsum("bqc,brc->bqr", vec[:, None, :], mat,
                          preferred_element_type=jnp.float32)[:, 0, :]

    def bmv_mid(mat, vec):
        """(Bb, R, C) . (Bb, R) -> (Bb, C); contract over the middle axis, f32 acc."""
        vec = vec.astype(mat.dtype)
        if use_dot_general:
            return jax.lax.dot_general(
                mat, vec, (((1,), (1,)), ((0,), (0,))),
                preferred_element_type=jnp.float32)
        return jnp.einsum("bqr,brc->bqc", vec[:, None, :], mat,
                          preferred_element_type=jnp.float32)[:, 0, :]

    def kernel(passage_ref, len_ref, query_ref, alters_ref,
               sim_wt_ref, sim_b_ref, ch_wt_ref, ch_b_ref, out_ref):
        passage = passage_ref[...]                  # (Bb, P, 2H) bf16
        lengths = len_ref[...]                      # (Bb, 1)     int32
        query = query_ref[...]                      # (Bb, H)     bf16
        alters = alters_ref[...]                    # (Bb, 3, H)  bf16
        sim_wt = sim_wt_ref[...]                    # (H, 2H)     bf16 (pre-transposed)
        sim_b = sim_b_ref[...]                      # (1, 2H)     f32
        ch_wt = ch_wt_ref[...]                      # (2H, H)     bf16 (pre-transposed)
        ch_b = ch_b_ref[...]                        # (1, H)      f32

        bb, p_len, _ = passage.shape
        out_w = out_ref.shape[1]

        # alpha = self.sim_w(query_vec): (Bb, 2H), MXU with f32 accumulation.
        alpha = jnp.dot(query, sim_wt, preferred_element_type=jnp.float32) + sim_b

        # scores[b, p] = <passage[b, p, :], alpha[b, :]>
        scores = bmv_last(passage, alpha)                               # (Bb, P) f32

        # Length mask rebuilt in-kernel; finite fill so padded rows can't NaN.
        pos = jax.lax.broadcasted_iota(jnp.int32, (bb, p_len), 1)
        scores = jnp.where(pos < lengths, scores, -1e30)

        # Masked softmax; 1/denom folded into the pooled context (EUP reciprocal).
        s_max = jnp.max(scores, axis=1, keepdims=True)
        p_unn = jnp.exp(scores - s_max)                                 # (Bb, P) f32
        inv_denom = pl.reciprocal(jnp.sum(p_unn, axis=1, keepdims=True), approx=True)

        # ctx[b, :] = softmax(scores)[b, :] @ passage[b, :, :]
        ctx = bmv_mid(passage, p_unn) * inv_denom                       # (Bb, 2H) f32

        # choose(passage_vec, alters): project to H, dot with each alternative.
        proj = jnp.dot(ctx.astype(ch_wt.dtype), ch_wt,
                       preferred_element_type=jnp.float32) + ch_b       # (Bb, H) f32
        logits = bmv_last(alters, proj)                                 # (Bb, 3) f32

        # f.log_softmax over the 3 alternatives.
        l_max = jnp.max(logits, axis=1, keepdims=True)
        lse = jnp.log(jnp.sum(jnp.exp(logits - l_max), axis=1, keepdims=True)) + l_max
        logp = logits - lse                                             # (Bb, 3)

        # Lane-dense epilogue: scatter the 3 log-probs into a (Bb, out_w) slab
        # (zeros elsewhere) so the writeback is an unmasked, full-lane store.
        lane_src = jax.lax.broadcasted_iota(jnp.int32, logp.shape, 1)   # (Bb, 3)
        lane_dst = jax.lax.broadcasted_iota(jnp.int32, (bb, out_w), 1)  # (Bb, out_w)
        out = jnp.zeros((bb, out_w), jnp.float32)
        for a in range(3):
            col = jnp.sum(jnp.where(lane_src == a, logp, 0.0),
                          axis=1, keepdims=True)                        # (Bb, 1)
            out = jnp.where(lane_dst == a, col, out)
        out_ref[...] = out.astype(out_ref.dtype)

    return kernel


def prepare_params(sim_w, sim_b, choose_w, choose_b):
    """One-time (parameter-load-time) prep: transpose + cast outside the hot path."""
    return (
        jnp.asarray(sim_w.T, dtype=jnp.bfloat16),                  # (H, 2H)
        jnp.asarray(sim_b, dtype=jnp.float32).reshape(1, -1),      # (1, 2H)
        jnp.asarray(choose_w.T, dtype=jnp.bfloat16),               # (2H, H)
        jnp.asarray(choose_b, dtype=jnp.float32).reshape(1, -1),   # (1, H)
    )


def stanford_ar_forward(passage_vec, passage_lengths, query_vec, alters, params,
                        *, block_b=16, out_lanes=128, prefer_dot_general=True):
    """passage_vec (B,P,2H), passage_lengths (B,), query_vec (B,H), alters (B,3,H),
    params = prepare_params(...). Returns (B,3) f32 log-probs.

    block_b sizing: multiple of 16 (bf16 sublane pack). Per grid step the passage
    tile costs block_b*P_pad*2H*2 bytes, double-buffered (x2); keep that well under
    the scoped VMEM limit (we request <=48 MiB so it fits v7x's 64 MiB physical —
    on v7x pick roughly half the v6e block) and keep B_pad/block_b >= 2 so the
    "parallel" grid axis can feed both v7x TensorCores.
    """
    B, P, D2 = passage_vec.shape
    H = query_vec.shape[-1]
    sim_wt, sim_b, ch_wt, ch_b = params

    # Pad P to a multiple of 128 (lane/MXU friendly); length mask handles padding.
    P_pad = _round_up(P, 128)
    # Pad batch to a multiple of block_b (zero rows: length 0 -> uniform attention
    # over an all-zero passage -> finite logits; sliced off below).
    B_pad = _round_up(B, block_b)

    passage_p = jnp.pad(passage_vec.astype(jnp.bfloat16),
                        ((0, B_pad - B), (0, P_pad - P), (0, 0)))
    query_p = jnp.pad(query_vec.astype(jnp.bfloat16), ((0, B_pad - B), (0, 0)))
    alters_p = jnp.pad(alters.astype(jnp.bfloat16),
                       ((0, B_pad - B), (0, 0), (0, 0)))
    lengths_p = jnp.pad(passage_lengths.astype(jnp.int32),
                        ((0, B_pad - B),)).reshape(B_pad, 1)

    grid = (B_pad // block_b,)

    # VMEM budget: double-buffered input tiles + resident weights + f32 temps.
    bf16, f32 = 2, 4
    per_step = (block_b * P_pad * D2 * bf16        # passage tile
                + block_b * H * bf16               # query tile
                + block_b * 3 * H * bf16           # alternatives tile
                + block_b * 128 * f32              # lengths tile (vreg-padded)
                + block_b * out_lanes * f32)       # output tile
    temps = 4 * block_b * P_pad * f32              # scores / p_unn / mask headroom
    weights = (H * D2 + D2 * H) * bf16 + (D2 + H) * f32
    need = 2 * per_step + weights + temps
    # >= 32 MiB raises the 16/32 MiB scoped defaults (v5e/v6e); <= 48 MiB keeps
    # us safely inside v7x's 64 MiB physical VMEM.
    vmem_limit = int(min(max(3 * need, 32 << 20), 48 << 20))

    in_specs = [
        pl.BlockSpec((block_b, P_pad, D2), lambda i: (i, 0, 0)),   # passage (tiled B)
        pl.BlockSpec((block_b, 1), lambda i: (i, 0)),              # lengths
        pl.BlockSpec((block_b, H), lambda i: (i, 0)),              # query
        pl.BlockSpec((block_b, 3, H), lambda i: (i, 0, 0)),        # alternatives
        pl.BlockSpec((H, D2), lambda i: (0, 0)),                   # sim_w^T  (bcast)
        pl.BlockSpec((1, D2), lambda i: (0, 0)),                   # sim_b
        pl.BlockSpec((D2, H), lambda i: (0, 0)),                   # choose_w^T
        pl.BlockSpec((1, H), lambda i: (0, 0)),                    # choose_b
    ]
    out_spec = pl.BlockSpec((block_b, out_lanes), lambda i: (i, 0))

    def run(use_dot_general):
        return pl.pallas_call(
            _make_kernel(use_dot_general),
            out_shape=jax.ShapeDtypeStruct((B_pad, out_lanes), jnp.float32),
            grid=grid,
            in_specs=in_specs,
            out_specs=out_spec,
            compiler_params=pltpu.CompilerParams(
                dimension_semantics=("parallel",),   # megacore sharding on v7x
                vmem_limit_bytes=vmem_limit),
        )(passage_p, lengths_p, query_p, alters_p, sim_wt, sim_b, ch_wt, ch_b)

    if prefer_dot_general:
        try:
            out = jax.block_until_ready(run(True))
            return out[:B, :3]
        except Exception:
            # Fallback for Mosaic builds that reject rank-3 x rank-2 batched
            # dot_general: use the proven singleton-q einsum contraction form.
            pass
    return run(False)[:B, :3]


def stanford_ar_reference(passage_vec, passage_lengths, query_vec, alters,
                          sim_w, sim_b, choose_w, choose_b):
    """Pure-JAX f32 reference mirroring the PyTorch forward()."""
    passage = passage_vec.astype(jnp.float32)
    query = query_vec.astype(jnp.float32)
    alt = alters.astype(jnp.float32)
    alpha = query @ sim_w.T + sim_b                                  # (B, 2H)
    scores = jnp.einsum("bpd,bd->bp", passage, alpha)                # (B, P)
    mask = jnp.arange(passage.shape[1])[None, :] < passage_lengths[:, None]
    scores = jnp.where(mask, scores, -jnp.inf)
    att = jax.nn.softmax(scores, axis=1)
    ctx = jnp.einsum("bp,bpd->bd", att, passage)                     # (B, 2H)
    proj = ctx @ choose_w.T + choose_b                               # (B, H)
    logits = jnp.einsum("bah,bh->ba", alt, proj)                     # (B, 3)
    return jax.nn.log_softmax(logits, axis=1)


if __name__ == "__main__":
    key = jax.random.PRNGKey(0)
    B, P, H = 24, 96, 64          # batch, passage length, hidden_size (small demo)
    H2 = 2 * H                    # bidirectional passage-encoder width
    BLOCK_B = 16                  # bf16 sublane pack; B pads to 32 -> grid of 2
    ks = jax.random.split(key, 8)

    # Post-encoder tensors (stand-ins for embedding + encoder.Rnn outputs),
    # kept bf16 end-to-end to halve HBM traffic on the mem-bound passage path.
    passage_vec = jax.random.normal(ks[0], (B, P, H2), jnp.float32).astype(jnp.bfloat16)
    query_vec = jax.random.normal(ks[1], (B, H), jnp.float32).astype(jnp.bfloat16)
    alters = jax.random.normal(ks[2], (B, 3, H), jnp.float32).astype(jnp.bfloat16)

    # Per-sample valid lengths (replaces the dense f32 mask).
    passage_lengths = jax.random.randint(ks[3], (B,), P // 2, P + 1).astype(jnp.int32)

    # Parameters: sim_w = nn.Linear(H, 2H); choose projection = Linear(2H, H).
    sim_w = 0.02 * jax.random.normal(ks[4], (H2, H), jnp.float32)
    sim_b = 0.02 * jax.random.normal(ks[5], (H2,), jnp.float32)
    choose_w = 0.02 * jax.random.normal(ks[6], (H, H2), jnp.float32)
    choose_b = 0.02 * jax.random.normal(ks[7], (H,), jnp.float32)

    params = prepare_params(sim_w, sim_b, choose_w, choose_b)

    out = stanford_ar_forward(passage_vec, passage_lengths, query_vec, alters,
                              params, block_b=BLOCK_B)
    out = jax.block_until_ready(out)

    ref = stanford_ar_reference(passage_vec, passage_lengths, query_vec, alters,
                                sim_w, sim_b, choose_w, choose_b)

    assert out.shape == (B, 3), out.shape
    assert not bool(jnp.any(jnp.isnan(out)))
    # bf16 operands / approx reciprocal vs an all-f32 reference -> loose tolerance.
    assert jnp.allclose(out, ref, atol=5e-2, rtol=5e-2), (out, ref)
    print("KERNEL_OK")
</pallas_src>

<mosaic_0001>
module attributes {stable_mosaic.version = 11 : i64} {
  func.func @kernel(%arg0: i32, %arg1: memref<16x128x128xbf16, #tpu.memory_space<vmem>>, %arg2: memref<16x1xi32, #tpu.memory_space<vmem>>, %arg3: memref<16x64xbf16, #tpu.memory_space<vmem>>, %arg4: memref<16x3x64xbf16, #tpu.memory_space<vmem>>, %arg5: memref<64x128xbf16, #tpu.memory_space<vmem>>, %arg6: memref<1x128xf32, #tpu.memory_space<vmem>>, %arg7: memref<128x64xbf16, #tpu.memory_space<vmem>>, %arg8: memref<1x64xf32, #tpu.memory_space<vmem>>, %arg9: memref<16x128xf32, #tpu.memory_space<vmem>>) attributes {dimension_semantics = [#tpu.dimension_semantics<parallel>], iteration_bounds = array<i64: 2>, scalar_prefetch = 0 : i64, scratch_operands = 0 : i64, tpu.core_type = #tpu.core_type<tc>, window_params = [{transform_indices = @transform_0, window_bounds = array<i64: 16, 128, 128>}, {transform_indices = @transform_1, window_bounds = array<i64: 16, 1>}, {transform_indices = @transform_2, window_bounds = array<i64: 16, 64>}, {transform_indices = @transform_3, window_bounds = array<i64: 16, 3, 64>}, {pipeline_mode = #tpu.pipeline_mode<synchronous>, transform_indices = @transform_4, window_bounds = array<i64: 64, 128>}, {pipeline_mode = #tpu.pipeline_mode<synchronous>, transform_indices = @transform_5, window_bounds = array<i64: 1, 128>}, {pipeline_mode = #tpu.pipeline_mode<synchronous>, transform_indices = @transform_6, window_bounds = array<i64: 128, 64>}, {pipeline_mode = #tpu.pipeline_mode<synchronous>, transform_indices = @transform_7, window_bounds = array<i64: 1, 64>}, {transform_indices = @transform_8, window_bounds = array<i64: 16, 128>}]} {
    %c0 = arith.constant 0 : index
    %c0_0 = arith.constant 0 : index
    %c0_1 = arith.constant 0 : index
    %0 = vector.load %arg1[%c0, %c0_0, %c0_1] : memref<16x128x128xbf16, #tpu.memory_space<vmem>>, vector<16x128x128xbf16>
    %c0_2 = arith.constant 0 : index
    %c0_3 = arith.constant 0 : index
    %1 = vector.load %arg2[%c0_2, %c0_3] : memref<16x1xi32, #tpu.memory_space<vmem>>, vector<16x1xi32>
    %c0_4 = arith.constant 0 : index
    %c0_5 = arith.constant 0 : index
    %2 = vector.load %arg3[%c0_4, %c0_5] : memref<16x64xbf16, #tpu.memory_space<vmem>>, vector<16x64xbf16>
    %c0_6 = arith.constant 0 : index
    %c0_7 = arith.constant 0 : index
    %c0_8 = arith.constant 0 : index
    %3 = vector.load %arg4[%c0_6, %c0_7, %c0_8] : memref<16x3x64xbf16, #tpu.memory_space<vmem>>, vector<16x3x64xbf16>
    %c0_9 = arith.constant 0 : index
    %c0_10 = arith.constant 0 : index
    %4 = vector.load %arg5[%c0_9, %c0_10] : memref<64x128xbf16, #tpu.memory_space<vmem>>, vector<64x128xbf16>
    %c0_11 = arith.constant 0 : index
    %c0_12 = arith.constant 0 : index
    %5 = vector.load %arg6[%c0_11, %c0_12] : memref<1x128xf32, #tpu.memory_space<vmem>>, vector<1x128xf32>
    %c0_13 = arith.constant 0 : index
    %c0_14 = arith.constant 0 : index
    %6 = vector.load %arg7[%c0_13, %c0_14] : memref<128x64xbf16, #tpu.memory_space<vmem>>, vector<128x64xbf16>
    %c0_15 = arith.constant 0 : index
    %c0_16 = arith.constant 0 : index
    %7 = vector.load %arg8[%c0_15, %c0_16] : memref<1x64xf32, #tpu.memory_space<vmem>>, vector<1x64xf32>
    %cst = arith.constant dense<0.000000e+00> : vector<16x128xf32>
    %8 = tpu.matmul %2, %4, %cst {dimension_numbers = #tpu.dot_dimension_numbers<[1], [0], [0], [1], [0, 0, 1, 1], [], []>} : vector<16x64xbf16>, vector<64x128xbf16>, vector<16x128xf32> -> vector<16x128xf32>
    %9 = vector.broadcast %5 : vector<1x128xf32> to vector<16x128xf32>
    %10 = arith.addf %8, %9 : vector<16x128xf32>
    %11 = arith.truncf %10 : vector<16x128xf32> to vector<16x128xbf16>
    %cst_17 = arith.constant dense<0.000000e+00> : vector<16x128xf32>
    %12 = tpu.matmul %0, %11, %cst_17 {dimension_numbers = #tpu.dot_dimension_numbers<[2], [1], [1], [], [0, 0, 0, 1], [0], [0]>} : vector<16x128x128xbf16>, vector<16x128xbf16>, vector<16x128xf32> -> vector<16x128xf32>
    %13 = tpu.iota {dimensions = array<i32: 1>} : vector<16x128xi32>
    %14 = vector.broadcast %1 : vector<16x1xi32> to vector<16x128xi32>
    %15 = arith.cmpi slt, %13, %14 : vector<16x128xi32>
    %cst_18 = arith.constant -1.000000e+30 : f32
    %16 = vector.broadcast %cst_18 : f32 to vector<16x128xf32>
    %17 = arith.select %15, %12, %16 : vector<16x128xi1>, vector<16x128xf32>
    %cst_19 = arith.constant dense<0xFF800000> : vector<16xf32>
    %18 = vector.multi_reduction <maximumf>, %17, %cst_19 [1] : vector<16x128xf32> to vector<16xf32>
    %19 = vector.shape_cast %18 : vector<16xf32> to vector<16x1xf32>
    %20 = vector.broadcast %19 : vector<16x1xf32> to vector<16x128xf32>
    %21 = arith.subf %17, %20 : vector<16x128xf32>
    %22 = math.exp %21 : vector<16x128xf32>
    %cst_20 = arith.constant dense<0.000000e+00> : vector<16xf32>
    %23 = vector.multi_reduction <add>, %22, %cst_20 [1] : vector<16x128xf32> to vector<16xf32>
    %24 = vector.shape_cast %23 : vector<16xf32> to vector<16x1xf32>
    %25 = tpu.reciprocal %24 {approx = true} : vector<16x1xf32> -> vector<16x1xf32>
    %26 = arith.truncf %22 : vector<16x128xf32> to vector<16x128xbf16>
    %cst_21 = arith.constant dense<0.000000e+00> : vector<16x128xf32>
    %27 = tpu.matmul %0, %26, %cst_21 {dimension_numbers = #tpu.dot_dimension_numbers<[1], [1], [2], [], [0, 0, 0, 2], [0], [0]>} : vector<16x128x128xbf16>, vector<16x128xbf16>, vector<16x128xf32> -> vector<16x128xf32>
    %28 = vector.broadcast %25 : vector<16x1xf32> to vector<16x128xf32>
    %29 = arith.mulf %27, %28 : vector<16x128xf32>
    %30 = arith.truncf %29 : vector<16x128xf32> to vector<16x128xbf16>
    %cst_22 = arith.constant dense<0.000000e+00> : vector<16x64xf32>
    %31 = tpu.matmul %30, %6, %cst_22 {dimension_numbers = #tpu.dot_dimension_numbers<[1], [0], [0], [1], [0, 0, 1, 1], [], []>} : vector<16x128xbf16>, vector<128x64xbf16>, vector<16x64xf32> -> vector<16x64xf32>
    %32 = vector.broadcast %7 : vector<1x64xf32> to vector<16x64xf32>
    %33 = arith.addf %31, %32 : vector<16x64xf32>
    %34 = arith.truncf %33 : vector<16x64xf32> to vector<16x64xbf16>
    %cst_23 = arith.constant dense<0.000000e+00> : vector<16x3xf32>
    %35 = tpu.matmul %3, %34, %cst_23 {dimension_numbers = #tpu.dot_dimension_numbers<[2], [1], [1], [], [0, 0, 0, 1], [0], [0]>} : vector<16x3x64xbf16>, vector<16x64xbf16>, vector<16x3xf32> -> vector<16x3xf32>
    %cst_24 = arith.constant dense<0xFF800000> : vector<16xf32>
    %36 = vector.multi_reduction <maximumf>, %35, %cst_24 [1] : vector<16x3xf32> to vector<16xf32>
    %37 = vector.shape_cast %36 : vector<16xf32> to vector<16x1xf32>
    %38 = vector.broadcast %37 : vector<16x1xf32> to vector<16x3xf32>
    %39 = arith.subf %35, %38 : vector<16x3xf32>
    %40 = math.exp %39 : vector<16x3xf32>
    %cst_25 = arith.constant dense<0.000000e+00> : vector<16xf32>
    %41 = vector.multi_reduction <add>, %40, %cst_25 [1] : vector<16x3xf32> to vector<16xf32>
    %42 = vector.shape_cast %41 : vector<16xf32> to vector<16x1xf32>
    %43 = math.log %42 : vector<16x1xf32>
    %44 = arith.addf %43, %37 : vector<16x1xf32>
    %45 = vector.broadcast %44 : vector<16x1xf32> to vector<16x3xf32>
    %46 = arith.subf %35, %45 : vector<16x3xf32>
    %47 = tpu.iota {dimensions = array<i32: 1>} : vector<16x3xi32>
    %48 = tpu.iota {dimensions = array<i32: 1>} : vector<16x128xi32>
    %cst_26 = arith.constant 0.000000e+00 : f32
    %49 = vector.broadcast %cst_26 : f32 to vector<16x128xf32>
    %c0_i32 = arith.constant 0 : i32
    %50 = vector.broadcast %c0_i32 : i32 to vector<16x3xi32>
    %51 = arith.cmpi eq, %47, %50 : vector<16x3xi32>
    %cst_27 = arith.constant 0.000000e+00 : f32
    %52 = vector.broadcast %cst_27 : f32 to vector<16x3xf32>
    %53 = arith.select %51, %46, %52 : vector<16x3xi1>, vector<16x3xf32>
    %cst_28 = arith.constant dense<0.000000e+00> : vector<16xf32>
    %54 = vector.multi_reduction <add>, %53, %cst_28 [1] : vector<16x3xf32> to vector<16xf32>
    %55 = vector.shape_cast %54 : vector<16xf32> to vector<16x1xf32>
    %c0_i32_29 = arith.constant 0 : i32
    %56 = vector.broadcast %c0_i32_29 : i32 to vector<16x128xi32>
    %57 = arith.cmpi eq, %48, %56 : vector<16x128xi32>
    %58 = vector.shape_cast %55 : vector<16x1xf32> to vector<16x1xf32>
    %59 = vector.broadcast %58 : vector<16x1xf32> to vector<16x128xf32>
    %60 = arith.select %57, %59, %49 : vector<16x128xi1>, vector<16x128xf32>
    %c1_i32 = arith.constant 1 : i32
    %61 = vector.broadcast %c1_i32 : i32 to vector<16x3xi32>
    %62 = arith.cmpi eq, %47, %61 : vector<16x3xi32>
    %cst_30 = arith.constant 0.000000e+00 : f32
    %63 = vector.broadcast %cst_30 : f32 to vector<16x3xf32>
    %64 = arith.select %62, %46, %63 : vector<16x3xi1>, vector<16x3xf32>
    %cst_31 = arith.constant dense<0.000000e+00> : vector<16xf32>
    %65 = vector.multi_reduction <add>, %64, %cst_31 [1] : vector<16x3xf32> to vector<16xf32>
    %66 = vector.shape_cast %65 : vector<16xf32> to vector<16x1xf32>
    %c1_i32_32 = arith.constant 1 : i32
    %67 = vector.broadcast %c1_i32_32 : i32 to vector<16x128xi32>
    %68 = arith.cmpi eq, %48, %67 : vector<16x128xi32>
    %69 = vector.shape_cast %66 : vector<16x1xf32> to vector<16x1xf32>
    %70 = vector.broadcast %69 : vector<16x1xf32> to vector<16x128xf32>
    %71 = arith.select %68, %70, %60 : vector<16x128xi1>, vector<16x128xf32>
    %c2_i32 = arith.constant 2 : i32
    %72 = vector.broadcast %c2_i32 : i32 to vector<16x3xi32>
    %73 = arith.cmpi eq, %47, %72 : vector<16x3xi32>
    %cst_33 = arith.constant 0.000000e+00 : f32
    %74 = vector.broadcast %cst_33 : f32 to vector<16x3xf32>
    %75 = arith.select %73, %46, %74 : vector<16x3xi1>, vector<16x3xf32>
    %cst_34 = arith.constant dense<0.000000e+00> : vector<16xf32>
    %76 = vector.multi_reduction <add>, %75, %cst_34 [1] : vector<16x3xf32> to vector<16xf32>
    %77 = vector.shape_cast %76 : vector<16xf32> to vector<16x1xf32>
    %c2_i32_35 = arith.constant 2 : i32
    %78 = vector.broadcast %c2_i32_35 : i32 to vector<16x128xi32>
    %79 = arith.cmpi eq, %48, %78 : vector<16x128xi32>
    %80 = vector.shape_cast %77 : vector<16x1xf32> to vector<16x1xf32>
    %81 = vector.broadcast %80 : vector<16x1xf32> to vector<16x128xf32>
    %82 = arith.select %79, %81, %71 : vector<16x128xi1>, vector<16x128xf32>
    %c0_36 = arith.constant 0 : index
    %c0_37 = arith.constant 0 : index
    %83 = vector.load %arg9[%c0_36, %c0_37] : memref<16x128xf32, #tpu.memory_space<vmem>>, vector<16x128xf32>
    tpu.vector_store %arg9[%c0_36, %c0_37], %82 {strides = array<i32>} : memref<16x128xf32, #tpu.memory_space<vmem>>, vector<16x128xf32>,
    return
  }
  func.func @transform_0(%arg0: i32) -> (i32, i32, i32) {
    %c0_i32 = arith.constant 0 : i32
    %c0_i32_0 = arith.constant 0 : i32
    %c0_i32_1 = arith.constant 0 : i32
    return %arg0, %c0_i32, %c0_i32_0 : i32, i32, i32
  }
  func.func @transform_1(%arg0: i32) -> (i32, i32) {
    %c0_i32 = arith.constant 0 : i32
    %c0_i32_0 = arith.constant 0 : i32
    return %arg0, %c0_i32 : i32, i32
  }
  func.func @transform_2(%arg0: i32) -> (i32, i32) {
    %c0_i32 = arith.constant 0 : i32
    %c0_i32_0 = arith.constant 0 : i32
    return %arg0, %c0_i32 : i32, i32
  }
  func.func @transform_3(%arg0: i32) -> (i32, i32, i32) {
    %c0_i32 = arith.constant 0 : i32
    %c0_i32_0 = arith.constant 0 : i32
    %c0_i32_1 = arith.constant 0 : i32
    return %arg0, %c0_i32, %c0_i32_0 : i32, i32, i32
  }
  func.func @transform_4(%arg0: i32) -> (i32, i32) {
    %c0_i32 = arith.constant 0 : i32
    %c0_i32_0 = arith.constant 0 : i32
    %c0_i32_1 = arith.constant 0 : i32
    return %c0_i32, %c0_i32_0 : i32, i32
  }
  func.func @transform_5(%arg0: i32) -> (i32, i32) {
    %c0_i32 = arith.constant 0 : i32
    %c0_i32_0 = arith.constant 0 : i32
    %c0_i32_1 = arith.constant 0 : i32
    return %c0_i32, %c0_i32_0 : i32, i32
  }
  func.func @transform_6(%arg0: i32) -> (i32, i32) {
    %c0_i32 = arith.constant 0 : i32
    %c0_i32_0 = arith.constant 0 : i32
    %c0_i32_1 = arith.constant 0 : i32
    return %c0_i32, %c0_i32_0 : i32, i32
  }
  func.func @transform_7(%arg0: i32) -> (i32, i32) {
    %c0_i32 = arith.constant 0 : i32
    %c0_i32_0 = arith.constant 0 : i32
    %c0_i32_1 = arith.constant 0 : i32
    return %c0_i32, %c0_i32_0 : i32, i32
  }
  func.func @transform_8(%arg0: i32) -> (i32, i32) {
    %c0_i32 = arith.constant 0 : i32
    %c0_i32_0 = arith.constant 0 : i32
    return %arg0, %c0_i32 : i32, i32
  }
}

module attributes {stable_mosaic.version = 11 : i64} {
  func.func @kernel(%arg0: i32, %arg1: memref<16x128x128xbf16, #tpu.memory_space<vmem>>, %arg2: memref<16x1xi32, #tpu.memory_space<vmem>>, %arg3: memref<16x64xbf16, #tpu.memory_space<vmem>>, %arg4: memref<16x3x64xbf16, #tpu.memory_space<vmem>>, %arg5: memref<64x128xbf16, #tpu.memory_space<vmem>>, %arg6: memref<1x128xf32, #tpu.memory_space<vmem>>, %arg7: memref<128x64xbf16, #tpu.memory_space<vmem>>, %arg8: memref<1x64xf32, #tpu.memory_space<vmem>>, %arg9: memref<16x128xf32, #tpu.memory_space<vmem>>) attributes {dimension_semantics = [#tpu.dimension_semantics<parallel>], iteration_bounds = array<i64: 2>, scalar_prefetch = 0 : i64, scratch_operands = 0 : i64, tpu.core_type = #tpu.core_type<tc>, window_params = [{transform_indices = @transform_0, window_bounds = array<i64: 16, 128, 128>}, {transform_indices = @transform_1, window_bounds = array<i64: 16, 1>}, {transform_indices = @transform_2, window_bounds = array<i64: 16, 64>}, {transform_indices = @transform_3, window_bounds = array<i64: 16, 3, 64>}, {pipeline_mode = #tpu.pipeline_mode<synchronous>, transform_indices = @transform_4, window_bounds = array<i64: 64, 128>}, {pipeline_mode = #tpu.pipeline_mode<synchronous>, transform_indices = @transform_5, window_bounds = array<i64: 1, 128>}, {pipeline_mode = #tpu.pipeline_mode<synchronous>, transform_indices = @transform_6, window_bounds = array<i64: 128, 64>}, {pipeline_mode = #tpu.pipeline_mode<synchronous>, transform_indices = @transform_7, window_bounds = array<i64: 1, 64>}, {transform_indices = @transform_8, window_bounds = array<i64: 16, 128>}]} {
    %c0 = arith.constant 0 : index
    %c0_0 = arith.constant 0 : index
    %c0_1 = arith.constant 0 : index
    %0 = vector.load %arg1[%c0, %c0_0, %c0_1] : memref<16x128x128xbf16, #tpu.memory_space<vmem>>, vector<16x128x128xbf16>
    %c0_2 = arith.constant 0 : index
    %c0_3 = arith.constant 0 : index
    %1 = vector.load %arg2[%c0_2, %c0_3] : memref<16x1xi32, #tpu.memory_space<vmem>>, vector<16x1xi32>
    %c0_4 = arith.constant 0 : index
    %c0_5 = arith.constant 0 : index
    %2 = vector.load %arg3[%c0_4, %c0_5] : memref<16x64xbf16, #tpu.memory_space<vmem>>, vector<16x64xbf16>
    %c0_6 = arith.constant 0 : index
    %c0_7 = arith.constant 0 : index
    %c0_8 = arith.constant 0 : index
    %3 = vector.load %arg4[%c0_6, %c0_7, %c0_8] : memref<16x3x64xbf16, #tpu.memory_space<vmem>>, vector<16x3x64xbf16>
    %c0_9 = arith.constant 0 : index
    %c0_10 = arith.constant 0 : index
    %4 = vector.load %arg5[%c0_9, %c0_10] : memref<64x128xbf16, #tpu.memory_space<vmem>>, vector<64x128xbf16>
    %c0_11 = arith.constant 0 : index
    %c0_12 = arith.constant 0 : index
    %5 = vector.load %arg6[%c0_11, %c0_12] : memref<1x128xf32, #tpu.memory_space<vmem>>, vector<1x128xf32>
    %c0_13 = arith.constant 0 : index
    %c0_14 = arith.constant 0 : index
    %6 = vector.load %arg7[%c0_13, %c0_14] : memref<128x64xbf16, #tpu.memory_space<vmem>>, vector<128x64xbf16>
    %c0_15 = arith.constant 0 : index
    %c0_16 = arith.constant 0 : index
    %7 = vector.load %arg8[%c0_15, %c0_16] : memref<1x64xf32, #tpu.memory_space<vmem>>, vector<1x64xf32>
    %cst = arith.constant dense<0.000000e+00> : vector<16x128xf32>
    %8 = tpu.matmul %2, %4, %cst {dimension_numbers = #tpu.dot_dimension_numbers<[1], [0], [0], [1], [0, 0, 1, 1], [], []>} : vector<16x64xbf16>, vector<64x128xbf16>, vector<16x128xf32> -> vector<16x128xf32>
    %9 = vector.broadcast %5 : vector<1x128xf32> to vector<16x128xf32>
    %10 = arith.addf %8, %9 : vector<16x128xf32>
    %11 = arith.truncf %10 : vector<16x128xf32> to vector<16x128xbf16>
    %12 = vector.shape_cast %11 : vector<16x128xbf16> to vector<16x1x128xbf16>
    "tpu.trace_start"() <{level = 10 : i32, message = "bqc,brc->bqr"}> : () -> ()
    %cst_17 = arith.constant dense<0.000000e+00> : vector<16x1x128xf32>
    %13 = tpu.matmul %12, %0, %cst_17 {dimension_numbers = #tpu.dot_dimension_numbers<[2], [2], [1], [1], [0, 0, 0, 1, 1, 1], [0], [0]>} : vector<16x1x128xbf16>, vector<16x128x128xbf16>, vector<16x1x128xf32> -> vector<16x1x128xf32>
    "tpu.trace_stop"() : () -> ()
    %14 = vector.shape_cast %13 : vector<16x1x128xf32> to vector<16x128xf32>
    %15 = tpu.iota {dimensions = array<i32: 1>} : vector<16x128xi32>
    %16 = vector.broadcast %1 : vector<16x1xi32> to vector<16x128xi32>
    %17 = arith.cmpi slt, %15, %16 : vector<16x128xi32>
    %cst_18 = arith.constant -1.000000e+30 : f32
    %18 = vector.broadcast %cst_18 : f32 to vector<16x128xf32>
    %19 = arith.select %17, %14, %18 : vector<16x128xi1>, vector<16x128xf32>
    %cst_19 = arith.constant dense<0xFF800000> : vector<16xf32>
    %20 = vector.multi_reduction <maximumf>, %19, %cst_19 [1] : vector<16x128xf32> to vector<16xf32>
    %21 = vector.shape_cast %20 : vector<16xf32> to vector<16x1xf32>
    %22 = vector.broadcast %21 : vector<16x1xf32> to vector<16x128xf32>
    %23 = arith.subf %19, %22 : vector<16x128xf32>
    %24 = math.exp %23 : vector<16x128xf32>
    %cst_20 = arith.constant dense<0.000000e+00> : vector<16xf32>
    %25 = vector.multi_reduction <add>, %24, %cst_20 [1] : vector<16x128xf32> to vector<16xf32>
    %26 = vector.shape_cast %25 : vector<16xf32> to vector<16x1xf32>
    %27 = tpu.reciprocal %26 {approx = true} : vector<16x1xf32> -> vector<16x1xf32>
    %28 = arith.truncf %24 : vector<16x128xf32> to vector<16x128xbf16>
    %29 = vector.shape_cast %28 : vector<16x128xbf16> to vector<16x1x128xbf16>
    "tpu.trace_start"() <{level = 10 : i32, message = "bqr,brc->bqc"}> : () -> ()
    %cst_21 = arith.constant dense<0.000000e+00> : vector<16x1x128xf32>
    %30 = tpu.matmul %29, %0, %cst_21 {dimension_numbers = #tpu.dot_dimension_numbers<[2], [1], [1], [2], [0, 0, 0, 1, 1, 2], [0], [0]>} : vector<16x1x128xbf16>, vector<16x128x128xbf16>, vector<16x1x128xf32> -> vector<16x1x128xf32>
    "tpu.trace_stop"() : () -> ()
    %31 = vector.shape_cast %30 : vector<16x1x128xf32> to vector<16x128xf32>
    %32 = vector.broadcast %27 : vector<16x1xf32> to vector<16x128xf32>
    %33 = arith.mulf %31, %32 : vector<16x128xf32>
    %34 = arith.truncf %33 : vector<16x128xf32> to vector<16x128xbf16>
    %cst_22 = arith.constant dense<0.000000e+00> : vector<16x64xf32>
    %35 = tpu.matmul %34, %6, %cst_22 {dimension_numbers = #tpu.dot_dimension_numbers<[1], [0], [0], [1], [0, 0, 1, 1], [], []>} : vector<16x128xbf16>, vector<128x64xbf16>, vector<16x64xf32> -> vector<16x64xf32>
    %36 = vector.broadcast %7 : vector<1x64xf32> to vector<16x64xf32>
    %37 = arith.addf %35, %36 : vector<16x64xf32>
    %38 = arith.truncf %37 : vector<16x64xf32> to vector<16x64xbf16>
    %39 = vector.shape_cast %38 : vector<16x64xbf16> to vector<16x1x64xbf16>
    "tpu.trace_start"() <{level = 10 : i32, message = "bqc,brc->bqr"}> : () -> ()
    %cst_23 = arith.constant dense<0.000000e+00> : vector<16x1x3xf32>
    %40 = tpu.matmul %39, %3, %cst_23 {dimension_numbers = #tpu.dot_dimension_numbers<[2], [2], [1], [1], [0, 0, 0, 1, 1, 1], [0], [0]>} : vector<16x1x64xbf16>, vector<16x3x64xbf16>, vector<16x1x3xf32> -> vector<16x1x3xf32>
    "tpu.trace_stop"() : () -> ()
    %41 = vector.shape_cast %40 : vector<16x1x3xf32> to vector<16x3xf32>
    %cst_24 = arith.constant dense<0xFF800000> : vector<16xf32>
    %42 = vector.multi_reduction <maximumf>, %41, %cst_24 [1] : vector<16x3xf32> to vector<16xf32>
    %43 = vector.shape_cast %42 : vector<16xf32> to vector<16x1xf32>
    %44 = vector.broadcast %43 : vector<16x1xf32> to vector<16x3xf32>
    %45 = arith.subf %41, %44 : vector<16x3xf32>
    %46 = math.exp %45 : vector<16x3xf32>
    %cst_25 = arith.constant dense<0.000000e+00> : vector<16xf32>
    %47 = vector.multi_reduction <add>, %46, %cst_25 [1] : vector<16x3xf32> to vector<16xf32>
    %48 = vector.shape_cast %47 : vector<16xf32> to vector<16x1xf32>
    %49 = math.log %48 : vector<16x1xf32>
    %50 = arith.addf %49, %43 : vector<16x1xf32>
    %51 = vector.broadcast %50 : vector<16x1xf32> to vector<16x3xf32>
    %52 = arith.subf %41, %51 : vector<16x3xf32>
    %53 = tpu.iota {dimensions = array<i32: 1>} : vector<16x3xi32>
    %54 = tpu.iota {dimensions = array<i32: 1>} : vector<16x128xi32>
    %cst_26 = arith.constant 0.000000e+00 : f32
    %55 = vector.broadcast %cst_26 : f32 to vector<16x128xf32>
    %c0_i32 = arith.constant 0 : i32
    %56 = vector.broadcast %c0_i32 : i32 to vector<16x3xi32>
    %57 = arith.cmpi eq, %53, %56 : vector<16x3xi32>
    %cst_27 = arith.constant 0.000000e+00 : f32
    %58 = vector.broadcast %cst_27 : f32 to vector<16x3xf32>
    %59 = arith.select %57, %52, %58 : vector<16x3xi1>, vector<16x3xf32>
    %cst_28 = arith.constant dense<0.000000e+00> : vector<16xf32>
    %60 = vector.multi_reduction <add>, %59, %cst_28 [1] : vector<16x3xf32> to vector<16xf32>
    %61 = vector.shape_cast %60 : vector<16xf32> to vector<16x1xf32>
    %c0_i32_29 = arith.constant 0 : i32
    %62 = vector.broadcast %c0_i32_29 : i32 to vector<16x128xi32>
    %63 = arith.cmpi eq, %54, %62 : vector<16x128xi32>
    %64 = vector.shape_cast %61 : vector<16x1xf32> to vector<16x1xf32>
    %65 = vector.broadcast %64 : vector<16x1xf32> to vector<16x128xf32>
    %66 = arith.select %63, %65, %55 : vector<16x128xi1>, vector<16x128xf32>
    %c1_i32 = arith.constant 1 : i32
    %67 = vector.broadcast %c1_i32 : i32 to vector<16x3xi32>
    %68 = arith.cmpi eq, %53, %67 : vector<16x3xi32>
    %cst_30 = arith.constant 0.000000e+00 : f32
    %69 = vector.broadcast %cst_30 : f32 to vector<16x3xf32>
    %70 = arith.select %68, %52, %69 : vector<16x3xi1>, vector<16x3xf32>
    %cst_31 = arith.constant dense<0.000000e+00> : vector<16xf32>
    %71 = vector.multi_reduction <add>, %70, %cst_31 [1] : vector<16x3xf32> to vector<16xf32>
    %72 = vector.shape_cast %71 : vector<16xf32> to vector<16x1xf32>
    %c1_i32_32 = arith.constant 1 : i32
    %73 = vector.broadcast %c1_i32_32 : i32 to vector<16x128xi32>
    %74 = arith.cmpi eq, %54, %73 : vector<16x128xi32>
    %75 = vector.shape_cast %72 : vector<16x1xf32> to vector<16x1xf32>
    %76 = vector.broadcast %75 : vector<16x1xf32> to vector<16x128xf32>
    %77 = arith.select %74, %76, %66 : vector<16x128xi1>, vector<16x128xf32>
    %c2_i32 = arith.constant 2 : i32
    %78 = vector.broadcast %c2_i32 : i32 to vector<16x3xi32>
    %79 = arith.cmpi eq, %53, %78 : vector<16x3xi32>
    %cst_33 = arith.constant 0.000000e+00 : f32
    %80 = vector.broadcast %cst_33 : f32 to vector<16x3xf32>
    %81 = arith.select %79, %52, %80 : vector<16x3xi1>, vector<16x3xf32>
    %cst_34 = arith.constant dense<0.000000e+00> : vector<16xf32>
    %82 = vector.multi_reduction <add>, %81, %cst_34 [1] : vector<16x3xf32> to vector<16xf32>
    %83 = vector.shape_cast %82 : vector<16xf32> to vector<16x1xf32>
    %c2_i32_35 = arith.constant 2 : i32
    %84 = vector.broadcast %c2_i32_35 : i32 to vector<16x128xi32>
    %85 = arith.cmpi eq, %54, %84 : vector<16x128xi32>
    %86 = vector.shape_cast %83 : vector<16x1xf32> to vector<16x1xf32>
    %87 = vector.broadcast %86 : vector<16x1xf32> to vector<16x128xf32>
    %88 = arith.select %85, %87, %77 : vector<16x128xi1>, vector<16x128xf32>
    %c0_36 = arith.constant 0 : index
    %c0_37 = arith.constant 0 : index
    %89 = vector.load %arg9[%c0_36, %c0_37] : memref<16x128xf32, #tpu.memory_space<vmem>>, vector<16x128xf32>
    tpu.vector_store %arg9[%c0_36, %c0_37], %88 {strides = array<i32>} : memref<16x128xf32, #tpu.memory_space<vmem>>, vector<16x128xf32>,
    return
  }
  func.func @transform_0(%arg0: i32) -> (i32, i32, i32) {
    %c0_i32 = arith.constant 0 : i32
    %c0_i32_0 = arith.constant 0 : i32
    %c0_i32_1 = arith.constant 0 : i32
    return %arg0, %c0_i32, %c0_i32_0 : i32, i32, i32
  }
  func.func @transform_1(%arg0: i32) -> (i32, i32) {
    %c0_i32 = arith.constant 0 : i32
    %c0_i32_0 = arith.constant 0 : i32
    return %arg0, %c0_i32 : i32, i32
  }
  func.func @transform_2(%arg0: i32) -> (i32, i32) {
    %c0_i32 = arith.constant 0 : i32
    %c0_i32_0 = arith.constant 0 : i32
    return %arg0, %c0_i32 : i32, i32
  }
  func.func @transform_3(%arg0: i32) -> (i32, i32, i32) {
    %c0_i32 = arith.constant 0 : i32
    %c0_i32_0 = arith.constant 0 : i32
    %c0_i32_1 = arith.constant 0 : i32
    return %arg0, %c0_i32, %c0_i32_0 : i32, i32, i32
  }
  func.func @transform_4(%arg0: i32) -> (i32, i32) {
    %c0_i32 = arith.constant 0 : i32
    %c0_i32_0 = arith.constant 0 : i32
    %c0_i32_1 = arith.constant 0 : i32
    return %c0_i32, %c0_i32_0 : i32, i32
  }
  func.func @transform_5(%arg0: i32) -> (i32, i32) {
    %c0_i32 = arith.constant 0 : i32
    %c0_i32_0 = arith.constant 0 : i32
    %c0_i32_1 = arith.constant 0 : i32
    return %c0_i32, %c0_i32_0 : i32, i32
  }
  func.func @transform_6(%arg0: i32) -> (i32, i32) {
    %c0_i32 = arith.constant 0 : i32
    %c0_i32_0 = arith.constant 0 : i32
    %c0_i32_1 = arith.constant 0 : i32
    return %c0_i32, %c0_i32_0 : i32, i32
  }
  func.func @transform_7(%arg0: i32) -> (i32, i32) {
    %c0_i32 = arith.constant 0 : i32
    %c0_i32_0 = arith.constant 0 : i32
    %c0_i32_1 = arith.constant 0 : i32
    return %c0_i32, %c0_i32_0 : i32, i32
  }
  func.func @transform_8(%arg0: i32) -> (i32, i32) {
    %c0_i32 = arith.constant 0 : i32
    %c0_i32_0 = arith.constant 0 : i32
    return %arg0, %c0_i32 : i32, i32
  }
}

</mosaic_0001>

<bundles_post_ra>
// kernel: tpu_custom_call.1
= control target key start
LH: loop header
LB: loop body
LE: loop exit
PB: predicated region body
PF: predicated region fallthrough
CT: control target
= control target key end

     0   :  { %13 = vsyncpa [#allocation3], 0  ;;  %s8030_s0 = inlined_call_operand.hbm [shape: bf16[32,128,128], index: 0, kind: input, shape index: {}]   ;;  %s8031_s1 = inlined_call_operand.vmem [shape: s32[32,1], index: 1, kind: input, shape index: {}]   ;;  %s8032_s2 = inlined_call_operand.vmem [shape: bf16[32,64], index: 2, kind: input, shape index: {}]   ;;  %s8033_s3 = inlined_call_operand.vmem [shape: bf16[32,3,64], index: 3, kind: input, shape index: {}]   ;;  %s8034_s4 = inlined_call_operand.vmem [shape: bf16[64,128], index: 4, kind: input, shape index: {}]   ;;  %s8035_s5 = inlined_call_operand.vmem [shape: f32[1,128], index: 5, kind: input, shape index: {}]   ;;  %s8036_s6 = inlined_call_operand.vmem [shape: bf16[128,64], index: 6, kind: input, shape index: {}]   ;;  %s8037_s7 = inlined_call_operand.vmem [shape: f32[1,64], index: 7, kind: input, shape index: {}]   ;;  %s8038_s8 = inlined_call_operand.hbm [shape: f32[32,128], index: 8, kind: output, shape index: {}]  }
   0x1   :  { %15 = vsyncpa [#allocation3 + $0x1], 0 }
   0x2   :  { %16 = vsyncpa [#allocation4], 0 }
   0x3   :  { %18 = vsyncpa [#allocation4 + $0x1], 0  ;;  %s6553_s27 = smov 0   ;;  %s6555_s28 = smov 0  }
   0x4   :  { %s6557_s29 = smov 0   ;;  %s6559_s30 = smov 0  }
   0x5 LB: > { %s6574_s9 = sadd.s32 4294967295, %s6496_s30   ;;  %s4778_s10 = sadd.s32 4294967294, %s6496_s30   ;;  %s6496_s30 = sphi %s6559_s30, %s8103_s30   ;;  %s6492_s29 = sphi %s6557_s29, %s8102_s29   ;;  %s6488_s28 = sphi %s6555_s28, %s8101_s28   ;;  %s6484_s27 = sphi %s6553_s27, %s8100_s27  }
   0x6   : > { %s6578_s11 = sadd.s32 1, %s6496_s30   ;;  %s31_s12 = sadd.s32 1, %s6492_s29 }
   0x7   : > { %s28_s13 = ssub.s32 %s6496_s30, %s6578_s11  ;;  %p38_p0 = scmp.ne.s32.totalorder %s6492_s29, %s6488_s28 }
   0x8   : > { %p29_p1 = scmp.eq.s32.totalorder %s28_s13, 0  ;;  %p39_p2 = scmp.eq.s32.totalorder %s6496_s30, 0 }
   0x9   : > { %p44_p3 = scmp.ne.s32.totalorder %s6488_s28, %s6484_s27  ;;  %p45_p4 = scmp.eq.s32.totalorder %s6574_s9, 0 }
   0xa   : > { %s6590_s14 = scalar_select %p29_p1, %s6492_s29, %s31_s12  }
   0xb   : > { %p6592_p5 = por %p39_p2, %p38_p0  ;;  %p6596_p6 = por %p45_p4, %p44_p3 }
   0xc   : > { %8058 = sst [smem:[#allocation8_spill]] %s6590_s14  ;;  %p230_p7 = scmp.eq.s32.totalorder %s6574_s9, 1 }
   0xd   : > { %s8060_s16 = scalar_select %p6596_p6, 1, 0 }
   0xe   : > { %p236_p8 = scmp.eq.s32.totalorder %s4778_s10, 1  ;;  %p6103_p10 = scmp.lt.s32.totalorder %s6496_s30, 2 }
   0xf   : > { %p6603_p11 = por %p230_p7, %p38_p0  ;;  %s268_s19 = sand.u32 1, %s6492_s29  }
  0x10   : > { %p6607_p12 = por %p236_p8, %p44_p3  ;;  %s4987_s20 = sshll.u32 %s6496_s30, 14 }
  0x11   : > { %s8061_s17 = scalar_select %p6603_p11, 1, 0 }
  0x12   : > { %s8062_s18 = scalar_select %p6607_p12, 1, 0 }
  0x13   : > { %s4781_s21 = sshll.u32 %s268_s19, 10  ;;  %s6616_s24 = scalar_lea.hbm %s8030_s0, %s4987_s20 }
  0x14   : > { %s272_s25 = scalar_lea.vmem [#allocation2], %s4781_s21  ;;  %p6620_p13 = pnand %p6103_p10, %p6592_p5 }
  0x15   : > { %s280_s26 = sshll.u32 %s272_s25, 4  ;;  %s6626_s12 = scalar_lea.sflag [#allocation3], %s268_s19  ;;  %s6624_s26 = int_to_ptr.vmem [resolvable:$true] %s280_s26 }
  0x16   : > { %s6404_s13 = scalar_lea.hbm %s6616_s24, 16384  ;;  %p6406_p1 = pneg %p6620_p13 }
  0x17   : > { %p6405_p0 = scmp.ne.s32.totalorder %s6616_s24, %s6404_s13  ;;  %s6409_s21 = scalar_lea.hbm %s8030_s0, 32768 }
  0x18   : > { %p6410_p4 = scmp.lt.s32.totalorder %s6616_s24, %s8030_s0  ;;  %p6411_p5 = scmp.lt.s32.totalorder %s6409_s21, %s6404_s13 }
  0x19   : > { %p6407_p2 = pnand %p6406_p1, %p6405_p0 }
  0x1a   : > { %p6412_p7 = por %p6411_p5, %p6410_p4 }
  0x1b   : > { %p6408_p3 = pneg %p6407_p2 }
  0x1d   : > { %p6413_p8 = pnand %p6412_p7, %p6408_p3 }
  0x1f   : > { %6416 = shalt.err (!%p6413_p8)
}
  0x20   : > { %s6417_s19 = scalar_lea.vmem %s6624_s26, 16384  ;;  %s6498_s25 = smov [#allocation2]  }
  0x21   : > { %p6418_p10 = scmp.ne.s32.totalorder %s6624_s26, %s6417_s19  ;;  %s6422_s14 = sshll.u32 %s6498_s25, 4  ;;  %s6423_s14 = int_to_ptr.vmem [resolvable:$false] %s6422_s14 }
  0x22   : > { %s6424_s20 = scalar_lea.vmem %s6423_s14, 32768  ;;  %p6425_p2 = scmp.lt.s32.totalorder %s6624_s26, %s6423_s14 }
  0x23   : > { %p6420_p9 = pnand %p6418_p10, %p6406_p1  ;;  %p6426_p12 = scmp.lt.s32.totalorder %s6424_s20, %s6417_s19 }
  0x25   : > { %p6421_p0 = pneg %p6420_p9  ;;  %p6427_p11 = por %p6426_p12, %p6425_p2 }
  0x27   : > { %p6428_p6 = pnand %p6427_p11, %p6421_p0 }
  0x29   : > { %6431 = shalt.err (!%p6428_p6)
}
  0x2a   : > { %s6499_s13 = smov 64   ;;  %s6500_s22 = smov 4  }
  0x2b   : > { %6098 = dma.hbm_to_vmem [thread:$0]  (!%p6620_p13), %s6616_s24, 16384, %s6624_s26, %s6626_s12, %s6499_s13, %s6499_s13, %s6500_s22  }
  0x2c   : > { %p4785_p9 = scmp.ge.s32.totalorder %s6496_s30, 1  ;;  %p315_p1 = scmp.lt.s32.totalorder %s6496_s30, 3 }
  0x2e   : > { %p316_p3 = pnand %p4785_p9, %p315_p1 }
  0x30   : > { %319 = sbr.rel (%p316_p3) target bundleno = 2494 (0x9be), region = 52 }
  0x35   : > { %s6650_s14 = sand.u32 1, %s6488_s28   ;;  %p8064_p6 = scmp.ne.s32.totalorder %s8060_s16, 0 }
  0x36   : > { %s4786_s21 = sshll.u32 %s6650_s14, 10  ;;  %s322_s15 = scalar_lea.sflag [#allocation3], %s6650_s14 }
  0x37   : > { %s6654_s23 = scalar_lea.vmem [#allocation2], %s4786_s21 }
  0x38   : > { %6475 = dma.done.wait (%p8064_p6), %s322_s15, 16384  }
  0x39   : > { %6477 = vsyncadd (%p8064_p6), %s322_s15, 4294950912  ;;  %s4788_s24 = sshll.u32 %s6574_s9, 1  ;;  %v8053_v0 = vmov 0.0   ;;  %vm6502_vm0 = vmmov 0   ;;  %v6146_v1 = vld [vmem:[%s8034_s4 + $0x18] sm:$0xff]   ;;  %v6147_v2 = vld [vmem:[%s8034_s4 + $0x10] sm:$0xff]   ;;  %v782_v24 = vlaneseq }
  0x3a   : > { %5323 = vmatprep.subr.bf16.mxu0 %v8053_v0  ;;  %5331 = vmatprep.mubr.msk.bf16.mxu0 %vm6502_vm0, %v8053_v0  ;;  %p375_p11 = scmp.lt.s32.totalorder %s4788_s24, 3  ;;  %v6151_v3 = vld [vmem:[%s6654_s23 + $0x38] sm:$0xff]   ;;  %v6148_v4 = vld [vmem:[%s8034_s4 + $0x8] sm:$0xff]   ;;  %v6149_v5 = vld [vmem:[%s8034_s4] sm:$0xff]   ;;  %vm731_vm1 = vcmask 523264   ;;  %vm2374_vm2 = vcmask 1041409  }
  0x3b   : > { %5335 = vmatprep.subr.bf16.mxu1 %v8053_v0  ;;  %5351 = vmatprep.mubr.msk.bf16.mxu1 %vm6502_vm0, %v8053_v0  ;;  %v6153_v6 = vld [vmem:[%s6654_s23 + $0x30] sm:$0xff]   ;;  %v6152_v8 = vld [vmem:[%s6654_s23 + $0x78] sm:$0xff]   ;;  %v6155_v9 = vld [vmem:[%s6654_s23 + $0x28] sm:$0xff]   ;;  %v6503_v22 = vmov 1966171168   ;;  %v783_v27 = vshrl.u32 %v782_v24, 7 }
  0x3c   : > { %s8105_s24 = smov (!%p375_p11, %s4788_s24), 3  ;;  %5324 = vmatpush3.bf16.msra.mxu0 %v6146_v1  ;;  %5336 = vmatpush3.bf16.xpose.msra.mxu1 %v6151_v3  ;;  %v6154_v10 = vld [vmem:[%s6654_s23 + $0x70] sm:$0xff]   ;;  %v6157_v11 = vld [vmem:[%s6654_s23 + $0x20] sm:$0xff]   ;;  %v6156_v12 = vld [vmem:[%s6654_s23 + $0x68] sm:$0xff]   ;;  %v780_v23 = vunpack.c.l.s4 %v6503_v22  ;;  %vm2377_vm3 = vcmask 1042434   ;;  %vm2380_vm4 = vcmask 1043459  }
  0x3d   : > { %s4791_s10 = sshll.u32 %s8105_s24, 2  ;;  %5325 = vmatprep.subr.bf16.mxu0 %v8053_v0  ;;  %5337 = vmatprep.subr.bf16.mxu1 %v8053_v0  ;;  %v6159_v13 = vld [vmem:[%s6654_s23 + $0x18] sm:$0xff]   ;;  %v6158_v14 = vld [vmem:[%s6654_s23 + $0x60] sm:$0xff]   ;;  %v6161_v15 = vld [vmem:[%s6654_s23 + $0x10] sm:$0xff]   ;;  %v6737_v38 = vsub.s32 0, %v783_v27  ;;  %s4789_s12 = sshll.u32 %s8105_s24, 3 }
  0x3e   : > { %s384_s13 = scalar_lea.vmem %s8032_s2, %s4791_s10  ;;  %v6160_v16 = vld [vmem:[%s6654_s23 + $0x58] sm:$0xff]   ;;  %v6162_v17 = vld [vmem:[%s6654_s23 + $0x50] sm:$0xff]   ;;  %v6163_v18 = vld [vmem:[%s6654_s23 + $0x8] sm:$0xff]   ;;  %v781_v26 = vunpack.c.0.s8 %v780_v23  ;;  %s6842_s20 = scalar_lea.vmem %s8031_s1, %s4789_s12  ;;  %vm2383_vm5 = vcmask 1044484   ;;  %vm2386_vm6 = vcmask 1045509   ;;  %vm2389_vm7 = vcmask 1046534  }
  0x3f   : > { %v6150_v7 = vld [vmem:[%s384_s13] sm:$0xff]   ;;  %v6164_v19 = vld [vmem:[%s6654_s23 + $0x48] sm:$0xff]   ;;  %v6167_v41 = vld [vmem:[%s6654_s23 + $0xb8] sm:$0xff]   ;;  %vm2392_vm8 = vcmask 1047559   ;;  %s4792_s22 = sshll.u32 %s6574_s9, 4  ;;  %vm4381_vm11 = vcmask 23552  }
  0x40   : > { %5326 = vmatpush3.bf16.msra.mxu0 %v6147_v2  ;;  %v6165_v20 = vld [vmem:[%s6654_s23] sm:$0xff]   ;;  %v6730_v33 = vsub.s32 %v781_v26, %v783_v27  ;;  %v6168_v44 = vld [vmem:[%s6654_s23 + $0xf8] sm:$0xff]   ;;  %v6169_v46 = vld [vmem:[%s6654_s23 + $0xb0] sm:$0xff]   ;;  %p387_p12 = scmp.lt.s32.totalorder %s4792_s22, 31  ;;  %s4787_s19 = sshll.u32 %s6650_s14, 4 }
  0x41   : > { %5327 = vmatprep.subr.bf16.mxu0 %v8053_v0  ;;  %v6166_v21 = vld [vmem:[%s6654_s23 + $0x40] sm:$0xff]   ;;  %v6170_v47 = vld [vmem:[%s6654_s23 + $0xf0] sm:$0xff]   ;;  %v6171_v48 = vld [vmem:[%s6654_s23 + $0xa8] sm:$0xff]   ;;  %s372_s25 = scalar_lea.vmem [#allocation5], %s4787_s19  ;;  %p8096_p4 = scmp.ne.s32.totalorder %s8061_s17, 0 }
  0x42   : > { %v4794_v28 = vld [vmem:[%s8035_s5] ss:$0 sm:$0xff]  ;;  %v6172_v49 = vld [vmem:[%s6654_s23 + $0xe8] sm:$0xff]   ;;  %v6175_v52 = vld [vmem:[%s6654_s23 + $0x98] sm:$0xff]   ;;  %s8107_s22 = smov (!%p387_p12, %s4792_s22), 31  ;;  %s6505_s15 = smov [#allocation5]  }
  0x43   : > { %v6173_v50 = vld [vmem:[%s6654_s23 + $0xa0] sm:$0xff]   ;;  %v6176_v53 = vld [vmem:[%s6654_s23 + $0xd8] sm:$0xff]   ;;  %v6177_v54 = vld [vmem:[%s6654_s23 + $0x90] sm:$0xff]   ;;  %s4793_s21 = sshll.u32 %s8107_s22, 1  ;;  %s6436_s16 = sshll.u32 %s6505_s15, 4  ;;  %s6437_s16 = int_to_ptr.vmem [resolvable:$false] %s6436_s16 }
  0x44   : > { %5328 = vmatpush3.bf16.msra.mxu0 %v6148_v4  ;;  %5338 = vmatpush3.bf16.xpose.msra.mxu1 %v6153_v6  ;;  %v6174_v51 = vld [vmem:[%s6654_s23 + $0xe0] sm:$0xff]   ;;  %v6178_v55 = vld [vmem:[%s6654_s23 + $0xd0] sm:$0xff]   ;;  %v6179_v56 = vld [vmem:[%s6654_s23 + $0x88] sm:$0xff]   ;;  %s7665_s26 = scalar_lea.vmem %s8033_s3, %s4793_s21 }
  0x45   : > { %5329 = vmatprep.subr.bf16.mxu0 %v8053_v0  ;;  %5339 = vmatprep.subr.bf16.mxu1 %v8053_v0  ;;  %v6180_v57 = vld [vmem:[%s6654_s23 + $0xc8] sm:$0xff]   ;;  %v6181_v60 = vld [vmem:[%s6654_s23 + $0x80] sm:$0xff]   ;;  %v6183_v2 = vld [vmem:[%s6654_s23 + $0x138] sm:$0xff]  }
  0x46   : > { %v6182_v61 = vld [vmem:[%s6654_s23 + $0xc0] sm:$0xff]   ;;  %v6184_v4 = vld [vmem:[%s6654_s23 + $0x178] sm:$0xff]   ;;  %v6185_v6 = vld [vmem:[%s6654_s23 + $0x130] sm:$0xff]  }
  0x47   : > { %v6200_v27 = vld [vmem:[%s6654_s23 + $0x1f8] sm:$0xff]  }
  0x48   : > { %5330 = vmatpush3.bf16.msra.mxu0 %v6149_v5 }
  0x49   : > { %5355 = vmatprep.subr.bf16.mxu0 %v8053_v0 }
  0x4b   : > { %5332 = vmatmul.mubr.msk.bf16.vlgmr.msra.gmra.mxu0 %vm731_vm1, %v6150_v7  ;;  %v6186_v7 = vld [vmem:[%s6654_s23 + $0x170] sm:$0xff]  }
  0x4c   : > { %5356 = vmatpush3.bf16.xpose.msra.mxu0 %v6152_v8  ;;  %5371 = vmatprep.mubr.msk.bf16.mxu0 %vm6502_vm0, %v8053_v0  ;;  %v6187_v8 = vld [vmem:[%s6654_s23 + $0x128] sm:$0xff]  }
  0x4d   : > { %5357 = vmatprep.subr.bf16.mxu0 %v8053_v0  ;;  %5340 = vmatpush3.bf16.xpose.msra.mxu1 %v6155_v9  ;;  %v6188_v9 = vld [vmem:[%s6654_s23 + $0x168] sm:$0xff]  }
  0x4e   : > { %5341 = vmatprep.subr.bf16.mxu1 %v8053_v0 }
  0x54   : > { %5358 = vmatpush3.bf16.xpose.msra.mxu0 %v6154_v10  ;;  %v6189_v10 = vld [vmem:[%s6654_s23 + $0x120] sm:$0xff]  }
  0x55   : > { %5359 = vmatprep.subr.bf16.mxu0 %v8053_v0  ;;  %5342 = vmatpush3.bf16.xpose.msra.mxu1 %v6157_v11  ;;  %v6190_v11 = vld [vmem:[%s6654_s23 + $0x160] sm:$0xff]  }
  0x56   : > { %5343 = vmatprep.subr.bf16.mxu1 %v8053_v0 }
  0x5c   : > { %5360 = vmatpush3.bf16.xpose.msra.mxu0 %v6156_v12  ;;  %v6191_v12 = vld [vmem:[%s6654_s23 + $0x118] sm:$0xff]  }
  0x5d   : > { %5361 = vmatprep.subr.bf16.mxu0 %v8053_v0  ;;  %5344 = vmatpush3.bf16.xpose.msra.mxu1 %v6159_v13  ;;  %v6192_v13 = vld [vmem:[%s6654_s23 + $0x158] sm:$0xff]  }
  0x5e   : > { %5345 = vmatprep.subr.bf16.mxu1 %v8053_v0 }
  0x64   : > { %5362 = vmatpush3.bf16.xpose.msra.mxu0 %v6158_v14  ;;  %v6193_v14 = vld [vmem:[%s6654_s23 + $0x110] sm:$0xff]  }
  0x65   : > { %5363 = vmatprep.subr.bf16.mxu0 %v8053_v0  ;;  %5346 = vmatpush3.bf16.xpose.msra.mxu1 %v6161_v15  ;;  %v6194_v15 = vld [vmem:[%s6654_s23 + $0x150] sm:$0xff]  }
  0x66   : > { %5347 = vmatprep.subr.bf16.mxu1 %v8053_v0 }
  0x6c   : > { %5364 = vmatpush3.bf16.xpose.msra.mxu0 %v6160_v16  ;;  %v6195_v16 = vld [vmem:[%s6654_s23 + $0x108] sm:$0xff]  }
  0x6d   : > { %5365 = vmatprep.subr.bf16.mxu0 %v8053_v0  ;;  %5348 = vmatpush3.bf16.xpose.msra.mxu1 %v6163_v18 }
  0x6e   : > { %5349 = vmatprep.subr.bf16.mxu1 %v8053_v0 }
  0x74   : > { %5366 = vmatpush3.bf16.xpose.msra.mxu0 %v6162_v17  ;;  %v6196_v17 = vld [vmem:[%s6654_s23 + $0x148] sm:$0xff]  }
  0x75   : > { %5367 = vmatprep.subr.bf16.mxu0 %v8053_v0  ;;  %5350 = vmatpush3.bf16.xpose.msra.mxu1 %v6165_v20  ;;  %v6198_v20 = vld [vmem:[%s6654_s23 + $0x140] sm:$0xff]  }
  0x76   : > { %5375 = vmatprep.subr.bf16.mxu1 %v8053_v0 }
  0x7c   : > { %5368 = vmatpush3.bf16.xpose.msra.mxu0 %v6164_v19  ;;  %v6197_v19 = vld [vmem:[%s6654_s23 + $0x100] sm:$0xff]  }
  0x7d   : > { %5369 = vmatprep.subr.bf16.mxu0 %v8053_v0 }
  0x84   : > { %5370 = vmatpush3.bf16.xpose.msra.mxu0 %v6166_v21 }
  0x85   : > { %5395 = vmatprep.subr.bf16.mxu0 %v8053_v0 }
 0x10b   : > { %v769_v25 = vpop.f32.mrf.mxu0 }
 0x10c   : > { %v770_v31 = vadd.f32 %v4794_v28, %v769_v25  ;;  %v6199_v25 = vld [vmem:[%s6654_s23 + $0x1b8] sm:$0xff]  }
 0x10d   : > { %v5333_v29 = vpop.f32.mrf.mxu0 }
 0x10e   : > { %v6201_v29 = vld [vmem:[%s6654_s23 + $0x1b0] sm:$0xff]  }
 0x10f   : > { %v772_v30 = vpop.f32.mrf.mxu0 }
 0x110   : > { %v6728_v32 = vadd.f32 %v4794_v28, %v772_v30  ;;  %v6202_v30 = vld [vmem:[%s6654_s23 + $0x1f0] sm:$0xff]  }
 0x111   : > { %v5334_v34 = vpop.f32.mrf.mxu0 }
 0x112   : > { %v776_v35 = vpack.c.bf16 %v6728_v32, %v770_v31  ;;  %v6504_v31 = vmov 0   ;;  %v650_v34 = vld [vmem:[%s6842_s20] sm:$0xff] }
 0x113   : > { %6145 = vset.pattern.permute.xlu0 %v6504_v31 }
 0x114   : > { %v785_v36 = vrot.slane %v776_v35, %v6730_v33  ;;  %2350 = vperm.xlu0 %6145, %v650_v34   ;;  %v6203_v35 = vld [vmem:[%s6654_s23 + $0x1a8] sm:$0xff]  }
 0x116   : > { %v6735_v37 = vrot.slane %v785_v36, %v6730_v33  ;;  %v793_v58 = vcombine.high %v785_v36, %v785_v36  ;;  %v6204_v36 = vld [vmem:[%s6654_s23 + $0x1e8] sm:$0xff]  }
 0x118   : > { %v4802_v39 = vpack.i.b16 %v6735_v37, %v6735_v37  ;;  %v828_v40 = vunpack.i.h.s16 %v6735_v37  ;;  %v6776_v59 = vrot.slane %v793_v58, %v6730_v33  ;;  %v823_v18 = vcombine.high %v6735_v37, %v6735_v37  ;;  %v6205_v37 = vld [vmem:[%s6654_s23 + $0x1a0] sm:$0xff]  }
 0x11a   : > { %v847_v42 = vrot.slane %v4802_v39, %v6737_v38  ;;  %v937_v43 = vpack.i.b16 %v828_v40, %v828_v40  ;;  %v830_v62 = vunpack.i.h.s16 %v6776_v59  ;;  %v4819_v63 = vpack.i.b16 %v6776_v59, %v6776_v59  ;;  %v6206_v39 = vld [vmem:[%s6654_s23 + $0x1e0] sm:$0xff]   ;;  %v6207_v40 = vld [vmem:[%s6654_s23 + $0x198] sm:$0xff]  }
 0x11b   : > { %v832_v21 = vunpack.i.h.s16 %v823_v18  ;;  %v4836_v22 = vpack.i.b16 %v823_v18, %v823_v18  ;;  %v6938_v18 = vld [vmem:[%s6654_s23 + $0x240] sm:$0xff]  }
 0x11c   : > { %5352 = vmatmul.mubr.bf16.vlgmr.msra.gmra.mxu1 %v847_v42  ;;  %v941_v45 = vrot.slane %v937_v43, %v6737_v38  ;;  %v1125_v1 = vpack.i.b16 %v830_v62, %v830_v62  ;;  %v1035_v3 = vrot.slane %v4819_v63, %v6737_v38  ;;  %v6209_v42 = vld [vmem:[%s6654_s23 + $0x190] sm:$0xff]  }
 0x11d   : > { %5376 = vmatpush3.bf16.xpose.msra.mxu1 %v6167_v41  ;;  %5391 = vmatprep.mubr.msk.bf16.mxu1 %vm6502_vm0, %v8053_v0  ;;  %v1313_v23 = vpack.i.b16 %v832_v21, %v832_v21  ;;  %v1223_v26 = vrot.slane %v4836_v22, %v6737_v38  ;;  %v6208_v41 = vld [vmem:[%s6654_s23 + $0x1d8] sm:$0xff]   ;;  %v6210_v43 = vld [vmem:[%s6654_s23 + $0x1d0] sm:$0xff]  }
 0x11e   : > { %5372 = vmatmul.mubr.bf16.vlgmr.msra.gmra.mxu0 %v941_v45  ;;  %5377 = vmatprep.subr.bf16.mxu1 %v8053_v0  ;;  %v1129_v5 = vrot.slane %v1125_v1, %v6737_v38  ;;  %v6212_v45 = vld [vmem:[%s6654_s23 + $0x1c8] sm:$0xff]   ;;  %v6217_v63 = vld [vmem:[%s6654_s23 + $0x230] sm:$0xff]   ;;  %v6948_v22 = vld [vmem:[%s6654_s23 + $0x2b8] sm:$0xff]  }
 0x11f   : > { %5396 = vmatpush3.bf16.xpose.msra.mxu0 %v6168_v44  ;;  %5411 = vmatprep.mubr.msk.bf16.mxu0 %vm6502_vm0, %v8053_v0  ;;  %v1317_v28 = vrot.slane %v1313_v23, %v6737_v38  ;;  %v6211_v44 = vld [vmem:[%s6654_s23 + $0x188] sm:$0xff]  }
 0x120   : > { %5397 = vmatprep.subr.bf16.mxu0 %v8053_v0 }
 0x125   : > { %5378 = vmatpush3.bf16.xpose.msra.mxu1 %v6169_v46  ;;  %v825_v46 = vcombine.high %v6776_v59, %v6776_v59 }
 0x126   : > { %5379 = vmatprep.subr.bf16.mxu1 %v8053_v0 }
 0x127   : > { %5398 = vmatpush3.bf16.xpose.msra.mxu0 %v6170_v47  ;;  %v6213_v47 = vld [vmem:[%s6654_s23 + $0x180] sm:$0xff]  }
 0x128   : > { %5399 = vmatprep.subr.bf16.mxu0 %v8053_v0 }
 0x12d   : > { %5380 = vmatpush3.bf16.xpose.msra.mxu1 %v6171_v48  ;;  %v6214_v48 = vld [vmem:[%s6654_s23 + $0x1c0] sm:$0xff]  }
 0x12e   : > { %5381 = vmatprep.subr.bf16.mxu1 %v8053_v0 }
 0x12f   : > { %5400 = vmatpush3.bf16.xpose.msra.mxu0 %v6172_v49  ;;  %v834_v49 = vunpack.i.h.s16 %v825_v46 }
 0x130   : > { %5401 = vmatprep.subr.bf16.mxu0 %v8053_v0 }
 0x135   : > { %5382 = vmatpush3.bf16.xpose.msra.mxu1 %v6173_v50  ;;  %v4853_v50 = vpack.i.b16 %v825_v46, %v825_v46  ;;  %v6989_v46 = vld [vmem:[%s6654_s23 + $0x2a0] sm:$0xff]  }
 0x136   : > { %5383 = vmatprep.subr.bf16.mxu1 %v8053_v0 }
 0x137   : > { %5402 = vmatpush3.bf16.xpose.msra.mxu0 %v6174_v51  ;;  %v1501_v51 = vpack.i.b16 %v834_v49, %v834_v49  ;;  %v7002_v49 = vld [vmem:[%s6654_s23 + $0x2d8] sm:$0xff]  }
 0x138   : > { %5403 = vmatprep.subr.bf16.mxu0 %v8053_v0 }
 0x13d   : > { %5384 = vmatpush3.bf16.xpose.msra.mxu1 %v6175_v52  ;;  %v6215_v52 = vld [vmem:[%s6654_s23 + $0x238] sm:$0xff]  }
 0x13e   : > { %5385 = vmatprep.subr.bf16.mxu1 %v8053_v0 }
 0x13f   : > { %5404 = vmatpush3.bf16.xpose.msra.mxu0 %v6176_v53  ;;  %v1411_v53 = vrot.slane %v4853_v50, %v6737_v38  ;;  %v7009_v50 = vld [vmem:[%s6654_s23 + $0x290] sm:$0xff]  }
 0x140   : > { %5405 = vmatprep.subr.bf16.mxu0 %v8053_v0 }
 0x145   : > { %5386 = vmatpush3.bf16.xpose.msra.mxu1 %v6177_v54  ;;  %v6216_v54 = vld [vmem:[%s6654_s23 + $0x278] sm:$0xff]  }
 0x146   : > { %5387 = vmatprep.subr.bf16.mxu1 %v8053_v0 }
 0x147   : > { %5406 = vmatpush3.bf16.xpose.msra.mxu0 %v6178_v55 }
 0x148   : > { %5407 = vmatprep.subr.bf16.mxu0 %v8053_v0 }
 0x14d   : > { %5388 = vmatpush3.bf16.xpose.msra.mxu1 %v6179_v56  ;;  %v1505_v56 = vrot.slane %v1501_v51, %v6737_v38  ;;  %v7012_v51 = vld [vmem:[%s6654_s23 + $0x2d0] sm:$0xff]  }
 0x14e   : > { %5389 = vmatprep.subr.bf16.mxu1 %v8053_v0 }
 0x14f   : > { %5408 = vmatpush3.bf16.xpose.msra.mxu0 %v6180_v57 }
 0x150   : > { %5409 = vmatprep.subr.bf16.mxu0 %v8053_v0 }
 0x155   : > { %5390 = vmatpush3.bf16.xpose.msra.mxu1 %v6181_v60 }
 0x156   : > { %5415 = vmatprep.subr.bf16.mxu1 %v8053_v0 }
 0x157   : > { %5410 = vmatpush3.bf16.xpose.msra.mxu0 %v6182_v61 }
 0x158   : > { %5435 = vmatprep.subr.bf16.mxu0 %v8053_v0 }
 0x15c   : > { %5392 = vmatmul.mubr.bf16.vlgmr.msra.gmra.mxu1 %v1035_v3  ;;  %v6218_v3 = vld [vmem:[%s6654_s23 + $0x270] sm:$0xff]  }
 0x15d   : > { %5416 = vmatpush3.bf16.xpose.msra.mxu1 %v6183_v2  ;;  %5431 = vmatprep.mubr.msk.bf16.mxu1 %vm6502_vm0, %v8053_v0 }
 0x15e   : > { %5412 = vmatmul.mubr.bf16.vlgmr.msra.gmra.mxu0 %v1129_v5  ;;  %5417 = vmatprep.subr.bf16.mxu1 %v8053_v0  ;;  %v6219_v5 = vld [vmem:[%s6654_s23 + $0x228] sm:$0xff]  }
 0x15f   : > { %5436 = vmatpush3.bf16.xpose.msra.mxu0 %v6184_v4  ;;  %5451 = vmatprep.mubr.msk.bf16.mxu0 %vm6502_vm0, %v8053_v0 }
 0x160   : > { %5437 = vmatprep.subr.bf16.mxu0 %v8053_v0 }
 0x165   : > { %5418 = vmatpush3.bf16.xpose.msra.mxu1 %v6185_v6  ;;  %v6220_v6 = vld [vmem:[%s6654_s23 + $0x268] sm:$0xff]  }
 0x166   : > { %5419 = vmatprep.subr.bf16.mxu1 %v8053_v0 }
 0x167   : > { %5438 = vmatpush3.bf16.xpose.msra.mxu0 %v6186_v7  ;;  %v6221_v7 = vld [vmem:[%s6654_s23 + $0x220] sm:$0xff]  }
 0x168   : > { %5439 = vmatprep.subr.bf16.mxu0 %v8053_v0 }
 0x16d   : > { %5420 = vmatpush3.bf16.xpose.msra.mxu1 %v6187_v8  ;;  %v6222_v8 = vld [vmem:[%s6654_s23 + $0x260] sm:$0xff]  }
 0x16e   : > { %5421 = vmatprep.subr.bf16.mxu1 %v8053_v0 }
 0x16f   : > { %5440 = vmatpush3.bf16.xpose.msra.mxu0 %v6188_v9  ;;  %v6899_v9 = vld [vmem:[%s6654_s23 + $0x218] sm:$0xff]  }
 0x170   : > { %5441 = vmatprep.subr.bf16.mxu0 %v8053_v0 }
 0x175   : > { %5422 = vmatpush3.bf16.xpose.msra.mxu1 %v6189_v10  ;;  %v6224_v10 = vld [vmem:[%s6654_s23 + $0x258] sm:$0xff]  }
 0x176   : > { %5423 = vmatprep.subr.bf16.mxu1 %v8053_v0 }
 0x177   : > { %5442 = vmatpush3.bf16.xpose.msra.mxu0 %v6190_v11  ;;  %v6906_v11 = vld [vmem:[%s6654_s23 + $0x210] sm:$0xff]  }
 0x178   : > { %5443 = vmatprep.subr.bf16.mxu0 %v8053_v0 }
 0x17d   : > { %5424 = vmatpush3.bf16.xpose.msra.mxu1 %v6191_v12  ;;  %v6909_v12 = vld [vmem:[%s6654_s23 + $0x250] sm:$0xff]  }
 0x17e   : > { %5425 = vmatprep.subr.bf16.mxu1 %v8053_v0 }
 0x17f   : > { %5444 = vmatpush3.bf16.xpose.msra.mxu0 %v6192_v13  ;;  %v4801_v13 = vpack.c.bf16 %v6728_v32, %v6728_v32 }
 0x180   : > { %5445 = vmatprep.subr.bf16.mxu0 %v8053_v0 }
 0x185   : > { %5426 = vmatpush3.bf16.xpose.msra.mxu1 %v6193_v14  ;;  %v6918_v14 = vld [vmem:[%s6654_s23 + $0x208] sm:$0xff]  }
 0x186   : > { %5427 = vmatprep.subr.bf16.mxu1 %v8053_v0 }
 0x187   : > { %5446 = vmatpush3.bf16.xpose.msra.mxu0 %v6194_v15  ;;  %v6921_v15 = vld [vmem:[%s6654_s23 + $0x248] sm:$0xff]  }
 0x188   : > { %5447 = vmatprep.subr.bf16.mxu0 %v8053_v0 }
 0x18d   : > { %5428 = vmatpush3.bf16.xpose.msra.mxu1 %v6195_v16  ;;  %v6924_v16 = vrot.slane %v4801_v13, %v6730_v33  ;;  %v7070_v13 = vld [vmem:[%s6654_s23 + $0x370] sm:$0xff]  }
 0x18e   : > { %5429 = vmatprep.subr.bf16.mxu1 %v8053_v0 }
 0x18f   : > { %5448 = vmatpush3.bf16.xpose.msra.mxu0 %v6196_v17  ;;  %v6931_v32 = vrot.slane %v6924_v16, %v6730_v33  ;;  %v6935_v17 = vld [vmem:[%s6654_s23 + $0x200] sm:$0xff]  }
 0x190   : > { %5449 = vmatprep.subr.bf16.mxu0 %v8053_v0 }
 0x195   : > { %5430 = vmatpush3.bf16.xpose.msra.mxu1 %v6197_v19  ;;  %v836_v19 = vunpack.i.h.s16 %v6931_v32 }
 0x196   : > { %5455 = vmatprep.subr.bf16.mxu1 %v8053_v0 }
 0x197   : > { %5450 = vmatpush3.bf16.xpose.msra.mxu0 %v6198_v20  ;;  %v4870_v20 = vpack.i.b16 %v6931_v32, %v6931_v32  ;;  %v1689_v21 = vpack.i.b16 %v836_v19, %v836_v19  ;;  %v7077_v19 = vld [vmem:[%s6654_s23 + $0x328] sm:$0xff]  }
 0x198   : > { %5475 = vmatprep.subr.bf16.mxu0 %v8053_v0 }
 0x199   : > { %v1599_v23 = vrot.slane %v4870_v20, %v6737_v38  ;;  %v7080_v20 = vld [vmem:[%s6654_s23 + $0x368] sm:$0xff]  }
 0x19c   : > { %5432 = vmatmul.mubr.bf16.vlgmr.msra.gmra.mxu1 %v1223_v26 }
 0x19d   : > { %5456 = vmatpush3.bf16.xpose.msra.mxu1 %v6199_v25  ;;  %5471 = vmatprep.mubr.msk.bf16.mxu1 %vm6502_vm0, %v8053_v0  ;;  %v6952_v25 = vld [vmem:[%s6654_s23 + $0x2f8] sm:$0xff]  }
 0x19e   : > { %5452 = vmatmul.mubr.bf16.vlgmr.msra.gmra.mxu0 %v1317_v28  ;;  %5457 = vmatprep.subr.bf16.mxu1 %v8053_v0 }
 0x19f   : > { %5476 = vmatpush3.bf16.xpose.msra.mxu0 %v6200_v27  ;;  %5491 = vmatprep.mubr.msk.bf16.mxu0 %vm6502_vm0, %v8053_v0  ;;  %v1693_v27 = vrot.slane %v1689_v21, %v6737_v38  ;;  %v7087_v21 = vld [vmem:[%s6654_s23 + $0x320] sm:$0xff]  }
 0x1a0   : > { %5477 = vmatprep.subr.bf16.mxu0 %v8053_v0 }
 0x1a5   : > { %5458 = vmatpush3.bf16.xpose.msra.mxu1 %v6201_v29 }
 0x1a6   : > { %5459 = vmatprep.subr.bf16.mxu1 %v8053_v0 }
 0x1a7   : > { %5478 = vmatpush3.bf16.xpose.msra.mxu0 %v6202_v30 }
 0x1a8   : > { %5479 = vmatprep.subr.bf16.mxu0 %v8053_v0 }
 0x1ad   : > { %5460 = vmatpush3.bf16.xpose.msra.mxu1 %v6203_v35 }
 0x1ae   : > { %5461 = vmatprep.subr.bf16.mxu1 %v8053_v0 }
 0x1af   : > { %5480 = vmatpush3.bf16.xpose.msra.mxu0 %v6204_v36 }
 0x1b0   : > { %5481 = vmatprep.subr.bf16.mxu0 %v8053_v0 }
 0x1b5   : > { %5462 = vmatpush3.bf16.xpose.msra.mxu1 %v6205_v37 }
 0x1b6   : > { %5463 = vmatprep.subr.bf16.mxu1 %v8053_v0 }
 0x1b7   : > { %5482 = vmatpush3.bf16.xpose.msra.mxu0 %v6206_v39  ;;  %v6969_v39 = vld [vmem:[%s6654_s23 + $0x2b0] sm:$0xff]  }
 0x1b8   : > { %5483 = vmatprep.subr.bf16.mxu0 %v8053_v0 }
 0x1bd   : > { %5464 = vmatpush3.bf16.xpose.msra.mxu1 %v6207_v40 }
 0x1be   : > { %5465 = vmatprep.subr.bf16.mxu1 %v8053_v0 }
 0x1bf   : > { %5484 = vmatpush3.bf16.xpose.msra.mxu0 %v6208_v41 }
 0x1c0   : > { %5485 = vmatprep.subr.bf16.mxu0 %v8053_v0 }
 0x1c5   : > { %5466 = vmatpush3.bf16.xpose.msra.mxu1 %v6209_v42  ;;  %v6972_v42 = vld [vmem:[%s6654_s23 + $0x2f0] sm:$0xff]  }
 0x1c6   : > { %5467 = vmatprep.subr.bf16.mxu1 %v8053_v0 }
 0x1c7   : > { %5486 = vmatpush3.bf16.xpose.msra.mxu0 %v6210_v43 }
 0x1c8   : > { %5487 = vmatprep.subr.bf16.mxu0 %v8053_v0 }
 0x1cd   : > { %5468 = vmatpush3.bf16.xpose.msra.mxu1 %v6211_v44  ;;  %v6979_v44 = vld [vmem:[%s6654_s23 + $0x2a8] sm:$0xff]  }
 0x1ce   : > { %5469 = vmatprep.subr.bf16.mxu1 %v8053_v0 }
 0x1cf   : > { %5488 = vmatpush3.bf16.xpose.msra.mxu0 %v6212_v45  ;;  %v6982_v45 = vld [vmem:[%s6654_s23 + $0x2e8] sm:$0xff]  }
 0x1d0   : > { %5489 = vmatprep.subr.bf16.mxu0 %v8053_v0 }
 0x1d5   : > { %5470 = vmatpush3.bf16.xpose.msra.mxu1 %v6213_v47  ;;  %v6992_v47 = vld [vmem:[%s6654_s23 + $0x2e0] sm:$0xff]  }
 0x1d6   : > { %5495 = vmatprep.subr.bf16.mxu1 %v8053_v0 }
 0x1d7   : > { %5490 = vmatpush3.bf16.xpose.msra.mxu0 %v6214_v48  ;;  %v6999_v48 = vld [vmem:[%s6654_s23 + $0x298] sm:$0xff]  }
 0x1d8   : > { %5515 = vmatprep.subr.bf16.mxu0 %v8053_v0 }
 0x1dc   : > { %5472 = vmatmul.mubr.bf16.vlgmr.msra.gmra.mxu1 %v1411_v53  ;;  %v931_v55 = vpop.f32.mrf.mxu1  ;;  %v7022_v53 = vld [vmem:[%s6654_s23 + $0x2c8] sm:$0xff]  }
 0x1dd   : > { %5496 = vmatpush3.bf16.xpose.msra.mxu1 %v6215_v52  ;;  %5511 = vmatprep.mubr.msk.bf16.mxu1 %vm6502_vm0, %v8053_v0  ;;  %v7019_v52 = vld [vmem:[%s6654_s23 + $0x288] sm:$0xff]  }
 0x1de   : > { %5492 = vmatmul.mubr.bf16.vlgmr.msra.gmra.mxu0 %v1505_v56  ;;  %v5353_v57 = vpop.f32.mrf.mxu1  ;;  %v1025_v58 = vpop.f32.mrf.mxu0  ;;  %5497 = vmatprep.subr.bf16.mxu1 %v8053_v0  ;;  %v7034_v56 = vld [vmem:[%s6654_s23 + $0x280] sm:$0xff]  }
 0x1df   : > { %v2373_v59 = vrot.slane %v1025_v58, 7  ;;  %5516 = vmatpush3.bf16.xpose.msra.mxu0 %v6216_v54  ;;  %5531 = vmatprep.mubr.msk.bf16.mxu0 %vm6502_vm0, %v8053_v0  ;;  %v794_v54 = vcombine.high %v6924_v16, %v6924_v16  ;;  %v7037_v57 = vld [vmem:[%s6654_s23 + $0x2c0] sm:$0xff]  }
 0x1e0   : > { %v934_v60 = vpop.f32.mrf.mxu1  ;;  %v5373_v61 = vpop.f32.mrf.mxu0  ;;  %5517 = vmatprep.subr.bf16.mxu0 %v8053_v0 }
 0x1e1   : > { %v6884_v62 = vsel %vm2374_vm2, %v2373_v59, %v931_v55  ;;  %v7030_v55 = vrot.slane %v794_v54, %v6730_v33  ;;  %v7047_v61 = vld [vmem:[%s6654_s23 + $0x338] sm:$0xff]  }
 0x1e2   : > { %v5354_v1 = vpop.f32.mrf.mxu1  ;;  %v1028_v2 = vpop.f32.mrf.mxu0 }
 0x1e3   : > { %v838_v58 = vunpack.i.h.s16 %v7030_v55  ;;  %v4887_v59 = vpack.i.b16 %v7030_v55, %v7030_v55 }
 0x1e4   : > { %v5374_v4 = vpop.f32.mrf.mxu0 }
 0x1e5   : > { %5498 = vmatpush3.bf16.xpose.msra.mxu1 %v6217_v63  ;;  %v1877_v60 = vpack.i.b16 %v838_v58, %v838_v58  ;;  %v7051_v63 = vld [vmem:[%s6654_s23 + $0x378] sm:$0xff]  }
 0x1e6   : > { %5499 = vmatprep.subr.bf16.mxu1 %v8053_v0 }
 0x1e7   : > { %5518 = vmatpush3.bf16.xpose.msra.mxu0 %v6218_v3  ;;  %v1881_v2 = vrot.slane %v1877_v60, %v6737_v38 }
 0x1e8   : > { %5519 = vmatprep.subr.bf16.mxu0 %v8053_v0 }
 0x1ed   : > { %5500 = vmatpush3.bf16.xpose.msra.mxu1 %v6219_v5 }
 0x1ee   : > { %5501 = vmatprep.subr.bf16.mxu1 %v8053_v0 }
 0x1ef   : > { %5520 = vmatpush3.bf16.xpose.msra.mxu0 %v6220_v6 }
 0x1f0   : > { %5521 = vmatprep.subr.bf16.mxu0 %v8053_v0 }
 0x1f5   : > { %5502 = vmatpush3.bf16.xpose.msra.mxu1 %v6221_v7  ;;  %v7067_v7 = vld [vmem:[%s6654_s23 + $0x330] sm:$0xff]  }
 0x1f6   : > { %5503 = vmatprep.subr.bf16.mxu1 %v8053_v0 }
 0x1f7   : > { %5522 = vmatpush3.bf16.xpose.msra.mxu0 %v6222_v8 }
 0x1f8   : > { %5523 = vmatprep.subr.bf16.mxu0 %v8053_v0 }
 0x1fd   : > { %5504 = vmatpush3.bf16.xpose.msra.mxu1 %v6899_v9 }
 0x1fe   : > { %5505 = vmatprep.subr.bf16.mxu1 %v8053_v0 }
 0x1ff   : > { %5524 = vmatpush3.bf16.xpose.msra.mxu0 %v6224_v10 }
 0x200   : > { %5525 = vmatprep.subr.bf16.mxu0 %v8053_v0 }
 0x205   : > { %5506 = vmatpush3.bf16.xpose.msra.mxu1 %v6906_v11 }
 0x206   : > { %5507 = vmatprep.subr.bf16.mxu1 %v8053_v0 }
 0x207   : > { %5526 = vmatpush3.bf16.xpose.msra.mxu0 %v6909_v12 }
 0x208   : > { %5527 = vmatprep.subr.bf16.mxu0 %v8053_v0 }
 0x20d   : > { %5508 = vmatpush3.bf16.xpose.msra.mxu1 %v6918_v14 }
 0x20e   : > { %5509 = vmatprep.subr.bf16.mxu1 %v8053_v0 }
 0x20f   : > { %5528 = vmatpush3.bf16.xpose.msra.mxu0 %v6921_v15 }
 0x210   : > { %5529 = vmatprep.subr.bf16.mxu0 %v8053_v0 }
 0x215   : > { %5510 = vmatpush3.bf16.xpose.msra.mxu1 %v6935_v17 }
 0x216   : > { %5535 = vmatprep.subr.bf16.mxu1 %v8053_v0 }
 0x217   : > { %5530 = vmatpush3.bf16.xpose.msra.mxu0 %v6938_v18 }
 0x218   : > { %5555 = vmatprep.subr.bf16.mxu0 %v8053_v0 }
 0x21c   : > { %v1119_v26 = vpop.f32.mrf.mxu1  ;;  %5512 = vmatmul.mubr.bf16.vlgmr.msra.gmra.mxu1 %v1599_v23  ;;  %v7090_v23 = vld [vmem:[%s6654_s23 + $0x360] sm:$0xff]  }
 0x21d   : > { %v2376_v28 = vrot.slane %v1119_v26, 6  ;;  %5536 = vmatpush3.bf16.xpose.msra.mxu1 %v6948_v22  ;;  %5551 = vmatprep.mubr.msk.bf16.mxu1 %vm6502_vm0, %v8053_v0  ;;  %v7097_v26 = vld [vmem:[%s6654_s23 + $0x318] sm:$0xff]  }
 0x21e   : > { %v5393_v29 = vpop.f32.mrf.mxu1  ;;  %v1213_v30 = vpop.f32.mrf.mxu0  ;;  %5532 = vmatmul.mubr.bf16.vlgmr.msra.gmra.mxu0 %v1693_v27  ;;  %5537 = vmatprep.subr.bf16.mxu1 %v8053_v0  ;;  %v7100_v27 = vld [vmem:[%s6654_s23 + $0x358] sm:$0xff]  }
 0x21f   : > { %v2378_v31 = vsel %vm2377_vm3, %v2376_v28, %v6884_v62  ;;  %v2379_v34 = vrot.slane %v1213_v30, 5  ;;  %5556 = vmatpush3.bf16.xpose.msra.mxu0 %v6952_v25  ;;  %5571 = vmatprep.mubr.msk.bf16.mxu0 %vm6502_vm0, %v8053_v0  ;;  %v1787_v62 = vrot.slane %v4887_v59, %v6737_v38  ;;  %v7107_v28 = vld [vmem:[%s6654_s23 + $0x310] sm:$0xff]   ;;  %v7117_v30 = vld [vmem:[%s6654_s23 + $0x308] sm:$0xff]  }
 0x220   : > { %v1122_v35 = vpop.f32.mrf.mxu1  ;;  %v5413_v36 = vpop.f32.mrf.mxu0  ;;  %5557 = vmatprep.subr.bf16.mxu0 %v8053_v0  ;;  %v7110_v29 = vld [vmem:[%s6654_s23 + $0x350] sm:$0xff]  }
 0x221   : > { %v6966_v37 = vsel %vm2380_vm4, %v2379_v34, %v2378_v31  ;;  %v7120_v31 = vld [vmem:[%s6654_s23 + $0x348] sm:$0xff]   ;;  %v824_v34 = vcombine.high %v6931_v32, %v6931_v32  ;;  %v7129_v35 = vld [vmem:[%s6654_s23 + $0x300] sm:$0xff]   ;;  %v7140_v32 = vld [vmem:[%s6654_s23 + $0x3b8] sm:$0xff]  }
 0x222   : > { %v5394_v40 = vpop.f32.mrf.mxu1  ;;  %v1216_v41 = vpop.f32.mrf.mxu0  ;;  %v7132_v36 = vld [vmem:[%s6654_s23 + $0x340] sm:$0xff]  }
 0x223   : > { %v840_v40 = vunpack.i.h.s16 %v824_v34  ;;  %v4904_v41 = vpack.i.b16 %v824_v34, %v824_v34 }
 0x224   : > { %v5414_v43 = vpop.f32.mrf.mxu0 }
 0x225   : > { %5538 = vmatpush3.bf16.xpose.msra.mxu1 %v6969_v39  ;;  %v2065_v54 = vpack.i.b16 %v840_v40, %v840_v40  ;;  %v1975_v59 = vrot.slane %v4904_v41, %v6737_v38  ;;  %v7166_v41 = vld [vmem:[%s6654_s23 + $0x3b0] sm:$0xff]  }
 0x226   : > { %5539 = vmatprep.subr.bf16.mxu1 %v8053_v0  ;;  %8066 = vst [vmem:[#allocation10_spill] sm:$0xff] %v7166_v41 }
 0x227   : > { %5558 = vmatpush3.bf16.xpose.msra.mxu0 %v6972_v42 }
 0x228   : > { %5559 = vmatprep.subr.bf16.mxu0 %v8053_v0 }
 0x22d   : > { %5540 = vmatpush3.bf16.xpose.msra.mxu1 %v6979_v44 }
 0x22e   : > { %5541 = vmatprep.subr.bf16.mxu1 %v8053_v0 }
 0x22f   : > { %5560 = vmatpush3.bf16.xpose.msra.mxu0 %v6982_v45 }
 0x230   : > { %5561 = vmatprep.subr.bf16.mxu0 %v8053_v0 }
 0x235   : > { %5542 = vmatpush3.bf16.xpose.msra.mxu1 %v6989_v46 }
 0x236   : > { %5543 = vmatprep.subr.bf16.mxu1 %v8053_v0 }
 0x237   : > { %5562 = vmatpush3.bf16.xpose.msra.mxu0 %v6992_v47 }
 0x238   : > { %5563 = vmatprep.subr.bf16.mxu0 %v8053_v0 }
 0x23d   : > { %5544 = vmatpush3.bf16.xpose.msra.mxu1 %v6999_v48 }
 0x23e   : > { %5545 = vmatprep.subr.bf16.mxu1 %v8053_v0 }
 0x23f   : > { %5564 = vmatpush3.bf16.xpose.msra.mxu0 %v7002_v49 }
 0x240   : > { %5565 = vmatprep.subr.bf16.mxu0 %v8053_v0 }
 0x245   : > { %5546 = vmatpush3.bf16.xpose.msra.mxu1 %v7009_v50 }
 0x246   : > { %5547 = vmatprep.subr.bf16.mxu1 %v8053_v0 }
 0x247   : > { %5566 = vmatpush3.bf16.xpose.msra.mxu0 %v7012_v51 }
 0x248   : > { %5567 = vmatprep.subr.bf16.mxu0 %v8053_v0 }
 0x24d   : > { %5548 = vmatpush3.bf16.xpose.msra.mxu1 %v7019_v52 }
 0x24e   : > { %5549 = vmatprep.subr.bf16.mxu1 %v8053_v0 }
 0x24f   : > { %5568 = vmatpush3.bf16.xpose.msra.mxu0 %v7022_v53 }
 0x250   : > { %5569 = vmatprep.subr.bf16.mxu0 %v8053_v0 }
 0x255   : > { %5550 = vmatpush3.bf16.xpose.msra.mxu1 %v7034_v56 }
 0x256   : > { %5575 = vmatprep.subr.bf16.mxu1 %v8053_v0 }
 0x257   : > { %5570 = vmatpush3.bf16.xpose.msra.mxu0 %v7037_v57 }
 0x258   : > { %5595 = vmatprep.subr.bf16.mxu0 %v8053_v0 }
 0x25c   : > { %v7053_v1 = vpop.f32.mrf.mxu1  ;;  %5552 = vmatmul.mubr.bf16.vlgmr.msra.gmra.mxu1 %v1787_v62  ;;  %v7147_v62 = vld [vmem:[%s6654_s23 + $0x3f8] sm:$0xff]  }
 0x25d   : > { %5576 = vmatpush3.bf16.xpose.msra.mxu1 %v7047_v61  ;;  %5591 = vmatprep.mubr.msk.bf16.mxu1 %vm6502_vm0, %v8053_v0  ;;  %v2382_v43 = vrot.slane %v7053_v1, 4  ;;  %8065 = vst [vmem:[#allocation9_spill] sm:$0xff] %v7147_v62  ;;  %v7150_v1 = vand.u32 127, %v782_v24 }
 0x25e   : > { %v5433_v3 = vpop.f32.mrf.mxu1  ;;  %v7059_v4 = vpop.f32.mrf.mxu0  ;;  %5572 = vmatmul.mubr.bf16.vlgmr.msra.gmra.mxu0 %v1881_v2  ;;  %5577 = vmatprep.subr.bf16.mxu1 %v8053_v0 }
 0x25f   : > { %5596 = vmatpush3.bf16.xpose.msra.mxu0 %v7051_v63  ;;  %5611 = vmatprep.mubr.msk.bf16.mxu0 %vm6502_vm0, %v8053_v0  ;;  %v2385_v58 = vrot.slane %v7059_v4, 3  ;;  %v2384_v60 = vsel %vm2383_vm5, %v2382_v43, %v6966_v37  ;;  %v2069_v3 = vrot.slane %v2065_v54, %v6737_v38  ;;  %v651_v43 = vld [vmem:[%s6842_s20 + $0x8] sm:$0xff]  ;;  %vm4574_vm12 = vcmp.eq.s32.totalorder %v7150_v1, 0  ;;  %s4669_s20 = sshll.u32 %s372_s25, 4  ;;  %s7972_s20 = int_to_ptr.vmem [resolvable:$true] %s4669_s20 }
 0x260   : > { %v1310_v5 = vpop.f32.mrf.mxu1  ;;  %v5453_v6 = vpop.f32.mrf.mxu0  ;;  %5597 = vmatprep.subr.bf16.mxu0 %v8053_v0  ;;  %2353 = vperm.xlu0 %6145, %v651_v43   ;;  %v7232_v43 = vld [vmem:[%s6654_s23 + $0x380] sm:$0xff]   ;;  %vm4631_vm13 = vcmp.eq.s32.totalorder %v7150_v1, 1  ;;  %vm4642_vm14 = vcmp.eq.s32.totalorder %v7150_v1, 2  ;;  %s6432_s21 = scalar_lea.vmem %s7972_s20, 256  ;;  %p6439_p8 = scmp.lt.s32.totalorder %s7972_s20, %s6437_s16 }
 0x261   : > { %v2351_v5 = vpop.permute.xlu0 %2350  ;;  %v2387_v37 = vsel %vm2386_vm6, %v2385_v58, %v2384_v60  ;;  %v7173_v60 = vld [vmem:[%s6654_s23 + $0x3f0] sm:$0xff]   ;;  %8078 = vst [vmem:[#allocation22_spill] sm:$0xff] %v7232_v43  ;;  %p6433_p13 = scmp.ne.s32.totalorder %s7972_s20, %s6432_s21 }
 0x262   : > { %v5434_v8 = vpop.f32.mrf.mxu1  ;;  %v1404_v10 = vpop.f32.mrf.mxu0  ;;  %vm2355_vm9 = vcmp.lt.s32.totalorder %v7150_v1, %v2351_v5  ;;  %8067 = vst [vmem:[#allocation11_spill] sm:$0xff] %v7173_v60  ;;  %v7183_v5 = vld [vmem:[%s6654_s23 + $0x3e8] sm:$0xff]  }
 0x263   : > { %8069 = vst [vmem:[#allocation13_spill] sm:$0xff] %v7183_v5  ;;  %p6434_p5 = pnand %p6433_p13, %p8096_p4 }
 0x264   : > { %v5454_v16 = vpop.f32.mrf.mxu0 }
 0x265   : > { %5578 = vmatpush3.bf16.xpose.msra.mxu1 %v7067_v7  ;;  %p6435_p7 = pneg %p6434_p5 }
 0x266   : > { %5579 = vmatprep.subr.bf16.mxu1 %v8053_v0 }
 0x267   : > { %5598 = vmatpush3.bf16.xpose.msra.mxu0 %v7070_v13 }
 0x268   : > { %5599 = vmatprep.subr.bf16.mxu0 %v8053_v0 }
 0x26d   : > { %5580 = vmatpush3.bf16.xpose.msra.mxu1 %v7077_v19 }
 0x26e   : > { %5581 = vmatprep.subr.bf16.mxu1 %v8053_v0 }
 0x26f   : > { %5600 = vmatpush3.bf16.xpose.msra.mxu0 %v7080_v20 }
 0x270   : > { %5601 = vmatprep.subr.bf16.mxu0 %v8053_v0 }
 0x275   : > { %5582 = vmatpush3.bf16.xpose.msra.mxu1 %v7087_v21 }
 0x276   : > { %5583 = vmatprep.subr.bf16.mxu1 %v8053_v0 }
 0x277   : > { %5602 = vmatpush3.bf16.xpose.msra.mxu0 %v7090_v23 }
 0x278   : > { %5603 = vmatprep.subr.bf16.mxu0 %v8053_v0 }
 0x27d   : > { %5584 = vmatpush3.bf16.xpose.msra.mxu1 %v7097_v26 }
 0x27e   : > { %5585 = vmatprep.subr.bf16.mxu1 %v8053_v0 }
 0x27f   : > { %5604 = vmatpush3.bf16.xpose.msra.mxu0 %v7100_v27 }
 0x280   : > { %5605 = vmatprep.subr.bf16.mxu0 %v8053_v0 }
 0x285   : > { %5586 = vmatpush3.bf16.xpose.msra.mxu1 %v7107_v28 }
 0x286   : > { %5587 = vmatprep.subr.bf16.mxu1 %v8053_v0 }
 0x287   : > { %5606 = vmatpush3.bf16.xpose.msra.mxu0 %v7110_v29 }
 0x288   : > { %5607 = vmatprep.subr.bf16.mxu0 %v8053_v0 }
 0x28d   : > { %5588 = vmatpush3.bf16.xpose.msra.mxu1 %v7117_v30 }
 0x28e   : > { %5589 = vmatprep.subr.bf16.mxu1 %v8053_v0 }
 0x28f   : > { %5608 = vmatpush3.bf16.xpose.msra.mxu0 %v7120_v31 }
 0x290   : > { %5609 = vmatprep.subr.bf16.mxu0 %v8053_v0 }
 0x295   : > { %5590 = vmatpush3.bf16.xpose.msra.mxu1 %v7129_v35 }
 0x296   : > { %5615 = vmatprep.subr.bf16.mxu1 %v8053_v0 }
 0x297   : > { %5610 = vmatpush3.bf16.xpose.msra.mxu0 %v7132_v36 }
 0x298   : > { %5635 = vmatprep.subr.bf16.mxu0 %v8053_v0 }
 0x29c   : > { %v1495_v2 = vpop.f32.mrf.mxu1  ;;  %5592 = vmatmul.mubr.bf16.vlgmr.msra.gmra.mxu1 %v1975_v59 }
 0x29d   : > { %v2388_v6 = vrot.slane %v1495_v2, 2  ;;  %5616 = vmatpush3.bf16.xpose.msra.mxu1 %v7140_v32  ;;  %5631 = vmatprep.mubr.msk.bf16.mxu1 %vm6502_vm0, %v8053_v0 }
 0x29e   : > { %v5473_v4 = vpop.f32.mrf.mxu1  ;;  %v1589_v8 = vpop.f32.mrf.mxu0  ;;  %5612 = vmatmul.mubr.bf16.vlgmr.msra.gmra.mxu0 %v2069_v3  ;;  %5617 = vmatprep.subr.bf16.mxu1 %v8053_v0  ;;  %v7180_v3 = vld [vmem:[%s6654_s23 + $0x3a8] sm:$0xff]  }
 0x29f   : > { %v2391_v24 = vrot.slane %v1589_v8, 1  ;;  %5636 = vmatpush3.bf16.xpose.msra.mxu0 %v7147_v62  ;;  %v2390_v10 = vsel %vm2389_vm7, %v2388_v6, %v2387_v37  ;;  %5651 = vmatprep.mubr.msk.bf16.mxu0 %vm6502_vm0, %v8053_v0  ;;  %8068 = vst [vmem:[#allocation12_spill] sm:$0xff] %v7180_v3  ;;  %v7190_v6 = vld [vmem:[%s6654_s23 + $0x3a0] sm:$0xff]   ;;  %v7200_v4 = vld [vmem:[%s6654_s23 + $0x398] sm:$0xff]  }
 0x2a0   : > { %v1498_v16 = vpop.f32.mrf.mxu1  ;;  %v5493_v34 = vpop.f32.mrf.mxu0  ;;  %5637 = vmatprep.subr.bf16.mxu0 %v8053_v0  ;;  %8070 = vst [vmem:[#allocation14_spill] sm:$0xff] %v7190_v6  ;;  %v7193_v37 = vld [vmem:[%s6654_s23 + $0x3e0] sm:$0xff]   ;;  %8072 = vst [vmem:[#allocation16_spill] sm:$0xff] %v7200_v4  ;;  %v7203_v8 = vld [vmem:[%s6654_s23 + $0x3d8] sm:$0xff]  }
 0x2a1   : > { %v2393_v40 = vsel %vm2392_vm8, %v2391_v24, %v2390_v10  ;;  %8071 = vst [vmem:[#allocation15_spill] sm:$0xff] %v7193_v37  ;;  %8073 = vst [vmem:[#allocation17_spill] sm:$0xff] %v7203_v8  ;;  %v7210_v24 = vld [vmem:[%s6654_s23 + $0x390] sm:$0xff]   ;;  %v7220_v16 = vld [vmem:[%s6654_s23 + $0x388] sm:$0xff]  }
 0x2a2   : > { %v5474_v54 = vpop.f32.mrf.mxu1  ;;  %v1592_v58 = vpop.f32.mrf.mxu0  ;;  %v7169_v59 = vsel %vm2355_vm9, %v2393_v40, -1e+30  ;;  %8074 = vst [vmem:[#allocation18_spill] sm:$0xff] %v7210_v24  ;;  %v7213_v10 = vld [vmem:[%s6654_s23 + $0x3d0] sm:$0xff]   ;;  %8076 = vst [vmem:[#allocation20_spill] sm:$0xff] %v7220_v16  ;;  %v7223_v34 = vld [vmem:[%s6654_s23 + $0x3c8] sm:$0xff]   ;;  %v826_v40 = vcombine.high %v7030_v55, %v7030_v55 }
 0x2a3   : > { %2412 = vmax.xlane.f32.xlu1 %v7169_v59  ;;  %8075 = vst [vmem:[#allocation19_spill] sm:$0xff] %v7213_v10  ;;  %8077 = vst [vmem:[#allocation21_spill] sm:$0xff] %v7223_v34  ;;  %v7235_v54 = vld [vmem:[%s6654_s23 + $0x3c0] sm:$0xff]  }
 0x2a4   : > { %v5494_v2 = vpop.f32.mrf.mxu0  ;;  %8079 = vst [vmem:[#allocation23_spill] sm:$0xff] %v7235_v54  ;;  %v842_v58 = vunpack.i.h.s16 %v826_v40 }
 0x2a5   : > { %5618 = vmatpush3.bf16.xpose.msra.mxu1 %v7166_v41  ;;  %v4921_v2 = vpack.i.b16 %v826_v40, %v826_v40 }
 0x2a6   : > { %5619 = vmatprep.subr.bf16.mxu1 %v8053_v0 }
 0x2a7   : > { %5638 = vmatpush3.bf16.xpose.msra.mxu0 %v7173_v60 }
 0x2a8   : > { %5639 = vmatprep.subr.bf16.mxu0 %v8053_v0 }
 0x2ad   : > { %5620 = vmatpush3.bf16.xpose.msra.mxu1 %v7180_v3 }
 0x2ae   : > { %5621 = vmatprep.subr.bf16.mxu1 %v8053_v0 }
 0x2af   : > { %5640 = vmatpush3.bf16.xpose.msra.mxu0 %v7183_v5 }
 0x2b0   : > { %5641 = vmatprep.subr.bf16.mxu0 %v8053_v0 }
 0x2b5   : > { %5622 = vmatpush3.bf16.xpose.msra.mxu1 %v7190_v6 }
 0x2b6   : > { %5623 = vmatprep.subr.bf16.mxu1 %v8053_v0 }
 0x2b7   : > { %5642 = vmatpush3.bf16.xpose.msra.mxu0 %v7193_v37 }
 0x2b8   : > { %5643 = vmatprep.subr.bf16.mxu0 %v8053_v0 }
 0x2bd   : > { %5624 = vmatpush3.bf16.xpose.msra.mxu1 %v7200_v4 }
 0x2be   : > { %5625 = vmatprep.subr.bf16.mxu1 %v8053_v0 }
 0x2bf   : > { %5644 = vmatpush3.bf16.xpose.msra.mxu0 %v7203_v8 }
 0x2c0   : > { %5645 = vmatprep.subr.bf16.mxu0 %v8053_v0 }
 0x2c5   : > { %5626 = vmatpush3.bf16.xpose.msra.mxu1 %v7210_v24  ;;  %v6331_v24 = vld [vmem:[%s6654_s23 + $0x38] sm:$0xff]  }
 0x2c6   : > { %5627 = vmatprep.subr.bf16.mxu1 %v8053_v0 }
 0x2c7   : > { %5646 = vmatpush3.bf16.xpose.msra.mxu0 %v7213_v10 }
 0x2c8   : > { %5647 = vmatprep.subr.bf16.mxu0 %v8053_v0 }
 0x2cd   : > { %5628 = vmatpush3.bf16.xpose.msra.mxu1 %v7220_v16  ;;  %v2163_v16 = vrot.slane %v4921_v2, %v6737_v38  ;;  %v6333_v2 = vld [vmem:[%s6654_s23 + $0x30] sm:$0xff]  }
 0x2ce   : > { %5629 = vmatprep.subr.bf16.mxu1 %v8053_v0 }
 0x2cf   : > { %5648 = vmatpush3.bf16.xpose.msra.mxu0 %v7223_v34  ;;  %v2253_v34 = vpack.i.b16 %v842_v58, %v842_v58 }
 0x2d0   : > { %5649 = vmatprep.subr.bf16.mxu0 %v8053_v0 }
 0x2d1   : > { %v2257_v55 = vrot.slane %v2253_v34, %v6737_v38 }
 0x2d5   : > { %5630 = vmatpush3.bf16.xpose.msra.mxu1 %v7232_v43 }
 0x2d6   : > { %5655 = vmatprep.subr.bf16.mxu1 %v8053_v0 }
 0x2d7   : > { %5650 = vmatpush3.bf16.xpose.msra.mxu0 %v7235_v54  ;;  %v6332_v54 = vld [vmem:[%s6654_s23 + $0x78] sm:$0xff]  }
 0x2d8   : > { %5675 = vmatprep.subr.bf16.mxu0 %v8053_v0 }
 0x2dc   : > { %v1683_v10 = vpop.f32.mrf.mxu1  ;;  %5632 = vmatmul.mubr.bf16.vlgmr.msra.gmra.mxu1 %v2163_v16 }
 0x2dd   : > { %5656 = vmatpush3.bf16.msra.mxu1 %v6331_v24  ;;  %5671 = vmatprep.mubr.msk.bf16.mxu1 %vm6502_vm0, %v8053_v0 }
 0x2de   : > { %v5513_v40 = vpop.f32.mrf.mxu1  ;;  %v1777_v43 = vpop.f32.mrf.mxu0  ;;  %5652 = vmatmul.mubr.bf16.vlgmr.msra.gmra.mxu0 %v2257_v55  ;;  %5657 = vmatprep.subr.bf16.mxu1 %v8053_v0 }
 0x2df   : > { %v2394_v58 = vrot.slane %v1777_v43, 7  ;;  %5676 = vmatpush3.bf16.msra.mxu0 %v6332_v54  ;;  %5691 = vmatprep.mubr.msk.bf16.mxu0 %vm6502_vm0, %v8053_v0  ;;  %v6334_v43 = vld [vmem:[%s6654_s23 + $0x70] sm:$0xff]  }
 0x2e0   : > { %v1686_v16 = vpop.f32.mrf.mxu1  ;;  %v5533_v34 = vpop.f32.mrf.mxu0  ;;  %5677 = vmatprep.subr.bf16.mxu0 %v8053_v0 }
 0x2e1   : > { %v2395_v24 = vsel %vm2374_vm2, %v2394_v58, %v1683_v10  ;;  %5658 = vmatpush3.bf16.msra.mxu1 %v6333_v2  ;;  %v6335_v16 = vld [vmem:[%s6654_s23 + $0x28] sm:$0xff]   ;;  %v6337_v58 = vld [vmem:[%s6654_s23 + $0x20] sm:$0xff]   ;;  %v6339_v2 = vld [vmem:[%s6654_s23 + $0x18] sm:$0xff]  }
 0x2e2   : > { %v5514_v55 = vpop.f32.mrf.mxu1  ;;  %v1780_v40 = vpop.f32.mrf.mxu0  ;;  %5659 = vmatprep.subr.bf16.mxu1 %v8053_v0  ;;  %v6336_v10 = vld [vmem:[%s6654_s23 + $0x68] sm:$0xff]   ;;  %v6338_v34 = vld [vmem:[%s6654_s23 + $0x60] sm:$0xff]  }
 0x2e3   : > { %5678 = vmatpush3.bf16.msra.mxu0 %v6334_v43  ;;  %v6340_v55 = vld [vmem:[%s6654_s23 + $0x58] sm:$0xff]   ;;  %v6341_v40 = vld [vmem:[%s6654_s23 + $0x10] sm:$0xff]  }
 0x2e4   : > { %v5534_v54 = vpop.f32.mrf.mxu0  ;;  %5679 = vmatprep.subr.bf16.mxu0 %v8053_v0  ;;  %v6342_v43 = vld [vmem:[%s6654_s23 + $0x50] sm:$0xff]  }
 0x2e5   : > { %5660 = vmatpush3.bf16.msra.mxu1 %v6335_v16  ;;  %v6343_v54 = vld [vmem:[%s6654_s23 + $0x8] sm:$0xff]  }
 0x2e6   : > { %5661 = vmatprep.subr.bf16.mxu1 %v8053_v0  ;;  %v6344_v16 = vld [vmem:[%s6654_s23 + $0x48] sm:$0xff]  }
 0x2e7   : > { %5680 = vmatpush3.bf16.msra.mxu0 %v6336_v10  ;;  %v6345_v10 = vld [vmem:[%s6654_s23] sm:$0xff]  }
 0x2e8   : > { %5681 = vmatprep.subr.bf16.mxu0 %v8053_v0 }
 0x2e9   : > { %5662 = vmatpush3.bf16.msra.mxu1 %v6337_v58  ;;  %v6346_v58 = vld [vmem:[%s6654_s23 + $0x40] sm:$0xff]  }
 0x2ea   : > { %5663 = vmatprep.subr.bf16.mxu1 %v8053_v0 }
 0x2eb   : > { %5682 = vmatpush3.bf16.msra.mxu0 %v6338_v34 }
 0x2ec   : > { %5683 = vmatprep.subr.bf16.mxu0 %v8053_v0 }
 0x2ed   : > { %5664 = vmatpush3.bf16.msra.mxu1 %v6339_v2 }
 0x2ee   : > { %5665 = vmatprep.subr.bf16.mxu1 %v8053_v0 }
 0x2ef   : > { %5684 = vmatpush3.bf16.msra.mxu0 %v6340_v55 }
 0x2f0   : > { %5685 = vmatprep.subr.bf16.mxu0 %v8053_v0 }
 0x2f1   : > { %5666 = vmatpush3.bf16.msra.mxu1 %v6341_v40 }
 0x2f2   : > { %5667 = vmatprep.subr.bf16.mxu1 %v8053_v0 }
 0x2f3   : > { %5686 = vmatpush3.bf16.msra.mxu0 %v6342_v43 }
 0x2f4   : > { %5687 = vmatprep.subr.bf16.mxu0 %v8053_v0 }
 0x2f5   : > { %5668 = vmatpush3.bf16.msra.mxu1 %v6343_v54 }
 0x2f6   : > { %5669 = vmatprep.subr.bf16.mxu1 %v8053_v0 }
 0x2f7   : > { %5688 = vmatpush3.bf16.msra.mxu0 %v6344_v16 }
 0x2f8   : > { %5689 = vmatprep.subr.bf16.mxu0 %v8053_v0 }
 0x2f9   : > { %5670 = vmatpush3.bf16.msra.mxu1 %v6345_v10 }
 0x2fa   : > { %5695 = vmatprep.subr.bf16.mxu1 %v8053_v0 }
 0x2fb   : > { %5690 = vmatpush3.bf16.msra.mxu0 %v6346_v58 }
 0x2fc   : > { %5715 = vmatprep.subr.bf16.mxu0 %v8053_v0 }
 0x31c   : > { %v1871_v34 = vpop.f32.mrf.mxu1 }
 0x31d   : > { %v2396_v2 = vrot.slane %v1871_v34, 6 }
 0x31e   : > { %v5553_v55 = vpop.f32.mrf.mxu1  ;;  %v1965_v40 = vpop.f32.mrf.mxu0 }
 0x31f   : > { %v2397_v43 = vsel %vm2377_vm3, %v2396_v2, %v2395_v24  ;;  %v2398_v54 = vrot.slane %v1965_v40, 5 }
 0x320   : > { %v1874_v8 = vpop.f32.mrf.mxu1  ;;  %v5573_v4 = vpop.f32.mrf.mxu0 }
 0x321   : > { %v2399_v16 = vsel %vm2380_vm4, %v2398_v54, %v2397_v43  ;;  %v2354_v54 = vpop.permute.xlu0 %2353 }
 0x322   : > { %v5554_v37 = vpop.f32.mrf.mxu1  ;;  %v1968_v6 = vpop.f32.mrf.mxu0  ;;  %vm2356_vm10 = vcmp.lt.s32.totalorder %v7150_v1, %v2354_v54 }
 0x324   : > { %v5574_v10 = vpop.f32.mrf.mxu0 }
 0x32c   : > { %v2413_v5 = vpop.xlane.xlu1 %2412 }
 0x32d   : > { %v2416_v3 = vsub.f32 %v7169_v59, %v2413_v5 }
 0x32f   : > { %v2418_v58 = vmul.f32 1.442695, %v2416_v3 }
 0x331   : > { %6287 = vpow2.f32 %v2418_v58 }
 0x33e   : > { %v6288_v0 = vpop.eup %6287 }
 0x33f   : > { %2422 = vadd.xlane.f32.xlu0 %v6288_v0 }
 0x35c   : > { %v2059_v34 = vpop.f32.mrf.mxu1 }
 0x35d   : > { %v2400_v40 = vrot.slane %v2059_v34, 4 }
 0x35e   : > { %v5593_v55 = vpop.f32.mrf.mxu1  ;;  %v2153_v60 = vpop.f32.mrf.mxu0 }
 0x35f   : > { %v2402_v43 = vrot.slane %v2153_v60, 3  ;;  %v2401_v6 = vsel %vm2383_vm5, %v2400_v40, %v2399_v16 }
 0x360   : > { %v2062_v41 = vpop.f32.mrf.mxu1  ;;  %v5613_v24 = vpop.f32.mrf.mxu0 }
 0x361   : > { %v2403_v59 = vsel %vm2386_vm6, %v2402_v43, %v2401_v6 }
 0x362   : > { %v5594_v2 = vpop.f32.mrf.mxu1  ;;  %v2156_v8 = vpop.f32.mrf.mxu0 }
 0x364   : > { %v5614_v4 = vpop.f32.mrf.mxu0 }
 0x39c   : > { %v2247_v37 = vpop.f32.mrf.mxu1 }
 0x39d   : > { %v2404_v10 = vrot.slane %v2247_v37, 2 }
 0x39e   : > { %v5633_v3 = vpop.f32.mrf.mxu1  ;;  %v2341_v5 = vpop.f32.mrf.mxu0 }
 0x39f   : > { %v2406_v58 = vrot.slane %v2341_v5, 1  ;;  %v2405_v55 = vsel %vm2389_vm7, %v2404_v10, %v2403_v59 }
 0x3a0   : > { %v2250_v62 = vpop.f32.mrf.mxu1  ;;  %v5653_v41 = vpop.f32.mrf.mxu0 }
 0x3a1   : > { %v2407_v24 = vsel %vm2392_vm8, %v2406_v58, %v2405_v55  ;;  %v8080_v58 = vmov 0.0   ;;  %v6348_v55 = vld [vmem:[%s6654_s23 + $0xf8] sm:$0xff]   ;;  %v6349_v41 = vld [vmem:[%s6654_s23 + $0xb0] sm:$0xff]  }
 0x3a2   : > { %v5634_v34 = vpop.f32.mrf.mxu1  ;;  %v2344_v60 = vpop.f32.mrf.mxu0  ;;  %v2411_v2 = vsel %vm2356_vm10, %v2407_v24, -1e+30  ;;  %v6350_v24 = vld [vmem:[%s6654_s23 + $0xf0] sm:$0xff]  }
 0x3a3   : > { %2414 = vmax.xlane.f32.xlu1 %v2411_v2  ;;  %v6351_v34 = vld [vmem:[%s6654_s23 + $0xa8] sm:$0xff]  }
 0x3a4   : > { %v5654_v16 = vpop.f32.mrf.mxu0  ;;  %v6352_v60 = vld [vmem:[%s6654_s23 + $0xe8] sm:$0xff]  }
 0x3a5   : > { %v6354_v16 = vld [vmem:[%s6654_s23 + $0xe0] sm:$0xff]  }
 0x42c   : > { %v2415_v8 = vpop.xlane.xlu1 %2414 }
 0x42d   : > { %v2417_v4 = vsub.f32 %v2411_v2, %v2415_v8  ;;  %v6353_v2 = vld [vmem:[%s6654_s23 + $0xa0] sm:$0xff]  }
 0x42f   : > { %v2420_v40 = vmul.f32 1.442695, %v2417_v4  ;;  %v6355_v4 = vld [vmem:[%s6654_s23 + $0x98] sm:$0xff]  }
 0x431   : > { %6289 = vpow2.f32 %v2420_v40  ;;  %v6356_v40 = vld [vmem:[%s6654_s23 + $0xd8] sm:$0xff]  }
 0x43e   : > { %v7288_v43 = vpop.eup %6289 }
 0x43f   : > { %2424 = vadd.xlane.f32.xlu1 %v7288_v43  ;;  %v2428_v62 = vpack.c.bf16 %v7288_v43, %v6288_v0  ;;  %v6347_v0 = vld [vmem:[%s6654_s23 + $0xb8] sm:$0xff]  }
 0x441   : > { %v2437_v6 = vrot.slane %v2428_v62, %v6730_v33 }
 0x443   : > { %v7294_v37 = vrot.slane %v2437_v6, %v6730_v33  ;;  %v2445_v8 = vcombine.high %v2437_v6, %v2437_v6 }
 0x445   : > { %v4939_v54 = vpack.i.b16 %v7294_v37, %v7294_v37  ;;  %v2480_v10 = vunpack.i.h.s16 %v7294_v37  ;;  %v7326_v62 = vrot.slane %v2445_v8, %v6730_v33  ;;  %v6366_v8 = vld [vmem:[%s6654_s23 + $0x170] sm:$0xff]  }
 0x447   : > { %v2499_v59 = vrot.slane %v4939_v54, %v6737_v38  ;;  %v2541_v3 = vpack.i.b16 %v2480_v10, %v2480_v10  ;;  %v6357_v54 = vld [vmem:[%s6654_s23 + $0x90] sm:$0xff]   ;;  %v2482_v6 = vunpack.i.h.s16 %v7326_v62 }
 0x448   : > { %v6358_v10 = vld [vmem:[%s6654_s23 + $0xd0] sm:$0xff]  }
 0x449   : > { %5672 = vmatmul.mubr.bf16.vlgmr.msra.gmra.mxu1 %v2499_v59  ;;  %v2545_v5 = vrot.slane %v2541_v3, %v6737_v38  ;;  %v6359_v59 = vld [vmem:[%s6654_s23 + $0x88] sm:$0xff]   ;;  %v4940_v3 = vpack.i.b16 %v7326_v62, %v7326_v62 }
 0x44a   : > { %5696 = vmatpush3.bf16.msra.mxu1 %v6347_v0  ;;  %5711 = vmatprep.mubr.msk.bf16.mxu1 %vm6502_vm0, %v8080_v58  ;;  %v2633_v0 = vpack.i.b16 %v2482_v6, %v2482_v6  ;;  %v6371_v6 = vld [vmem:[%s6654_s23 + $0x118] sm:$0xff]  }
 0x44b   : > { %5692 = vmatmul.mubr.bf16.vlgmr.msra.gmra.mxu0 %v2545_v5  ;;  %5697 = vmatprep.subr.bf16.mxu1 %v8080_v58  ;;  %v6360_v5 = vld [vmem:[%s6654_s23 + $0xc8] sm:$0xff]  }
 0x44c   : > { %5716 = vmatpush3.bf16.msra.mxu0 %v6348_v55  ;;  %5731 = vmatprep.mubr.msk.bf16.mxu0 %vm6502_vm0, %v8080_v58  ;;  %v6361_v55 = vld [vmem:[%s6654_s23 + $0x80] sm:$0xff]  }
 0x44d   : > { %5717 = vmatprep.subr.bf16.mxu0 %v8080_v58 }
 0x44e   : > { %5698 = vmatpush3.bf16.msra.mxu1 %v6349_v41  ;;  %v2591_v41 = vrot.slane %v4940_v3, %v6737_v38  ;;  %v2475_v3 = vcombine.high %v7294_v37, %v7294_v37 }
 0x44f   : > { %5699 = vmatprep.subr.bf16.mxu1 %v8080_v58 }
 0x450   : > { %5718 = vmatpush3.bf16.msra.mxu0 %v6350_v24  ;;  %v6362_v24 = vld [vmem:[%s6654_s23 + $0xc0] sm:$0xff]  }
 0x451   : > { %5719 = vmatprep.subr.bf16.mxu0 %v8080_v58 }
 0x452   : > { %5700 = vmatpush3.bf16.msra.mxu1 %v6351_v34  ;;  %v2637_v34 = vrot.slane %v2633_v0, %v6737_v38  ;;  %v6374_v0 = vld [vmem:[%s6654_s23 + $0x150] sm:$0xff]  }
 0x453   : > { %5701 = vmatprep.subr.bf16.mxu1 %v8080_v58 }
 0x454   : > { %5720 = vmatpush3.bf16.msra.mxu0 %v6352_v60  ;;  %v6363_v60 = vld [vmem:[%s6654_s23 + $0x138] sm:$0xff]  }
 0x455   : > { %5721 = vmatprep.subr.bf16.mxu0 %v8080_v58 }
 0x456   : > { %5702 = vmatpush3.bf16.msra.mxu1 %v6353_v2  ;;  %v6364_v2 = vld [vmem:[%s6654_s23 + $0x178] sm:$0xff]  }
 0x457   : > { %5703 = vmatprep.subr.bf16.mxu1 %v8080_v58 }
 0x458   : > { %5722 = vmatpush3.bf16.msra.mxu0 %v6354_v16  ;;  %v6365_v16 = vld [vmem:[%s6654_s23 + $0x130] sm:$0xff]  }
 0x459   : > { %5723 = vmatprep.subr.bf16.mxu0 %v8080_v58 }
 0x45a   : > { %5704 = vmatpush3.bf16.msra.mxu1 %v6355_v4  ;;  %v6367_v4 = vld [vmem:[%s6654_s23 + $0x128] sm:$0xff]  }
 0x45b   : > { %5705 = vmatprep.subr.bf16.mxu1 %v8080_v58 }
 0x45c   : > { %5724 = vmatpush3.bf16.msra.mxu0 %v6356_v40  ;;  %v6368_v40 = vld [vmem:[%s6654_s23 + $0x168] sm:$0xff]  }
 0x45d   : > { %5725 = vmatprep.subr.bf16.mxu0 %v8080_v58 }
 0x45e   : > { %5706 = vmatpush3.bf16.msra.mxu1 %v6357_v54  ;;  %v6369_v54 = vld [vmem:[%s6654_s23 + $0x120] sm:$0xff]  }
 0x45f   : > { %5707 = vmatprep.subr.bf16.mxu1 %v8080_v58 }
 0x460   : > { %5726 = vmatpush3.bf16.msra.mxu0 %v6358_v10  ;;  %v6370_v10 = vld [vmem:[%s6654_s23 + $0x160] sm:$0xff]  }
 0x461   : > { %5727 = vmatprep.subr.bf16.mxu0 %v8080_v58 }
 0x462   : > { %5708 = vmatpush3.bf16.msra.mxu1 %v6359_v59  ;;  %v6372_v59 = vld [vmem:[%s6654_s23 + $0x158] sm:$0xff]  }
 0x463   : > { %5709 = vmatprep.subr.bf16.mxu1 %v8080_v58 }
 0x464   : > { %5728 = vmatpush3.bf16.msra.mxu0 %v6360_v5  ;;  %v6373_v5 = vld [vmem:[%s6654_s23 + $0x110] sm:$0xff]  }
 0x465   : > { %5729 = vmatprep.subr.bf16.mxu0 %v8080_v58 }
 0x466   : > { %5710 = vmatpush3.bf16.msra.mxu1 %v6361_v55  ;;  %v2484_v55 = vunpack.i.h.s16 %v2475_v3 }
 0x467   : > { %5735 = vmatprep.subr.bf16.mxu1 %v8080_v58 }
 0x468   : > { %5730 = vmatpush3.bf16.msra.mxu0 %v6362_v24  ;;  %v4941_v24 = vpack.i.b16 %v2475_v3, %v2475_v3  ;;  %v2725_v37 = vpack.i.b16 %v2484_v55, %v2484_v55  ;;  %v6385_v3 = vld [vmem:[%s6654_s23 + $0x1a0] sm:$0xff]   ;;  %v6388_v55 = vld [vmem:[%s6654_s23 + $0x1d8] sm:$0xff]  }
 0x469   : > { %5712 = vmatmul.mubr.bf16.vlgmr.msra.gmra.mxu1 %v2591_v41  ;;  %5755 = vmatprep.subr.bf16.mxu0 %v8080_v58  ;;  %v6375_v41 = vld [vmem:[%s6654_s23 + $0x108] sm:$0xff]  }
 0x46a   : > { %5736 = vmatpush3.bf16.msra.mxu1 %v6363_v60  ;;  %5751 = vmatprep.mubr.msk.bf16.mxu1 %vm6502_vm0, %v8080_v58  ;;  %v6377_v60 = vld [vmem:[%s6654_s23 + $0x100] sm:$0xff]  }
 0x46b   : > { %5732 = vmatmul.mubr.bf16.vlgmr.msra.gmra.mxu0 %v2637_v34  ;;  %5737 = vmatprep.subr.bf16.mxu1 %v8080_v58  ;;  %v6376_v34 = vld [vmem:[%s6654_s23 + $0x148] sm:$0xff]  }
 0x46c   : > { %5756 = vmatpush3.bf16.msra.mxu0 %v6364_v2  ;;  %5771 = vmatprep.mubr.msk.bf16.mxu0 %vm6502_vm0, %v8080_v58  ;;  %v2683_v2 = vrot.slane %v4941_v24, %v6737_v38  ;;  %v6389_v24 = vld [vmem:[%s6654_s23 + $0x190] sm:$0xff]  }
 0x46d   : > { %5757 = vmatprep.subr.bf16.mxu0 %v8080_v58 }
 0x46e   : > { %5738 = vmatpush3.bf16.msra.mxu1 %v6365_v16  ;;  %v6378_v16 = vld [vmem:[%s6654_s23 + $0x140] sm:$0xff]  }
 0x46f   : > { %5739 = vmatprep.subr.bf16.mxu1 %v8080_v58 }
 0x470   : > { %5758 = vmatpush3.bf16.msra.mxu0 %v6366_v8  ;;  %v2729_v8 = vrot.slane %v2725_v37, %v6737_v38 }
 0x471   : > { %5759 = vmatprep.subr.bf16.mxu0 %v8080_v58 }
 0x472   : > { %5740 = vmatpush3.bf16.msra.mxu1 %v6367_v4  ;;  %v6379_v4 = vld [vmem:[%s6654_s23 + $0x1b8] sm:$0xff]  }
 0x473   : > { %5741 = vmatprep.subr.bf16.mxu1 %v8080_v58 }
 0x474   : > { %5760 = vmatpush3.bf16.msra.mxu0 %v6368_v40  ;;  %v6380_v40 = vld [vmem:[%s6654_s23 + $0x1f8] sm:$0xff]  }
 0x475   : > { %5761 = vmatprep.subr.bf16.mxu0 %v8080_v58 }
 0x476   : > { %5742 = vmatpush3.bf16.msra.mxu1 %v6369_v54  ;;  %v6381_v54 = vld [vmem:[%s6654_s23 + $0x1b0] sm:$0xff]  }
 0x477   : > { %5743 = vmatprep.subr.bf16.mxu1 %v8080_v58 }
 0x478   : > { %5762 = vmatpush3.bf16.msra.mxu0 %v6370_v10  ;;  %v6382_v10 = vld [vmem:[%s6654_s23 + $0x1f0] sm:$0xff]  }
 0x479   : > { %5763 = vmatprep.subr.bf16.mxu0 %v8080_v58 }
 0x47a   : > { %5744 = vmatpush3.bf16.msra.mxu1 %v6371_v6  ;;  %v6383_v6 = vld [vmem:[%s6654_s23 + $0x1a8] sm:$0xff]  }
 0x47b   : > { %5745 = vmatprep.subr.bf16.mxu1 %v8080_v58 }
 0x47c   : > { %5764 = vmatpush3.bf16.msra.mxu0 %v6372_v59  ;;  %v6384_v59 = vld [vmem:[%s6654_s23 + $0x1e8] sm:$0xff]  }
 0x47d   : > { %5765 = vmatprep.subr.bf16.mxu0 %v8080_v58 }
 0x47e   : > { %5746 = vmatpush3.bf16.msra.mxu1 %v6373_v5  ;;  %v6386_v5 = vld [vmem:[%s6654_s23 + $0x1e0] sm:$0xff]  }
 0x47f   : > { %5747 = vmatprep.subr.bf16.mxu1 %v8080_v58 }
 0x480   : > { %5766 = vmatpush3.bf16.msra.mxu0 %v6374_v0  ;;  %v6387_v0 = vld [vmem:[%s6654_s23 + $0x198] sm:$0xff]  }
 0x481   : > { %5767 = vmatprep.subr.bf16.mxu0 %v8080_v58 }
 0x482   : > { %5748 = vmatpush3.bf16.msra.mxu1 %v6375_v41  ;;  %v2477_v41 = vcombine.high %v7326_v62, %v7326_v62 }
 0x483   : > { %5749 = vmatprep.subr.bf16.mxu1 %v8080_v58 }
 0x484   : > { %5768 = vmatpush3.bf16.msra.mxu0 %v6376_v34  ;;  %v6390_v34 = vld [vmem:[%s6654_s23 + $0x1d0] sm:$0xff]   ;;  %v2486_v37 = vunpack.i.h.s16 %v2477_v41 }
 0x485   : > { %5769 = vmatprep.subr.bf16.mxu0 %v8080_v58 }
 0x486   : > { %5750 = vmatpush3.bf16.msra.mxu1 %v6377_v60  ;;  %v6391_v60 = vld [vmem:[%s6654_s23 + $0x188] sm:$0xff]   ;;  %v2817_v62 = vpack.i.b16 %v2486_v37, %v2486_v37  ;;  %v6403_v37 = vld [vmem:[%s6654_s23 + $0x258] sm:$0xff]  }
 0x487   : > { %5775 = vmatprep.subr.bf16.mxu1 %v8080_v58 }
 0x488   : > { %5770 = vmatpush3.bf16.msra.mxu0 %v6378_v16  ;;  %v6392_v16 = vld [vmem:[%s6654_s23 + $0x1c8] sm:$0xff]  }
 0x489   : > { %5752 = vmatmul.mubr.bf16.vlgmr.msra.gmra.mxu1 %v2683_v2  ;;  %5795 = vmatprep.subr.bf16.mxu0 %v8080_v58  ;;  %v4942_v2 = vpack.i.b16 %v2477_v41, %v2477_v41  ;;  %v6401_v41 = vld [vmem:[%s6654_s23 + $0x220] sm:$0xff]  }
 0x48a   : > { %5776 = vmatpush3.bf16.msra.mxu1 %v6379_v4  ;;  %5791 = vmatprep.mubr.msk.bf16.mxu1 %vm6502_vm0, %v8080_v58 }
 0x48b   : > { %5772 = vmatmul.mubr.bf16.vlgmr.msra.gmra.mxu0 %v2729_v8  ;;  %5777 = vmatprep.subr.bf16.mxu1 %v8080_v58  ;;  %v6393_v8 = vld [vmem:[%s6654_s23 + $0x180] sm:$0xff]   ;;  %v2775_v4 = vrot.slane %v4942_v2, %v6737_v38 }
 0x48c   : > { %5796 = vmatpush3.bf16.msra.mxu0 %v6380_v40  ;;  %5811 = vmatprep.mubr.msk.bf16.mxu0 %vm6502_vm0, %v8080_v58  ;;  %v6394_v40 = vld [vmem:[%s6654_s23 + $0x1c0] sm:$0xff]  }
 0x48d   : > { %5797 = vmatprep.subr.bf16.mxu0 %v8080_v58  ;;  %v8085_v2 = vld [vmem:[#allocation13_spill] sm:$0xff] }
 0x48e   : > { %5778 = vmatpush3.bf16.msra.mxu1 %v6381_v54  ;;  %v2821_v54 = vrot.slane %v2817_v62, %v6737_v38  ;;  %v8087_v62 = vld [vmem:[#allocation15_spill] sm:$0xff] }
 0x48f   : > { %5779 = vmatprep.subr.bf16.mxu1 %v8080_v58 }
 0x490   : > { %5798 = vmatpush3.bf16.msra.mxu0 %v6382_v10  ;;  %v6395_v10 = vld [vmem:[%s6654_s23 + $0x238] sm:$0xff]  }
 0x491   : > { %5799 = vmatprep.subr.bf16.mxu0 %v8080_v58 }
 0x492   : > { %5780 = vmatpush3.bf16.msra.mxu1 %v6383_v6  ;;  %v6396_v6 = vld [vmem:[%s6654_s23 + $0x278] sm:$0xff]  }
 0x493   : > { %5781 = vmatprep.subr.bf16.mxu1 %v8080_v58 }
 0x494   : > { %5800 = vmatpush3.bf16.msra.mxu0 %v6384_v59  ;;  %v6397_v59 = vld [vmem:[%s6654_s23 + $0x230] sm:$0xff]  }
 0x495   : > { %5801 = vmatprep.subr.bf16.mxu0 %v8080_v58 }
 0x496   : > { %5782 = vmatpush3.bf16.msra.mxu1 %v6385_v3  ;;  %v6398_v3 = vld [vmem:[%s6654_s23 + $0x270] sm:$0xff]  }
 0x497   : > { %5783 = vmatprep.subr.bf16.mxu1 %v8080_v58 }
 0x498   : > { %5802 = vmatpush3.bf16.msra.mxu0 %v6386_v5  ;;  %v6399_v5 = vld [vmem:[%s6654_s23 + $0x228] sm:$0xff]  }
 0x499   : > { %5803 = vmatprep.subr.bf16.mxu0 %v8080_v58 }
 0x49a   : > { %5784 = vmatpush3.bf16.msra.mxu1 %v6387_v0  ;;  %v6400_v0 = vld [vmem:[%s6654_s23 + $0x268] sm:$0xff]  }
 0x49b   : > { %5785 = vmatprep.subr.bf16.mxu1 %v8080_v58 }
 0x49c   : > { %5804 = vmatpush3.bf16.msra.mxu0 %v6388_v55  ;;  %v4938_v55 = vpack.c.bf16 %v7288_v43, %v7288_v43 }
 0x49d   : > { %5805 = vmatprep.subr.bf16.mxu0 %v8080_v58 }
 0x49e   : > { %5786 = vmatpush3.bf16.msra.mxu1 %v6389_v24  ;;  %v6402_v24 = vld [vmem:[%s6654_s23 + $0x260] sm:$0xff]   ;;  %s4988_s23 = sshll.u32 %s6574_s9, 8  ;;  %s4656_s9 = scalar_lea.sflag [#allocation4], %s6650_s14 }
 0x49f   : > { %5787 = vmatprep.subr.bf16.mxu1 %v8080_v58  ;;  %s7979_s22 = scalar_lea.hbm %s8038_s8, %s4988_s23 }
 0x4a0   : > { %5806 = vmatpush3.bf16.msra.mxu0 %v6390_v34  ;;  %v2444_v34 = vrot.slane %v4938_v55, %v6730_v33  ;;  %v8094_v55 = vld [vmem:[#allocation22_spill] sm:$0xff] }
 0x4a1   : > { %5807 = vmatprep.subr.bf16.mxu0 %v8080_v58 }
 0x4a2   : > { %5788 = vmatpush3.bf16.msra.mxu1 %v6391_v60  ;;  %v7453_v43 = vrot.slane %v2444_v34, %v6730_v33 }
 0x4a3   : > { %5789 = vmatprep.subr.bf16.mxu1 %v8080_v58 }
 0x4a4   : > { %5808 = vmatpush3.bf16.msra.mxu0 %v6392_v16  ;;  %v2488_v60 = vunpack.i.h.s16 %v7453_v43  ;;  %v8086_v16 = vld [vmem:[#allocation14_spill] sm:$0xff] }
 0x4a5   : > { %5809 = vmatprep.subr.bf16.mxu0 %v8080_v58 }
 0x4a6   : > { %5790 = vmatpush3.bf16.msra.mxu1 %v6393_v8  ;;  %v8088_v8 = vld [vmem:[#allocation16_spill] sm:$0xff] }
 0x4a7   : > { %5815 = vmatprep.subr.bf16.mxu1 %v8080_v58 }
 0x4a8   : > { %5810 = vmatpush3.bf16.msra.mxu0 %v6394_v40 }
 0x4a9   : > { %5792 = vmatmul.mubr.bf16.vlgmr.msra.gmra.mxu1 %v2775_v4  ;;  %5835 = vmatprep.subr.bf16.mxu0 %v8080_v58  ;;  %v8089_v4 = vld [vmem:[#allocation17_spill] sm:$0xff] }
 0x4aa   : > { %5816 = vmatpush3.bf16.msra.mxu1 %v6395_v10  ;;  %5831 = vmatprep.mubr.msk.bf16.mxu1 %vm6502_vm0, %v8080_v58  ;;  %v8091_v10 = vld [vmem:[#allocation19_spill] sm:$0xff] }
 0x4ab   : > { %5812 = vmatmul.mubr.bf16.vlgmr.msra.gmra.mxu0 %v2821_v54  ;;  %5817 = vmatprep.subr.bf16.mxu1 %v8080_v58  ;;  %v8090_v54 = vld [vmem:[#allocation18_spill] sm:$0xff] }
 0x4ac   : > { %5836 = vmatpush3.bf16.msra.mxu0 %v6396_v6  ;;  %5851 = vmatprep.mubr.msk.bf16.mxu0 %vm6502_vm0, %v8080_v58 }
 0x4ad   : > { %5837 = vmatprep.subr.bf16.mxu0 %v8080_v58 }
 0x4ae   : > { %5818 = vmatpush3.bf16.msra.mxu1 %v6397_v59  ;;  %v8092_v59 = vld [vmem:[#allocation20_spill] sm:$0xff] }
 0x4af   : > { %5819 = vmatprep.subr.bf16.mxu1 %v8080_v58 }
 0x4b0   : > { %5838 = vmatpush3.bf16.msra.mxu0 %v6398_v3 }
 0x4b1   : > { %5839 = vmatprep.subr.bf16.mxu0 %v8080_v58 }
 0x4b2   : > { %5820 = vmatpush3.bf16.msra.mxu1 %v6399_v5  ;;  %v8093_v5 = vld [vmem:[#allocation21_spill] sm:$0xff] }
 0x4b3   : > { %5821 = vmatprep.subr.bf16.mxu1 %v8080_v58 }
 0x4b4   : > { %5840 = vmatpush3.bf16.msra.mxu0 %v6400_v0 }
 0x4b5   : > { %5841 = vmatprep.subr.bf16.mxu0 %v8080_v58 }
 0x4b6   : > { %5822 = vmatpush3.bf16.msra.mxu1 %v6401_v41 }
 0x4b7   : > { %5823 = vmatprep.subr.bf16.mxu1 %v8080_v58 }
 0x4b8   : > { %5842 = vmatpush3.bf16.msra.mxu0 %v6402_v24  ;;  %v8095_v24 = vld [vmem:[#allocation23_spill] sm:$0xff] }
 0x4b9   : > { %5843 = vmatprep.subr.bf16.mxu0 %v8080_v58 }
 0x4ba   : > { %5824 = vmatpush3.bf16.msra.mxu1 %v6899_v9  ;;  %v4943_v9 = vpack.i.b16 %v7453_v43, %v7453_v43 }
 0x4bb   : > { %5825 = vmatprep.subr.bf16.mxu1 %v8080_v58 }
 0x4bc   : > { %5844 = vmatpush3.bf16.msra.mxu0 %v6403_v37 }
 0x4bd   : > { %5845 = vmatprep.subr.bf16.mxu0 %v8080_v58 }
 0x4be   : > { %5826 = vmatpush3.bf16.msra.mxu1 %v6906_v11  ;;  %v2909_v11 = vpack.i.b16 %v2488_v60, %v2488_v60 }
 0x4bf   : > { %5827 = vmatprep.subr.bf16.mxu1 %v8080_v58 }
 0x4c0   : > { %5846 = vmatpush3.bf16.msra.mxu0 %v6909_v12  ;;  %v2867_v12 = vrot.slane %v4943_v9, %v6737_v38 }
 0x4c1   : > { %5847 = vmatprep.subr.bf16.mxu0 %v8080_v58 }
 0x4c2   : > { %5828 = vmatpush3.bf16.msra.mxu1 %v6918_v14  ;;  %v2913_v14 = vrot.slane %v2909_v11, %v6737_v38 }
 0x4c3   : > { %5829 = vmatprep.subr.bf16.mxu1 %v8080_v58 }
 0x4c4   : > { %5848 = vmatpush3.bf16.msra.mxu0 %v6921_v15  ;;  %v2446_v15 = vcombine.high %v2444_v34, %v2444_v34 }
 0x4c5   : > { %5849 = vmatprep.subr.bf16.mxu0 %v8080_v58 }
 0x4c6   : > { %5830 = vmatpush3.bf16.msra.mxu1 %v6935_v17  ;;  %v7497_v17 = vrot.slane %v2446_v15, %v6730_v33 }
 0x4c7   : > { %5855 = vmatprep.subr.bf16.mxu1 %v8080_v58 }
 0x4c8   : > { %5850 = vmatpush3.bf16.msra.mxu0 %v6938_v18  ;;  %v2490_v18 = vunpack.i.h.s16 %v7497_v17  ;;  %v2478_v40 = vcombine.high %v7497_v17, %v7497_v17 }
 0x4c9   : > { %5832 = vmatmul.mubr.bf16.vlgmr.msra.gmra.mxu1 %v2867_v12  ;;  %5875 = vmatprep.subr.bf16.mxu0 %v8080_v58 }
 0x4ca   : > { %5856 = vmatpush3.bf16.msra.mxu1 %v6948_v22  ;;  %5871 = vmatprep.mubr.msk.bf16.mxu1 %vm6502_vm0, %v8080_v58  ;;  %v4944_v22 = vpack.i.b16 %v7497_v17, %v7497_v17  ;;  %v2494_v6 = vunpack.i.h.s16 %v2478_v40  ;;  %v4946_v3 = vpack.i.b16 %v2478_v40, %v2478_v40 }
 0x4cb   : > { %5852 = vmatmul.mubr.bf16.vlgmr.msra.gmra.mxu0 %v2913_v14  ;;  %5857 = vmatprep.subr.bf16.mxu1 %v8080_v58 }
 0x4cc   : > { %5876 = vmatpush3.bf16.msra.mxu0 %v6952_v25  ;;  %5891 = vmatprep.mubr.msk.bf16.mxu0 %vm6502_vm0, %v8080_v58  ;;  %v3001_v25 = vpack.i.b16 %v2490_v18, %v2490_v18  ;;  %v3185_v0 = vpack.i.b16 %v2494_v6, %v2494_v6  ;;  %v3143_v41 = vrot.slane %v4946_v3, %v6737_v38 }
 0x4cd   : > { %5877 = vmatprep.subr.bf16.mxu0 %v8080_v58 }
 0x4ce   : > { %5858 = vmatpush3.bf16.msra.mxu1 %v6969_v39  ;;  %v2959_v39 = vrot.slane %v4944_v22, %v6737_v38 }
 0x4cf   : > { %5859 = vmatprep.subr.bf16.mxu1 %v8080_v58 }
 0x4d0   : > { %5878 = vmatpush3.bf16.msra.mxu0 %v6972_v42  ;;  %v3005_v42 = vrot.slane %v3001_v25, %v6737_v38 }
 0x4d1   : > { %5879 = vmatprep.subr.bf16.mxu0 %v8080_v58 }
 0x4d2   : > { %5860 = vmatpush3.bf16.msra.mxu1 %v6979_v44  ;;  %v2423_v44 = vpop.xlane.xlu0 %2422 }
 0x4d3   : > { %5861 = vmatprep.subr.bf16.mxu1 %v8080_v58  ;;  %6291 = vrcp.f32 %v2423_v44 }
 0x4d4   : > { %5880 = vmatpush3.bf16.msra.mxu0 %v6982_v45  ;;  %v2476_v45 = vcombine.high %v7453_v43, %v7453_v43  ;;  %v3189_v43 = vrot.slane %v3185_v0, %v6737_v38 }
 0x4d5   : > { %5881 = vmatprep.subr.bf16.mxu0 %v8080_v58 }
 0x4d6   : > { %5862 = vmatpush3.bf16.msra.mxu1 %v6989_v46  ;;  %v2492_v46 = vunpack.i.h.s16 %v2476_v45 }
 0x4d7   : > { %5863 = vmatprep.subr.bf16.mxu1 %v8080_v58 }
 0x4d8   : > { %5882 = vmatpush3.bf16.msra.mxu0 %v6992_v47  ;;  %v4945_v47 = vpack.i.b16 %v2476_v45, %v2476_v45 }
 0x4d9   : > { %5883 = vmatprep.subr.bf16.mxu0 %v8080_v58 }
 0x4da   : > { %5864 = vmatpush3.bf16.msra.mxu1 %v6999_v48  ;;  %v3093_v48 = vpack.i.b16 %v2492_v46, %v2492_v46 }
 0x4db   : > { %5865 = vmatprep.subr.bf16.mxu1 %v8080_v58 }
 0x4dc   : > { %5884 = vmatpush3.bf16.msra.mxu0 %v7002_v49 }
 0x4dd   : > { %5885 = vmatprep.subr.bf16.mxu0 %v8080_v58 }
 0x4de   : > { %5866 = vmatpush3.bf16.msra.mxu1 %v7009_v50  ;;  %v3051_v50 = vrot.slane %v4945_v47, %v6737_v38 }
 0x4df   : > { %5867 = vmatprep.subr.bf16.mxu1 %v8080_v58 }
 0x4e0   : > { %5886 = vmatpush3.bf16.msra.mxu0 %v7012_v51  ;;  %v7551_v49 = vpop.eup %6291 }
 0x4e1   : > { %5887 = vmatprep.subr.bf16.mxu0 %v8080_v58  ;;  %v3234_v34 = vrot.slane %v7551_v49, 2  ;;  %v3235_v9 = vrot.slane %v7551_v49, 3 }
 0x4e2   : > { %5868 = vmatpush3.bf16.msra.mxu1 %v7019_v52  ;;  %v3097_v52 = vrot.slane %v3093_v48, %v6737_v38 }
 0x4e3   : > { %5869 = vmatprep.subr.bf16.mxu1 %v8080_v58 }
 0x4e4   : > { %5888 = vmatpush3.bf16.msra.mxu0 %v7022_v53 }
 0x4e5   : > { %5889 = vmatprep.subr.bf16.mxu0 %v8080_v58 }
 0x4e6   : > { %5870 = vmatpush3.bf16.msra.mxu1 %v7034_v56  ;;  %v3233_v56 = vrot.slane %v7551_v49, 1 }
 0x4e7   : > { %5895 = vmatprep.subr.bf16.mxu1 %v8080_v58 }
 0x4e8   : > { %5890 = vmatpush3.bf16.msra.mxu0 %v7037_v57 }
 0x4e9   : > { %5872 = vmatmul.mubr.bf16.vlgmr.msra.gmra.mxu1 %v2959_v39  ;;  %5915 = vmatprep.subr.bf16.mxu0 %v8080_v58 }
 0x4ea   : > { %5896 = vmatpush3.bf16.msra.mxu1 %v7047_v61  ;;  %5911 = vmatprep.mubr.msk.bf16.mxu1 %vm6502_vm0, %v8080_v58 }
 0x4eb   : > { %5892 = vmatmul.mubr.bf16.vlgmr.msra.gmra.mxu0 %v3005_v42  ;;  %5897 = vmatprep.subr.bf16.mxu1 %v8080_v58 }
 0x4ec   : > { %5916 = vmatpush3.bf16.msra.mxu0 %v7051_v63  ;;  %5931 = vmatprep.mubr.msk.bf16.mxu0 %vm6502_vm0, %v8080_v58 }
 0x4ed   : > { %5917 = vmatprep.subr.bf16.mxu0 %v8080_v58 }
 0x4ee   : > { %5898 = vmatpush3.bf16.msra.mxu1 %v7067_v7  ;;  %v8081_v7 = vld [vmem:[#allocation9_spill] sm:$0xff] }
 0x4ef   : > { %5899 = vmatprep.subr.bf16.mxu1 %v8080_v58 }
 0x4f0   : > { %5918 = vmatpush3.bf16.msra.mxu0 %v7070_v13 }
 0x4f1   : > { %5919 = vmatprep.subr.bf16.mxu0 %v8080_v58 }
 0x4f2   : > { %5900 = vmatpush3.bf16.msra.mxu1 %v7077_v19 }
 0x4f3   : > { %5901 = vmatprep.subr.bf16.mxu1 %v8080_v58 }
 0x4f4   : > { %5920 = vmatpush3.bf16.msra.mxu0 %v7080_v20 }
 0x4f5   : > { %5921 = vmatprep.subr.bf16.mxu0 %v8080_v58 }
 0x4f6   : > { %5902 = vmatpush3.bf16.msra.mxu1 %v7087_v21 }
 0x4f7   : > { %5903 = vmatprep.subr.bf16.mxu1 %v8080_v58 }
 0x4f8   : > { %5922 = vmatpush3.bf16.msra.mxu0 %v7090_v23  ;;  %v8082_v23 = vld [vmem:[#allocation10_spill] sm:$0xff] }
 0x4f9   : > { %5923 = vmatprep.subr.bf16.mxu0 %v8080_v58 }
 0x4fa   : > { %5904 = vmatpush3.bf16.msra.mxu1 %v7097_v26 }
 0x4fb   : > { %5905 = vmatprep.subr.bf16.mxu1 %v8080_v58 }
 0x4fc   : > { %5924 = vmatpush3.bf16.msra.mxu0 %v7100_v27 }
 0x4fd   : > { %5925 = vmatprep.subr.bf16.mxu0 %v8080_v58 }
 0x4fe   : > { %5906 = vmatpush3.bf16.msra.mxu1 %v7107_v28 }
 0x4ff   : > { %5907 = vmatprep.subr.bf16.mxu1 %v8080_v58 }
 0x500   : > { %5926 = vmatpush3.bf16.msra.mxu0 %v7110_v29  ;;  %v8083_v29 = vld [vmem:[#allocation11_spill] sm:$0xff] }
 0x501   : > { %5927 = vmatprep.subr.bf16.mxu0 %v8080_v58 }
 0x502   : > { %5908 = vmatpush3.bf16.msra.mxu1 %v7117_v30 }
 0x503   : > { %5909 = vmatprep.subr.bf16.mxu1 %v8080_v58 }
 0x504   : > { %5928 = vmatpush3.bf16.msra.mxu0 %v7120_v31 }
 0x505   : > { %5929 = vmatprep.subr.bf16.mxu0 %v8080_v58 }
 0x506   : > { %5910 = vmatpush3.bf16.msra.mxu1 %v7129_v35 }
 0x507   : > { %5935 = vmatprep.subr.bf16.mxu1 %v8080_v58 }
 0x508   : > { %5930 = vmatpush3.bf16.msra.mxu0 %v7132_v36  ;;  %v8084_v36 = vld [vmem:[#allocation12_spill] sm:$0xff] }
 0x509   : > { %5912 = vmatmul.mubr.bf16.vlgmr.msra.gmra.mxu1 %v3051_v50  ;;  %v2535_v51 = vpop.f32.mrf.mxu1  ;;  %5955 = vmatprep.subr.bf16.mxu0 %v8080_v58 }
 0x50a   : > { %v3263_v53 = vmul.f32 %v7551_v49, %v2535_v51  ;;  %5936 = vmatpush3.bf16.msra.mxu1 %v7140_v32  ;;  %5951 = vmatprep.mubr.msk.bf16.mxu1 %vm6502_vm0, %v8080_v58  ;;  %v3236_v51 = vrot.slane %v7551_v49, 4 }
 0x50b   : > { %5932 = vmatmul.mubr.bf16.vlgmr.msra.gmra.mxu0 %v3097_v52  ;;  %v5673_v57 = vpop.f32.mrf.mxu1  ;;  %v2581_v61 = vpop.f32.mrf.mxu0  ;;  %5937 = vmatprep.subr.bf16.mxu1 %v8080_v58 }
 0x50c   : > { %v3264_v63 = vmul.f32 %v3233_v56, %v2581_v61  ;;  %5956 = vmatpush3.bf16.msra.mxu0 %v8081_v7  ;;  %5971 = vmatprep.mubr.msk.bf16.mxu0 %vm6502_vm0, %v8080_v58  ;;  %v3279_v20 = vpack.c.bf16 %v3263_v53, %v3263_v53  ;;  %v3237_v56 = vrot.slane %v7551_v49, 5 }
 0x50d   : > { %v2538_v13 = vpop.f32.mrf.mxu1  ;;  %v5693_v19 = vpop.f32.mrf.mxu0  ;;  %5957 = vmatprep.subr.bf16.mxu0 %v8080_v58 }
 0x50e   : > { %v3280_v21 = vpack.c.bf16 %v3264_v63, %v3264_v63  ;;  %5938 = vmatpush3.bf16.msra.mxu1 %v8082_v23  ;;  %v3317_v31 = vunpack.c.l.b16 %v3279_v20 }
 0x50f   : > { %v5674_v26 = vpop.f32.mrf.mxu1  ;;  %v2584_v27 = vpop.f32.mrf.mxu0  ;;  %5939 = vmatprep.subr.bf16.mxu1 %v8080_v58 }
 0x510   : > { %v3318_v28 = vunpack.c.l.b16 %v3280_v21  ;;  %5958 = vmatpush3.bf16.msra.mxu0 %v8083_v29 }
 0x511   : > { %v5694_v30 = vpop.f32.mrf.mxu0  ;;  %5959 = vmatprep.subr.bf16.mxu0 %v8080_v58 }
 0x512   : > { %v3333_v35 = vrot.slane %v3318_v28, 7  ;;  %5940 = vmatpush3.bf16.msra.mxu1 %v8084_v36  ;;  %v6279_v36 = vld [vmem:[%s8036_s6 + $0x38] sm:$0xff]  }
 0x513   : > { %5941 = vmatprep.subr.bf16.mxu1 %v8080_v58 }
 0x514   : > { %v3334_v32 = vsel %vm2374_vm2, %v3333_v35, %v3317_v31  ;;  %5960 = vmatpush3.bf16.msra.mxu0 %v8085_v2  ;;  %v6281_v2 = vld [vmem:[%s8036_s6 + $0x28] sm:$0xff]  }
 0x515   : > { %5961 = vmatprep.subr.bf16.mxu0 %v8080_v58 }
 0x516   : > { %5942 = vmatpush3.bf16.msra.mxu1 %v8086_v16  ;;  %v6282_v16 = vld [vmem:[%s8036_s6 + $0x20] sm:$0xff]  }
 0x517   : > { %5943 = vmatprep.subr.bf16.mxu1 %v8080_v58 }
 0x518   : > { %5962 = vmatpush3.bf16.msra.mxu0 %v8087_v62  ;;  %v6283_v62 = vld [vmem:[%s8036_s6 + $0x18] sm:$0xff]  }
 0x519   : > { %5963 = vmatprep.subr.bf16.mxu0 %v8080_v58 }
 0x51a   : > { %5944 = vmatpush3.bf16.msra.mxu1 %v8088_v8  ;;  %v3238_v8 = vrot.slane %v7551_v49, 6 }
 0x51b   : > { %5945 = vmatprep.subr.bf16.mxu1 %v8080_v58 }
 0x51c   : > { %5964 = vmatpush3.bf16.msra.mxu0 %v8089_v4 }
 0x51d   : > { %5965 = vmatprep.subr.bf16.mxu0 %v8080_v58 }
 0x51e   : > { %5946 = vmatpush3.bf16.msra.mxu1 %v8090_v54  ;;  %v3239_v54 = vrot.slane %v7551_v49, 7 }
 0x51f   : > { %5947 = vmatprep.subr.bf16.mxu1 %v8080_v58 }
 0x520   : > { %5966 = vmatpush3.bf16.msra.mxu0 %v8091_v10 }
 0x521   : > { %5967 = vmatprep.subr.bf16.mxu0 %v8080_v58 }
 0x522   : > { %5948 = vmatpush3.bf16.msra.mxu1 %v8092_v59 }
 0x523   : > { %5949 = vmatprep.subr.bf16.mxu1 %v8080_v58 }
 0x524   : > { %5968 = vmatpush3.bf16.msra.mxu0 %v8093_v5 }
 0x525   : > { %5969 = vmatprep.subr.bf16.mxu0 %v8080_v58 }
 0x526   : > { %5950 = vmatpush3.bf16.msra.mxu1 %v8094_v55 }
 0x527   : > { %5975 = vmatprep.subr.bf16.mxu1 %v8080_v58 }
 0x528   : > { %5970 = vmatpush3.bf16.msra.mxu0 %v8095_v24 }
 0x529   : > { %v2627_v37 = vpop.f32.mrf.mxu1  ;;  %5952 = vmatmul.mubr.bf16.vlgmr.msra.gmra.mxu1 %v3143_v41  ;;  %5995 = vmatprep.subr.bf16.mxu0 %v8080_v58 }
 0x52a   : > { %v3265_v60 = vmul.f32 %v3234_v34, %v2627_v37  ;;  %5991 = vmatprep.mubr.msk.bf16.mxu1 %vm6502_vm0, %v8080_v58  ;;  %5976 = vmatpush3.bf16.msra.mxu1 %v6279_v36  ;;  %v6284_v37 = vld [vmem:[%s8036_s6 + $0x10] sm:$0xff]  }
 0x52b   : > { %v5713_v11 = vpop.f32.mrf.mxu1  ;;  %v2673_v12 = vpop.f32.mrf.mxu0  ;;  %5972 = vmatmul.mubr.bf16.vlgmr.msra.gmra.mxu0 %v3189_v43  ;;  %5977 = vmatprep.subr.bf16.mxu1 %v8080_v58 }
 0x52c   : > { %v3281_v14 = vpack.c.bf16 %v3265_v60, %v3265_v60  ;;  %v3266_v15 = vmul.f32 %v3235_v9, %v2673_v12  ;;  %5997 = vmatprep.mubr.msk.bf16.mxu0 %vm6502_vm0, %v8080_v58  ;;  %v6285_v12 = vld [vmem:[%s8036_s6 + $0x8] sm:$0xff]  }
 0x52d   : > { %v2630_v17 = vpop.f32.mrf.mxu1  ;;  %v5733_v18 = vpop.f32.mrf.mxu0 }
 0x52e   : > { %v3319_v22 = vunpack.c.l.b16 %v3281_v14  ;;  %v3282_v25 = vpack.c.bf16 %v3266_v15, %v3266_v15  ;;  %v6286_v15 = vld [vmem:[%s8036_s6] sm:$0xff]   ;;  %v2425_v17 = vpop.xlane.xlu1 %2424 }
 0x52f   : > { %v5714_v39 = vpop.f32.mrf.mxu1  ;;  %v2676_v42 = vpop.f32.mrf.mxu0  ;;  %6293 = vrcp.f32 %v2425_v17 }
 0x530   : > { %v3335_v44 = vrot.slane %v3319_v22, 6  ;;  %v3320_v45 = vunpack.c.l.b16 %v3282_v25 }
 0x531   : > { %v5734_v46 = vpop.f32.mrf.mxu0 }
 0x532   : > { %v3336_v47 = vsel %vm2377_vm3, %v3335_v44, %v3334_v32  ;;  %v3337_v48 = vrot.slane %v3320_v45, 5  ;;  %v6280_v32 = vld [vmem:[%s8036_s6 + $0x30] sm:$0xff]  }
 0x533   : > { %5978 = vmatpush3.bf16.msra.mxu1 %v6280_v32 }
 0x534   : > { %v3338_v50 = vsel %vm2380_vm4, %v3337_v48, %v3336_v47  ;;  %5979 = vmatprep.subr.bf16.mxu1 %v8080_v58 }
 0x537   : > { %5980 = vmatpush3.bf16.msra.mxu1 %v6281_v2 }
 0x538   : > { %5981 = vmatprep.subr.bf16.mxu1 %v8080_v58 }
 0x53b   : > { %5982 = vmatpush3.bf16.msra.mxu1 %v6282_v16 }
 0x53c   : > { %5983 = vmatprep.subr.bf16.mxu1 %v8080_v58  ;;  %v6294_v18 = vpop.eup %6293 }
 0x53d   : > { %v3240_v39 = vrot.slane %v6294_v18, 1  ;;  %v3241_v16 = vrot.slane %v6294_v18, 2 }
 0x53f   : > { %5984 = vmatpush3.bf16.msra.mxu1 %v6283_v62 }
 0x540   : > { %5985 = vmatprep.subr.bf16.mxu1 %v8080_v58 }
 0x543   : > { %5986 = vmatpush3.bf16.msra.mxu1 %v6284_v37  ;;  %v3245_v37 = vrot.slane %v6294_v18, 6 }
 0x544   : > { %5987 = vmatprep.subr.bf16.mxu1 %v8080_v58 }
 0x547   : > { %5988 = vmatpush3.bf16.msra.mxu1 %v6285_v12 }
 0x548   : > { %5989 = vmatprep.subr.bf16.mxu1 %v8080_v58 }
 0x549   : > { %v2719_v52 = vpop.f32.mrf.mxu1 }
 0x54a   : > { %v3267_v53 = vmul.f32 %v3236_v51, %v2719_v52 }
 0x54b   : > { %v5753_v57 = vpop.f32.mrf.mxu1  ;;  %v2765_v61 = vpop.f32.mrf.mxu0  ;;  %5990 = vmatpush3.bf16.msra.mxu1 %v6286_v15  ;;  %v3246_v15 = vrot.slane %v6294_v18, 7 }
 0x54c   : > { %v3283_v63 = vpack.c.bf16 %v3267_v53, %v3267_v53  ;;  %v3268_v7 = vmul.f32 %v3237_v56, %v2765_v61  ;;  %6013 = vmatprep.subr.bf16.mxu1 %v8080_v58 }
 0x54d   : > { %v2722_v13 = vpop.f32.mrf.mxu1  ;;  %v5773_v19 = vpop.f32.mrf.mxu0 }
 0x54e   : > { %v3321_v20 = vunpack.c.l.b16 %v3283_v63  ;;  %v3284_v21 = vpack.c.bf16 %v3268_v7, %v3268_v7 }
 0x54f   : > { %v5754_v23 = vpop.f32.mrf.mxu1  ;;  %v2768_v26 = vpop.f32.mrf.mxu0 }
 0x550   : > { %v3339_v27 = vrot.slane %v3321_v20, 4  ;;  %v3322_v28 = vunpack.c.l.b16 %v3284_v21 }
 0x551   : > { %v5774_v29 = vpop.f32.mrf.mxu0 }
 0x552   : > { %v3340_v30 = vsel %vm2383_vm5, %v3339_v27, %v3338_v50  ;;  %v3341_v31 = vrot.slane %v3322_v28, 3 }
 0x554   : > { %v3342_v35 = vsel %vm2386_vm6, %v3341_v31, %v3340_v30 }
 0x569   : > { %v2811_v4 = vpop.f32.mrf.mxu1 }
 0x56a   : > { %v3269_v40 = vmul.f32 %v3238_v8, %v2811_v4  ;;  %v3242_v8 = vrot.slane %v6294_v18, 3  ;;  %v3243_v4 = vrot.slane %v6294_v18, 4 }
 0x56b   : > { %v5793_v10 = vpop.f32.mrf.mxu1  ;;  %v2857_v6 = vpop.f32.mrf.mxu0 }
 0x56c   : > { %v3285_v59 = vpack.c.bf16 %v3269_v40, %v3269_v40  ;;  %v3270_v3 = vmul.f32 %v3239_v54, %v2857_v6  ;;  %v3244_v6 = vrot.slane %v6294_v18, 5 }
 0x56d   : > { %v2814_v5 = vpop.f32.mrf.mxu1  ;;  %v5813_v0 = vpop.f32.mrf.mxu0 }
 0x56e   : > { %v3323_v55 = vunpack.c.l.b16 %v3285_v59  ;;  %v3286_v41 = vpack.c.bf16 %v3270_v3, %v3270_v3 }
 0x56f   : > { %v5794_v24 = vpop.f32.mrf.mxu1  ;;  %v2860_v34 = vpop.f32.mrf.mxu0 }
 0x570   : > { %v3343_v43 = vrot.slane %v3323_v55, 2  ;;  %v3324_v60 = vunpack.c.l.b16 %v3286_v41 }
 0x571   : > { %v5814_v9 = vpop.f32.mrf.mxu0 }
 0x572   : > { %v3344_v49 = vsel %vm2389_vm7, %v3343_v43, %v3342_v35  ;;  %v3345_v11 = vrot.slane %v3324_v60, 1 }
 0x574   : > { %v7644_v14 = vsel %vm2392_vm8, %v3345_v11, %v3344_v49 }
 0x589   : > { %v2903_v22 = vpop.f32.mrf.mxu1 }
 0x58a   : > { %v3271_v25 = vmul.f32 %v6294_v18, %v2903_v22 }
 0x58b   : > { %v5833_v42 = vpop.f32.mrf.mxu1  ;;  %v2949_v44 = vpop.f32.mrf.mxu0 }
 0x58c   : > { %v3272_v45 = vmul.f32 %v3240_v39, %v2949_v44  ;;  %v3287_v48 = vpack.c.bf16 %v3271_v25, %v3271_v25 }
 0x58d   : > { %v2906_v46 = vpop.f32.mrf.mxu1  ;;  %v5853_v47 = vpop.f32.mrf.mxu0 }
 0x58e   : > { %v3288_v50 = vpack.c.bf16 %v3272_v45, %v3272_v45  ;;  %v3325_v57 = vunpack.c.l.b16 %v3287_v48 }
 0x58f   : > { %v5834_v51 = vpop.f32.mrf.mxu1  ;;  %v2952_v52 = vpop.f32.mrf.mxu0 }
 0x590   : > { %v3326_v53 = vunpack.c.l.b16 %v3288_v50 }
 0x591   : > { %v5854_v56 = vpop.f32.mrf.mxu0 }
 0x592   : > { %v3347_v61 = vrot.slane %v3326_v53, 7 }
 0x594   : > { %v3348_v63 = vsel %vm2374_vm2, %v3347_v61, %v3325_v57 }
 0x5a9   : > { %v2995_v7 = vpop.f32.mrf.mxu1 }
 0x5aa   : > { %v3273_v62 = vmul.f32 %v3241_v16, %v2995_v7 }
 0x5ab   : > { %v5873_v13 = vpop.f32.mrf.mxu1  ;;  %v3041_v19 = vpop.f32.mrf.mxu0 }
 0x5ac   : > { %v3274_v40 = vmul.f32 %v3242_v8, %v3041_v19  ;;  %v3289_v54 = vpack.c.bf16 %v3273_v62, %v3273_v62  ;;  %v654_v19 = vld [vmem:[%s7665_s26] sm:$0x3] }
 0x5ad   : > { %v2998_v20 = vpop.f32.mrf.mxu1  ;;  %v5893_v21 = vpop.f32.mrf.mxu0 }
 0x5ae   : > { %v3290_v59 = vpack.c.bf16 %v3274_v40, %v3274_v40  ;;  %v3327_v5 = vunpack.c.l.b16 %v3289_v54  ;;  %v3528_v20 = vsel %vm731_vm1, %v654_v19, 0  ;;  %v655_v40 = vld [vmem:[%s7665_s26 + $0x2] sm:$0x3]  ;;  %v659_v54 = vld [vmem:[%s7665_s26 + $0xa] sm:$0x3] }
 0x5af   : > { %v5874_v23 = vpop.f32.mrf.mxu1  ;;  %v3044_v26 = vpop.f32.mrf.mxu0  ;;  %5996 = vmatpush3.bf16.xpose.msra.mxu0 %v3528_v20 }
 0x5b0   : > { %v3328_v55 = vunpack.c.l.b16 %v3290_v59  ;;  %v3349_v24 = vrot.slane %v3327_v5, 6  ;;  %6001 = vmatprep.subr.bf16.mxu0 %v8080_v58  ;;  %v4947_v26 = vld [vmem:[%s8037_s7] ss:$0 sm:$0xff]  ;;  %v3783_v59 = vsel %vm731_vm1, %v659_v54, 0 }
 0x5b1   : > { %v5894_v27 = vpop.f32.mrf.mxu0 }
 0x5b2   : > { %v3351_v43 = vrot.slane %v3328_v55, 5  ;;  %v3350_v49 = vsel %vm2377_vm3, %v3349_v24, %v3348_v63 }
 0x5b4   : > { %v3352_v42 = vsel %vm2380_vm4, %v3351_v43, %v3350_v49  ;;  %v656_v43 = vld [vmem:[%s7665_s26 + $0x4] sm:$0x3] }
 0x5c9   : > { %v3087_v28 = vpop.f32.mrf.mxu1 }
 0x5ca   : > { %v3275_v10 = vmul.f32 %v3243_v4, %v3087_v28 }
 0x5cb   : > { %v5913_v29 = vpop.f32.mrf.mxu1  ;;  %v3133_v30 = vpop.f32.mrf.mxu0 }
 0x5cc   : > { %v3276_v3 = vmul.f32 %v3244_v6, %v3133_v30  ;;  %v3291_v0 = vpack.c.bf16 %v3275_v10, %v3275_v10  ;;  %v3579_v6 = vsel %vm731_vm1, %v655_v40, 0 }
 0x5cd   : > { %v3090_v31 = vpop.f32.mrf.mxu1  ;;  %v5933_v35 = vpop.f32.mrf.mxu0 }
 0x5ce   : > { %v3292_v41 = vpack.c.bf16 %v3276_v3, %v3276_v3  ;;  %v3329_v34 = vunpack.c.l.b16 %v3291_v0 }
 0x5cf   : > { %v5914_v36 = vpop.f32.mrf.mxu1  ;;  %v3136_v32 = vpop.f32.mrf.mxu0 }
 0x5d0   : > { %v3330_v60 = vunpack.c.l.b16 %v3292_v41  ;;  %v3353_v11 = vrot.slane %v3329_v34, 4 }
 0x5d1   : > { %v5934_v2 = vpop.f32.mrf.mxu0 }
 0x5d2   : > { %v3355_v44 = vrot.slane %v3330_v60, 3  ;;  %v3354_v47 = vsel %vm2383_vm5, %v3353_v11, %v3352_v42  ;;  %v661_v60 = vld [vmem:[%s7665_s26 + $0xe] sm:$0x3] }
 0x5d3   : > { %v3885_v49 = vsel %vm731_vm1, %v661_v60, 0 }
 0x5d4   : > { %v3356_v18 = vsel %vm2386_vm6, %v3355_v44, %v3354_v47  ;;  %v663_v44 = vld [vmem:[%s7665_s26 + $0x12] sm:$0x3] }
 0x5e9   : > { %v3179_v9 = vpop.f32.mrf.mxu1 }
 0x5ea   : > { %v3277_v12 = vmul.f32 %v3245_v37, %v3179_v9  ;;  %v3630_v9 = vsel %vm731_vm1, %v656_v43, 0 }
 0x5eb   : > { %v5953_v17 = vpop.f32.mrf.mxu1  ;;  %v3225_v22 = vpop.f32.mrf.mxu0 }
 0x5ec   : > { %v3293_v25 = vpack.c.bf16 %v3277_v12, %v3277_v12  ;;  %v3278_v39 = vmul.f32 %v3246_v15, %v3225_v22 }
 0x5ed   : > { %v3182_v45 = vpop.f32.mrf.mxu1  ;;  %v5973_v46 = vpop.f32.mrf.mxu0 }
 0x5ee   : > { %v3331_v48 = vunpack.c.l.b16 %v3293_v25  ;;  %v3294_v50 = vpack.c.bf16 %v3278_v39, %v3278_v39  ;;  %v658_v39 = vld [vmem:[%s7665_s26 + $0x8] sm:$0x3]  ;;  %v3987_v46 = vsel %vm731_vm1, %v663_v44, 0 }
 0x5ef   : > { %v5954_v51 = vpop.f32.mrf.mxu1  ;;  %v3228_v52 = vpop.f32.mrf.mxu0  ;;  %v3732_v45 = vsel %vm731_vm1, %v658_v39, 0 }
 0x5f0   : > { %v3357_v53 = vrot.slane %v3331_v48, 2  ;;  %v3332_v56 = vunpack.c.l.b16 %v3294_v50 }
 0x5f1   : > { %v5974_v57 = vpop.f32.mrf.mxu0 }
 0x5f2   : > { %v3358_v61 = vsel %vm2389_vm7, %v3357_v53, %v3356_v18  ;;  %v3359_v63 = vrot.slane %v3332_v56, 1  ;;  %v660_v18 = vld [vmem:[%s7665_s26 + $0xc] sm:$0x3]  ;;  %v665_v57 = vld [vmem:[%s7665_s26 + $0x16] sm:$0x3] }
 0x5f4   : > { %v3360_v7 = vsel %vm2392_vm8, %v3359_v63, %v3358_v61  ;;  %v3834_v61 = vsel %vm731_vm1, %v660_v18, 0 }
 0x5f5   : > { %v3361_v13 = vpack.c.b16 %v3360_v7, %v7644_v14  ;;  %v657_v14 = vld [vmem:[%s7665_s26 + $0x6] sm:$0x3] }
 0x5f6   : > { %v3681_v21 = vsel %vm731_vm1, %v657_v14, 0 }
 0x5f7   : > { %5992 = vmatmul.mubr.bf16.vlgmr.msra.gmra.mxu1 %v3361_v13  ;;  %v4089_v13 = vsel %vm731_vm1, %v665_v57, 0 }
 0x5f8   : > { %6015 = vmatprep.mubr.msk.bf16.mxu1 %vm6502_vm0, %v8080_v58  ;;  %6014 = vmatpush3.bf16.xpose.msra.mxu1 %v3681_v21  ;;  %v662_v21 = vld [vmem:[%s7665_s26 + $0x10] sm:$0x3] }
 0x5f9   : > { %6025 = vmatprep.subr.bf16.mxu1 %v8080_v58 }
 0x6b7   : > { %v3445_v23 = vpop.f32.mrf.mxu1 }
 0x6b8   : > { %v3446_v29 = vadd.f32 %v4947_v26, %v3445_v23  ;;  %v667_v23 = vld [vmem:[%s7665_s26 + $0x1a] sm:$0x3] }
 0x6b9   : > { %v5993_v27 = vpop.f32.mrf.mxu1 }
 0x6bb   : > { %v3448_v28 = vpop.f32.mrf.mxu1 }
 0x6bc   : > { %v3449_v30 = vadd.f32 %v4947_v26, %v3448_v28  ;;  %v3936_v26 = vsel %vm731_vm1, %v662_v21, 0 }
 0x6bd   : > { %v5994_v31 = vpop.f32.mrf.mxu1 }
 0x6be   : > { %v3452_v35 = vpack.c.bf16 %v3449_v30, %v3446_v29  ;;  %v4956_v41 = vpack.c.bf16 %v3449_v30, %v3449_v30  ;;  %v4191_v30 = vsel %vm731_vm1, %v667_v23, 0 }
 0x6c0   : > { %v3461_v36 = vrot.slane %v3452_v35, %v6730_v33  ;;  %v3468_v11 = vrot.slane %v4956_v41, %v6730_v33 }
 0x6c2   : > { %v3469_v32 = vcombine.high %v3461_v36, %v3461_v36  ;;  %v3477_v2 = vrot.slane %v3461_v36, %v6730_v33  ;;  %v7709_v22 = vrot.slane %v3468_v11, %v6730_v33  ;;  %v3470_v47 = vcombine.high %v3468_v11, %v3468_v11 }
 0x6c4   : > { %v3491_v16 = vrot.slane %v3469_v32, %v6730_v33  ;;  %v7679_v62 = vcombine.high %v3477_v2, %v3477_v2  ;;  %v4957_v4 = vpack.i.b16 %v3477_v2, %v3477_v2  ;;  %v3504_v3 = vunpack.i.h.s16 %v3477_v2  ;;  %v664_v32 = vld [vmem:[%s7665_s26 + $0x14] sm:$0x3]  ;;  %v669_v2 = vld [vmem:[%s7665_s26 + $0x1e] sm:$0x3] }
 0x6c5   : > { %v3512_v48 = vunpack.i.h.s16 %v7709_v22  ;;  %v3498_v52 = vrot.slane %v3470_v47, %v6730_v33  ;;  %v3500_v19 = vcombine.high %v7709_v22, %v7709_v22  ;;  %v4969_v35 = vpack.i.b16 %v7709_v22, %v7709_v22 }
 0x6c6   : > { %v3506_v8 = vunpack.i.h.s16 %v3491_v16  ;;  %v3508_v5 = vunpack.i.h.s16 %v7679_v62  ;;  %v3523_v0 = vrot.slane %v4957_v4, %v6737_v38  ;;  %v7690_v24 = vcombine.high %v3491_v16, %v3491_v16 }
 0x6c7   : > { %v3570_v34 = vpack.i.b16 %v3504_v3, %v3504_v3  ;;  %v4960_v25 = vpack.i.b16 %v3491_v16, %v3491_v16  ;;  %v4963_v53 = vpack.i.b16 %v7679_v62, %v7679_v62  ;;  %v3978_v56 = vpack.i.b16 %v3512_v48, %v3512_v48 }
 0x6c8   : > { %v3672_v10 = vpack.i.b16 %v3506_v8, %v3506_v8  ;;  %5998 = vmatmul.mubr.msk.bf16.vlgmr.msra.gmra.mxu0 %vm731_vm1, %v3523_v0  ;;  %v3774_v37 = vpack.i.b16 %v3508_v5, %v3508_v5  ;;  %v3510_v17 = vunpack.i.h.s16 %v7690_v24  ;;  %v3514_v33 = vunpack.i.h.s16 %v3498_v52 }
 0x6c9   : > { %6002 = vmatpush3.bf16.xpose.msra.mxu0 %v3579_v6  ;;  %6003 = vmatprep.mubr.msk.bf16.mxu0 %vm6502_vm0, %v8080_v58  ;;  %v3574_v12 = vrot.slane %v3570_v34, %v6737_v38  ;;  %v3625_v50 = vrot.slane %v4960_v25, %v6737_v38  ;;  %v3727_v63 = vrot.slane %v4963_v53, %v6737_v38  ;;  %v3516_v27 = vunpack.i.h.s16 %v3500_v19  ;;  %v666_v6 = vld [vmem:[%s7665_s26 + $0x18] sm:$0x3] }
 0x6ca   : > { %v3676_v55 = vrot.slane %v3672_v10, %v6737_v38  ;;  %6007 = vmatprep.subr.bf16.mxu0 %v8080_v58  ;;  %v3778_v15 = vrot.slane %v3774_v37, %v6737_v38  ;;  %v3876_v42 = vpack.i.b16 %v3510_v17, %v3510_v17  ;;  %v3982_v7 = vrot.slane %v3978_v56, %v6737_v38 }
 0x6cb   : > { %v4080_v20 = vpack.i.b16 %v3514_v33, %v3514_v33  ;;  %v4966_v14 = vpack.i.b16 %v7690_v24, %v7690_v24  ;;  %v3502_v31 = vcombine.high %v3498_v52, %v3498_v52  ;;  %v4182_v36 = vpack.i.b16 %v3516_v27, %v3516_v27 }
 0x6cc   : > { %6016 = vmatmul.mubr.msk.bf16.vlgmr.msra.gmra.mxu1 %vm731_vm1, %v3676_v55  ;;  %v3880_v51 = vrot.slane %v3876_v42, %v6737_v38  ;;  %v4038_v16 = vsel %vm731_vm1, %v664_v32, 0  ;;  %v3931_v62 = vrot.slane %v4969_v35, %v6737_v38  ;;  %v4293_v4 = vsel %vm731_vm1, %v669_v2, 0  ;;  %v668_v55 = vld [vmem:[%s7665_s26 + $0x1c] sm:$0x3]  ;;  %s6438_s26 = scalar_lea.vmem %s6437_s16, 512 }
 0x6cd   : > { %6026 = vmatpush3.bf16.xpose.msra.mxu1 %v3783_v59  ;;  %6027 = vmatprep.mubr.msk.bf16.mxu1 %vm6502_vm0, %v8080_v58  ;;  %v3829_v28 = vrot.slane %v4966_v14, %v6737_v38  ;;  %v4084_v29 = vrot.slane %v4080_v20, %v6737_v38  ;;  %v4186_v8 = vrot.slane %v4182_v36, %v6737_v38  ;;  %v3518_v40 = vunpack.i.h.s16 %v3502_v31  ;;  %p6440_p10 = scmp.lt.s32.totalorder %s6438_s26, %s6432_s21 }
 0x6ce   : > { %6037 = vmatprep.subr.bf16.mxu1 %v8080_v58  ;;  %v4972_v54 = vpack.i.b16 %v3498_v52, %v3498_v52  ;;  %v4140_v3 = vsel %vm731_vm1, %v666_v6, 0  ;;  %v4975_v0 = vpack.i.b16 %v3500_v19, %v3500_v19  ;;  %v4242_v24 = vsel %vm731_vm1, %v668_v55, 0 }
 0x6cf   : > { %v4284_v10 = vpack.i.b16 %v3518_v40, %v3518_v40  ;;  %v4978_v34 = vpack.i.b16 %v3502_v31, %v3502_v31  ;;  %p6441_p0 = por %p6440_p10, %p6439_p8 }
 0x6d0   : > { %6004 = vmatmul.mubr.msk.bf16.vlgmr.msra.gmra.mxu0 %vm731_vm1, %v3574_v12  ;;  %v4033_v59 = vrot.slane %v4972_v54, %v6737_v38  ;;  %v4135_v41 = vrot.slane %v4975_v0, %v6737_v38 }
 0x6d1   : > { %6008 = vmatpush3.bf16.xpose.msra.mxu0 %v3630_v9  ;;  %6009 = vmatprep.mubr.msk.bf16.mxu0 %vm6502_vm0, %v8080_v58  ;;  %v4288_v5 = vrot.slane %v4284_v10, %v6737_v38  ;;  %v4237_v37 = vrot.slane %v4978_v34, %v6737_v38  ;;  %p6442_p2 = pnand %p6441_p0, %p6435_p7 }
 0x6d2   : > { %6019 = vmatprep.subr.bf16.mxu0 %v8080_v58 }
 0x6d4   : > { %6028 = vmatmul.mubr.msk.bf16.vlgmr.msra.gmra.mxu1 %vm731_vm1, %v3778_v15 }
 0x6d5   : > { %6038 = vmatpush3.bf16.xpose.msra.mxu1 %v3885_v49  ;;  %6039 = vmatprep.mubr.msk.bf16.mxu1 %vm6502_vm0, %v8080_v58 }
 0x6d6   : > { %6049 = vmatprep.subr.bf16.mxu1 %v8080_v58 }
 0x6d8   : > { %6010 = vmatmul.mubr.msk.bf16.vlgmr.msra.gmra.mxu0 %vm731_vm1, %v3625_v50 }
 0x6d9   : > { %6020 = vmatpush3.bf16.xpose.msra.mxu0 %v3732_v45  ;;  %6021 = vmatprep.mubr.msk.bf16.mxu0 %vm6502_vm0, %v8080_v58 }
 0x6da   : > { %6031 = vmatprep.subr.bf16.mxu0 %v8080_v58 }
 0x6dc   : > { %6040 = vmatmul.mubr.msk.bf16.vlgmr.msra.gmra.mxu1 %vm731_vm1, %v3880_v51 }
 0x6dd   : > { %6050 = vmatpush3.bf16.xpose.msra.mxu1 %v3987_v46  ;;  %6051 = vmatprep.mubr.msk.bf16.mxu1 %vm6502_vm0, %v8080_v58 }
 0x6de   : > { %6061 = vmatprep.subr.bf16.mxu1 %v8080_v58 }
 0x6e0   : > { %6022 = vmatmul.mubr.msk.bf16.vlgmr.msra.gmra.mxu0 %vm731_vm1, %v3727_v63 }
 0x6e1   : > { %6032 = vmatpush3.bf16.xpose.msra.mxu0 %v3834_v61  ;;  %6033 = vmatprep.mubr.msk.bf16.mxu0 %vm6502_vm0, %v8080_v58 }
 0x6e2   : > { %6043 = vmatprep.subr.bf16.mxu0 %v8080_v58 }
 0x6e4   : > { %6052 = vmatmul.mubr.msk.bf16.vlgmr.msra.gmra.mxu1 %vm731_vm1, %v3982_v7 }
 0x6e5   : > { %6062 = vmatpush3.bf16.xpose.msra.mxu1 %v4089_v13  ;;  %6063 = vmatprep.mubr.msk.bf16.mxu1 %vm6502_vm0, %v8080_v58 }
 0x6e6   : > { %6073 = vmatprep.subr.bf16.mxu1 %v8080_v58 }
 0x6e8   : > { %6034 = vmatmul.mubr.msk.bf16.vlgmr.msra.gmra.mxu0 %vm731_vm1, %v3829_v28 }
 0x6e9   : > { %6044 = vmatpush3.bf16.xpose.msra.mxu0 %v3936_v26  ;;  %6045 = vmatprep.mubr.msk.bf16.mxu0 %vm6502_vm0, %v8080_v58 }
 0x6ea   : > { %6055 = vmatprep.subr.bf16.mxu0 %v8080_v58 }
 0x6ec   : > { %6064 = vmatmul.mubr.msk.bf16.vlgmr.msra.gmra.mxu1 %vm731_vm1, %v4084_v29 }
 0x6ed   : > { %6074 = vmatpush3.bf16.xpose.msra.mxu1 %v4191_v30  ;;  %6075 = vmatprep.mubr.msk.bf16.mxu1 %vm6502_vm0, %v8080_v58 }
 0x6ee   : > { %6085 = vmatprep.subr.bf16.mxu1 %v8080_v58 }
 0x6f0   : > { %6046 = vmatmul.mubr.msk.bf16.vlgmr.msra.gmra.mxu0 %vm731_vm1, %v3931_v62 }
 0x6f1   : > { %6056 = vmatpush3.bf16.xpose.msra.mxu0 %v4038_v16  ;;  %6057 = vmatprep.mubr.msk.bf16.mxu0 %vm6502_vm0, %v8080_v58 }
 0x6f2   : > { %6067 = vmatprep.subr.bf16.mxu0 %v8080_v58 }
 0x6f4   : > { %6076 = vmatmul.mubr.msk.bf16.vlgmr.msra.gmra.mxu1 %vm731_vm1, %v4186_v8 }
 0x6f5   : > { %6086 = vmatpush3.bf16.xpose.msra.mxu1 %v4293_v4  ;;  %6087 = vmatprep.mubr.msk.bf16.mxu1 %vm6502_vm0, %v8080_v58 }
 0x6f8   : > { %6058 = vmatmul.mubr.msk.bf16.vlgmr.msra.gmra.mxu0 %vm731_vm1, %v4033_v59 }
 0x6f9   : > { %6068 = vmatpush3.bf16.xpose.msra.mxu0 %v4140_v3  ;;  %6069 = vmatprep.mubr.msk.bf16.mxu0 %vm6502_vm0, %v8080_v58 }
 0x6fa   : > { %6079 = vmatprep.subr.bf16.mxu0 %v8080_v58 }
 0x6fc   : > { %6088 = vmatmul.mubr.msk.bf16.vlgmr.msra.gmra.mxu1 %vm731_vm1, %v4288_v5 }
 0x700   : > { %6070 = vmatmul.mubr.msk.bf16.vlgmr.msra.gmra.mxu0 %vm731_vm1, %v4135_v41 }
 0x701   : > { %6080 = vmatpush3.bf16.xpose.msra.mxu0 %v4242_v24  ;;  %6081 = vmatprep.mubr.msk.bf16.mxu0 %vm6502_vm0, %v8080_v58 }
 0x708   : > { %6082 = vmatmul.mubr.msk.bf16.vlgmr.msra.gmra.mxu0 %vm731_vm1, %v4237_v37 }
 0x788   : > { %v7799_v43 = vpop.f32.mrf.mxu0 }
 0x78a   : > { %v5999_v9 = vpop.f32.mrf.mxu0 }
 0x78c   : > { %v7801_v60 = vpop.f32.mrf.mxu1  ;;  %v3567_v11 = vpop.f32.mrf.mxu0 }
 0x78d   : > { %v4355_v14 = vrot.slane %v7801_v60, 5 }
 0x78e   : > { %v6017_v49 = vpop.f32.mrf.mxu1  ;;  %v6000_v15 = vpop.f32.mrf.mxu0 }
 0x790   : > { %v3720_v12 = vpop.f32.mrf.mxu1  ;;  %v7803_v22 = vpop.f32.mrf.mxu0 }
 0x791   : > { %v4351_v53 = vrot.slane %v7803_v22, 7 }
 0x792   : > { %v6018_v17 = vpop.f32.mrf.mxu1  ;;  %v6005_v58 = vpop.f32.mrf.mxu0 }
 0x793   : > { %v4352_v63 = vsel %vm2374_vm2, %v4351_v53, %v7799_v43 }
 0x794   : > { %v7805_v25 = vpop.f32.mrf.mxu1  ;;  %v3618_v42 = vpop.f32.mrf.mxu0 }
 0x795   : > { %v4359_v30 = vrot.slane %v7805_v25, 3 }
 0x796   : > { %v6029_v39 = vpop.f32.mrf.mxu1  ;;  %v6006_v44 = vpop.f32.mrf.mxu0 }
 0x798   : > { %v3822_v38 = vpop.f32.mrf.mxu1  ;;  %v7807_v46 = vpop.f32.mrf.mxu0 }
 0x799   : > { %v4353_v57 = vrot.slane %v7807_v46, 6 }
 0x79a   : > { %v6030_v45 = vpop.f32.mrf.mxu1  ;;  %v6011_v48 = vpop.f32.mrf.mxu0 }
 0x79b   : > { %v4354_v19 = vsel %vm2377_vm3, %v4353_v57, %v4352_v63 }
 0x79c   : > { %v7809_v47 = vpop.f32.mrf.mxu1  ;;  %v3669_v51 = vpop.f32.mrf.mxu0  ;;  %v4356_v26 = vsel %vm2380_vm4, %v4355_v14, %v4354_v19 }
 0x79d   : > { %v4363_v32 = vrot.slane %v7809_v47, 1 }
 0x79e   : > { %v6041_v50 = vpop.f32.mrf.mxu1  ;;  %v6012_v56 = vpop.f32.mrf.mxu0 }
 0x7a0   : > { %v3924_v52 = vpop.f32.mrf.mxu1  ;;  %v7813_v61 = vpop.f32.mrf.mxu0 }
 0x7a1   : > { %v4357_v20 = vrot.slane %v7813_v61, 4 }
 0x7a2   : > { %v6042_v18 = vpop.f32.mrf.mxu1  ;;  %v6023_v7 = vpop.f32.mrf.mxu0 }
 0x7a3   : > { %v4358_v29 = vsel %vm2383_vm5, %v4357_v20, %v4356_v26 }
 0x7a4   : > { %v7815_v33 = vpop.f32.mrf.mxu1  ;;  %v3771_v21 = vpop.f32.mrf.mxu0  ;;  %v4360_v16 = vsel %vm2386_vm6, %v4359_v30, %v4358_v29 }
 0x7a5   : > { %v4365_v38 = vrot.slane %v7815_v33, 7 }
 0x7a6   : > { %v6053_v13 = vpop.f32.mrf.mxu1  ;;  %v6024_v27 = vpop.f32.mrf.mxu0 }
 0x7a8   : > { %v4026_v23 = vpop.f32.mrf.mxu1  ;;  %v7825_v31 = vpop.f32.mrf.mxu0 }
 0x7a9   : > { %v4361_v36 = vrot.slane %v7825_v31, 2 }
 0x7aa   : > { %v6054_v28 = vpop.f32.mrf.mxu1  ;;  %v6035_v2 = vpop.f32.mrf.mxu0 }
 0x7ab   : > { %v4362_v8 = vsel %vm2389_vm7, %v4361_v36, %v4360_v16 }
 0x7ac   : > { %v7827_v35 = vpop.f32.mrf.mxu1  ;;  %v3873_v4 = vpop.f32.mrf.mxu0  ;;  %v4364_v40 = vsel %vm2392_vm8, %v4363_v32, %v4362_v8 }
 0x7ad   : > { %v4382_v10 = vsel %vm4381_vm11, %v4364_v40, -inf  ;;  %v4369_v52 = vrot.slane %v7827_v35, 5 }
 0x7ae   : > { %v6065_v62 = vpop.f32.mrf.mxu1  ;;  %v6036_v6 = vpop.f32.mrf.mxu0  ;;  %4383 = vmax.xlane.f32.xlu1 %v4382_v10 }
 0x7b0   : > { %v4128_v54 = vpop.f32.mrf.mxu1  ;;  %v7835_v3 = vpop.f32.mrf.mxu0 }
 0x7b1   : > { %v4366_v45 = vsel %vm2374_vm2, %v4365_v38, %v7835_v3 }
 0x7b2   : > { %v6066_v59 = vpop.f32.mrf.mxu1  ;;  %v6047_v0 = vpop.f32.mrf.mxu0 }
 0x7b4   : > { %v7837_v5 = vpop.f32.mrf.mxu1  ;;  %v3975_v41 = vpop.f32.mrf.mxu0 }
 0x7b5   : > { %v4373_v63 = vrot.slane %v7837_v5, 3 }
 0x7b6   : > { %v6077_v55 = vpop.f32.mrf.mxu1  ;;  %v6048_v34 = vpop.f32.mrf.mxu0 }
 0x7b8   : > { %v4230_v24 = vpop.f32.mrf.mxu1  ;;  %v7839_v9 = vpop.f32.mrf.mxu0 }
 0x7b9   : > { %v4367_v42 = vrot.slane %v7839_v9, 6 }
 0x7ba   : > { %v6078_v37 = vpop.f32.mrf.mxu1  ;;  %v6059_v11 = vpop.f32.mrf.mxu0 }
 0x7bb   : > { %v4368_v50 = vsel %vm2377_vm3, %v4367_v42, %v4366_v45 }
 0x7bc   : > { %v7841_v49 = vpop.f32.mrf.mxu1  ;;  %v4077_v15 = vpop.f32.mrf.mxu0  ;;  %v4370_v56 = vsel %vm2380_vm4, %v4369_v52, %v4368_v50 }
 0x7bd   : > { %v4377_v19 = vrot.slane %v7841_v49, 1 }
 0x7be   : > { %v6089_v12 = vpop.f32.mrf.mxu1  ;;  %v6060_v58 = vpop.f32.mrf.mxu0 }
 0x7c0   : > { %v4332_v17 = vpop.f32.mrf.mxu1  ;;  %v7845_v44 = vpop.f32.mrf.mxu0 }
 0x7c1   : > { %v4371_v51 = vrot.slane %v7845_v44, 4 }
 0x7c2   : > { %v6090_v39 = vpop.f32.mrf.mxu1  ;;  %v6071_v48 = vpop.f32.mrf.mxu0 }
 0x7c3   : > { %v4372_v57 = vsel %vm2383_vm5, %v4371_v51, %v4370_v56 }
 0x7c4   : > { %v4179_v53 = vpop.f32.mrf.mxu0  ;;  %v4374_v14 = vsel %vm2386_vm6, %v4373_v63, %v4372_v57 }
 0x7c6   : > { %v6072_v18 = vpop.f32.mrf.mxu0 }
 0x7c8   : > { %v7855_v7 = vpop.f32.mrf.mxu0 }
 0x7c9   : > { %v4375_v13 = vrot.slane %v7855_v7, 2 }
 0x7ca   : > { %v6083_v20 = vpop.f32.mrf.mxu0 }
 0x7cb   : > { %v4376_v21 = vsel %vm2389_vm7, %v4375_v13, %v4374_v14 }
 0x7cc   : > { %v4281_v23 = vpop.f32.mrf.mxu0  ;;  %v4378_v26 = vsel %vm2392_vm8, %v4377_v19, %v4376_v21 }
 0x7cd   : > { %v4385_v27 = vsel %vm4381_vm11, %v4378_v26, -inf }
 0x7ce   : > { %v6084_v28 = vpop.f32.mrf.mxu0  ;;  %4386 = vmax.xlane.f32.xlu1 %v4385_v27 }
 0x837   : > { %v7863_v29 = vpop.xlane.xlu1 %4383 }
 0x838   : > { %v4390_v30 = vrot.slane %v7863_v29, 1  ;;  %v4420_v36 = vsub.f32 %v7799_v43, %v7863_v29  ;;  %v4391_v32 = vrot.slane %v7863_v29, 2  ;;  %v4392_v2 = vrot.slane %v7863_v29, 3 }
 0x839   : > { %v4393_v16 = vrot.slane %v7863_v29, 4  ;;  %v4394_v62 = vrot.slane %v7863_v29, 5  ;;  %v4395_v8 = vrot.slane %v7863_v29, 6  ;;  %v4396_v4 = vrot.slane %v7863_v29, 7 }
 0x83a   : > { %v4436_v40 = vmul.f32 1.442695, %v4420_v36  ;;  %v4421_v54 = vsub.f32 %v7803_v22, %v4390_v30  ;;  %v4422_v10 = vsub.f32 %v7807_v46, %v4391_v32  ;;  %v4423_v6 = vsub.f32 %v7801_v60, %v4392_v2 }
 0x83b   : > { %v4424_v59 = vsub.f32 %v7813_v61, %v4393_v16  ;;  %v4425_v0 = vsub.f32 %v7805_v25, %v4394_v62  ;;  %v4426_v55 = vsub.f32 %v7825_v31, %v4395_v8  ;;  %v4427_v41 = vsub.f32 %v7809_v47, %v4396_v4 }
 0x83c   : > { %v4438_v24 = vmul.f32 1.442695, %v4421_v54  ;;  %v4440_v34 = vmul.f32 1.442695, %v4422_v10  ;;  %v4442_v37 = vmul.f32 1.442695, %v4423_v6  ;;  %6295 = vpow2.f32 %v4436_v40 }
 0x83d   : > { %v4444_v11 = vmul.f32 1.442695, %v4424_v59  ;;  %v4446_v12 = vmul.f32 1.442695, %v4425_v0  ;;  %v4448_v15 = vmul.f32 1.442695, %v4426_v55 }
 0x83e   : > { %6297 = vpow2.f32 %v4438_v24  ;;  %v4450_v17 = vmul.f32 1.442695, %v4427_v41 }
 0x83f   : > { %6299 = vpow2.f32 %v4440_v34 }
 0x840   : > { %6301 = vpow2.f32 %v4442_v37 }
 0x841   : > { %6303 = vpow2.f32 %v4444_v11 }
 0x842   : > { %6305 = vpow2.f32 %v4446_v12 }
 0x843   : > { %6307 = vpow2.f32 %v4448_v15 }
 0x844   : > { %6309 = vpow2.f32 %v4450_v17 }
 0x849   : > { %v6296_v58 = vpop.eup %6295 }
 0x84b   : > { %v6298_v39 = vpop.eup %6297 }
 0x84c   : > { %v6300_v42 = vpop.eup %6299  ;;  %v4484_v38 = vrot.slane %v6298_v39, 7 }
 0x84d   : > { %v6302_v45 = vpop.eup %6301  ;;  %v4486_v48 = vrot.slane %v6300_v42, 6 }
 0x84e   : > { %v6304_v50 = vpop.eup %6303  ;;  %v4485_v51 = vsel %vm2374_vm2, %v4484_v38, %v6296_v58  ;;  %v4488_v52 = vrot.slane %v6302_v45, 5 }
 0x84f   : > { %v6306_v53 = vpop.eup %6305  ;;  %v4487_v56 = vsel %vm2377_vm3, %v4486_v48, %v4485_v51  ;;  %v4490_v18 = vrot.slane %v6304_v50, 4 }
 0x850   : > { %v6308_v57 = vpop.eup %6307  ;;  %v4489_v63 = vsel %vm2380_vm4, %v4488_v52, %v4487_v56  ;;  %v4492_v13 = vrot.slane %v6306_v53, 3 }
 0x851   : > { %v6310_v19 = vpop.eup %6309  ;;  %v4491_v20 = vsel %vm2383_vm5, %v4490_v18, %v4489_v63  ;;  %v4494_v14 = vrot.slane %v6308_v57, 2 }
 0x852   : > { %v4493_v21 = vsel %vm2386_vm6, %v4492_v13, %v4491_v20  ;;  %v4496_v23 = vrot.slane %v6310_v19, 1 }
 0x853   : > { %v4495_v26 = vsel %vm2389_vm7, %v4494_v14, %v4493_v21 }
 0x854   : > { %v4497_v27 = vsel %vm2392_vm8, %v4496_v23, %v4495_v26 }
 0x855   : > { %v4514_v28 = vsel %vm4381_vm11, %v4497_v27, 0.0 }
 0x856   : > { %4515 = vadd.xlane.f32.xlu1 %v4514_v28 }
 0x857   : > { %v7889_v30 = vpop.xlane.xlu1 %4386 }
 0x858   : > { %v4397_v36 = vrot.slane %v7889_v30, 1  ;;  %v4428_v32 = vsub.f32 %v7835_v3, %v7889_v30  ;;  %v4398_v2 = vrot.slane %v7889_v30, 2  ;;  %v4399_v16 = vrot.slane %v7889_v30, 3 }
 0x859   : > { %v4400_v62 = vrot.slane %v7889_v30, 4  ;;  %v4401_v8 = vrot.slane %v7889_v30, 5  ;;  %v4402_v4 = vrot.slane %v7889_v30, 6  ;;  %v4403_v40 = vrot.slane %v7889_v30, 7 }
 0x85a   : > { %v4452_v54 = vmul.f32 1.442695, %v4428_v32  ;;  %v4429_v10 = vsub.f32 %v7815_v33, %v4397_v36  ;;  %v4430_v6 = vsub.f32 %v7839_v9, %v4398_v2  ;;  %v4431_v59 = vsub.f32 %v7827_v35, %v4399_v16 }
 0x85b   : > { %v4432_v0 = vsub.f32 %v7845_v44, %v4400_v62  ;;  %v4433_v55 = vsub.f32 %v7837_v5, %v4401_v8  ;;  %v4434_v41 = vsub.f32 %v7855_v7, %v4402_v4  ;;  %v4435_v24 = vsub.f32 %v7841_v49, %v4403_v40 }
 0x85c   : > { %v4454_v34 = vmul.f32 1.442695, %v4429_v10  ;;  %v4456_v37 = vmul.f32 1.442695, %v4430_v6  ;;  %v4458_v11 = vmul.f32 1.442695, %v4431_v59  ;;  %6311 = vpow2.f32 %v4452_v54 }
 0x85d   : > { %v4460_v12 = vmul.f32 1.442695, %v4432_v0  ;;  %v4462_v15 = vmul.f32 1.442695, %v4433_v55  ;;  %v4464_v17 = vmul.f32 1.442695, %v4434_v41 }
 0x85e   : > { %6313 = vpow2.f32 %v4454_v34  ;;  %v4466_v58 = vmul.f32 1.442695, %v4435_v24 }
 0x85f   : > { %6315 = vpow2.f32 %v4456_v37 }
 0x860   : > { %6317 = vpow2.f32 %v4458_v11 }
 0x861   : > { %6319 = vpow2.f32 %v4460_v12 }
 0x862   : > { %6321 = vpow2.f32 %v4462_v15 }
 0x863   : > { %6323 = vpow2.f32 %v4464_v17 }
 0x864   : > { %6325 = vpow2.f32 %v4466_v58 }
 0x869   : > { %v6312_v39 = vpop.eup %6311 }
 0x86b   : > { %v6314_v42 = vpop.eup %6313 }
 0x86c   : > { %v6316_v38 = vpop.eup %6315  ;;  %v4498_v45 = vrot.slane %v6314_v42, 7 }
 0x86d   : > { %v6318_v48 = vpop.eup %6317  ;;  %v4500_v50 = vrot.slane %v6316_v38, 6 }
 0x86e   : > { %v6320_v51 = vpop.eup %6319  ;;  %v4499_v52 = vsel %vm2374_vm2, %v4498_v45, %v6312_v39  ;;  %v4502_v53 = vrot.slane %v6318_v48, 5 }
 0x86f   : > { %v6322_v56 = vpop.eup %6321  ;;  %v4501_v18 = vsel %vm2377_vm3, %v4500_v50, %v4499_v52  ;;  %v4504_v57 = vrot.slane %v6320_v51, 4 }
 0x870   : > { %v6324_v63 = vpop.eup %6323  ;;  %v4503_v13 = vsel %vm2380_vm4, %v4502_v53, %v4501_v18  ;;  %v4506_v19 = vrot.slane %v6322_v56, 3 }
 0x871   : > { %v6326_v20 = vpop.eup %6325  ;;  %v4505_v14 = vsel %vm2383_vm5, %v4504_v57, %v4503_v13  ;;  %v4508_v21 = vrot.slane %v6324_v63, 2 }
 0x872   : > { %v4507_v23 = vsel %vm2386_vm6, %v4506_v19, %v4505_v14  ;;  %v4510_v26 = vrot.slane %v6326_v20, 1 }
 0x873   : > { %v4509_v27 = vsel %vm2389_vm7, %v4508_v21, %v4507_v23 }
 0x874   : > { %v4511_v28 = vsel %vm2392_vm8, %v4510_v26, %v4509_v27 }
 0x875   : > { %v4517_v36 = vsel %vm4381_vm11, %v4511_v28, 0.0 }
 0x876   : > { %4518 = vadd.xlane.f32.xlu1 %v4517_v36 }
 0x8df   : > { %v4516_v32 = vpop.xlane.xlu1 %4515 }
 0x8e0   : > { %6327 = vlog2.f32 %v4516_v32 }
 0x8ed   : > { %v6328_v2 = vpop.eup %6327 }
 0x8ee   : > { %v4521_v16 = vmul.f32 0.6931472, %v6328_v2 }
 0x8f0   : > { %v4524_v62 = vadd.f32 %v4521_v16, %v7863_v29 }
 0x8f2   : > { %v4528_v8 = vrot.slane %v4524_v62, 1  ;;  %v4529_v4 = vrot.slane %v4524_v62, 2  ;;  %v4530_v40 = vrot.slane %v4524_v62, 3  ;;  %v4531_v54 = vrot.slane %v4524_v62, 4 }
 0x8f3   : > { %v4532_v10 = vrot.slane %v4524_v62, 5  ;;  %v4533_v6 = vrot.slane %v4524_v62, 6  ;;  %v4534_v59 = vrot.slane %v4524_v62, 7  ;;  %v4558_v34 = vsub.f32 %v7799_v43, %v4524_v62 }
 0x8f4   : > { %v4559_v0 = vsub.f32 %v7803_v22, %v4528_v8  ;;  %v4560_v55 = vsub.f32 %v7807_v46, %v4529_v4  ;;  %v4561_v41 = vsub.f32 %v7801_v60, %v4530_v40  ;;  %v4562_v24 = vsub.f32 %v7813_v61, %v4531_v54 }
 0x8f5   : > { %v4563_v37 = vsub.f32 %v7805_v25, %v4532_v10  ;;  %v4564_v12 = vsub.f32 %v7825_v31, %v4533_v6  ;;  %v4565_v15 = vsub.f32 %v7809_v47, %v4534_v59 }
 0x8f6   : > { %v4591_v29 = vrot.slane %v4559_v0, 7  ;;  %v4593_v11 = vrot.slane %v4560_v55, 6  ;;  %v4595_v58 = vrot.slane %v4561_v41, 5  ;;  %v4597_v46 = vrot.slane %v4562_v24, 4 }
 0x8f7   : > { %v4599_v39 = vrot.slane %v4563_v37, 3  ;;  %v4601_v43 = vrot.slane %v4564_v12, 2  ;;  %v4603_v42 = vrot.slane %v4565_v15, 1 }
 0x8f8   : > { %v4592_v17 = vsel %vm2374_vm2, %v4591_v29, %v4558_v34 }
 0x8f9   : > { %v4594_v22 = vsel %vm2377_vm3, %v4593_v11, %v4592_v17 }
 0x8fa   : > { %v4596_v60 = vsel %vm2380_vm4, %v4595_v58, %v4594_v22 }
 0x8fb   : > { %v4598_v61 = vsel %vm2383_vm5, %v4597_v46, %v4596_v60 }
 0x8fc   : > { %v4600_v25 = vsel %vm2386_vm6, %v4599_v39, %v4598_v61 }
 0x8fd   : > { %v4602_v31 = vsel %vm2389_vm7, %v4601_v43, %v4600_v25 }
 0x8fe   : > { %v4604_v47 = vsel %vm2392_vm8, %v4603_v42, %v4602_v31 }
 0x8ff   : > { %v4519_v38 = vpop.xlane.xlu1 %4518  ;;  %v4621_v45 = vsel %vm4574_vm12, %v4604_v47, 0.0  ;;  %v4632_v50 = vsel %vm4631_vm13, %v4604_v47, 0.0  ;;  %v4643_v55 = vsel %vm4642_vm14, %v4604_v47, 0.0 }
 0x900   : > { %6329 = vlog2.f32 %v4519_v38  ;;  %v4623_v48 = vsel %vm4381_vm11, %v4621_v45, 0.0  ;;  %v4634_v51 = vsel %vm4381_vm11, %v4632_v50, 0.0  ;;  %v4645_v24 = vsel %vm4381_vm11, %v4643_v55, 0.0 }
 0x901   : > { %4624 = vadd.xlane.f32.xlu1 %v4623_v48 }
 0x905   : > { %4635 = vadd.xlane.f32.xlu1 %v4634_v51 }
 0x90d   : > { %v6330_v52 = vpop.eup %6329 }
 0x90e   : > { %v4523_v53 = vmul.f32 0.6931472, %v6330_v52 }
 0x910   : > { %v4525_v56 = vadd.f32 %v4523_v53, %v7889_v30 }
 0x912   : > { %v4535_v18 = vrot.slane %v4525_v56, 1  ;;  %v4536_v57 = vrot.slane %v4525_v56, 2  ;;  %v4537_v63 = vrot.slane %v4525_v56, 3  ;;  %v4538_v13 = vrot.slane %v4525_v56, 4 }
 0x913   : > { %v4539_v19 = vrot.slane %v4525_v56, 5  ;;  %v4540_v20 = vrot.slane %v4525_v56, 6  ;;  %v4541_v14 = vrot.slane %v4525_v56, 7  ;;  %v4566_v28 = vsub.f32 %v7835_v3, %v4525_v56 }
 0x914   : > { %v4567_v21 = vsub.f32 %v7815_v33, %v4535_v18  ;;  %v4568_v23 = vsub.f32 %v7839_v9, %v4536_v57  ;;  %v4569_v26 = vsub.f32 %v7827_v35, %v4537_v63  ;;  %v4570_v27 = vsub.f32 %v7845_v44, %v4538_v13 }
 0x915   : > { %v4571_v36 = vsub.f32 %v7837_v5, %v4539_v19  ;;  %v4572_v2 = vsub.f32 %v7855_v7, %v4540_v20  ;;  %v4573_v16 = vsub.f32 %v7841_v49, %v4541_v14 }
 0x916   : > { %v4605_v30 = vrot.slane %v4567_v21, 7  ;;  %v4607_v32 = vrot.slane %v4568_v23, 6  ;;  %v4609_v8 = vrot.slane %v4569_v26, 5  ;;  %v4611_v9 = vrot.slane %v4570_v27, 4 }
 0x917   : > { %v4613_v4 = vrot.slane %v4571_v36, 3  ;;  %v4615_v3 = vrot.slane %v4572_v2, 2  ;;  %v4617_v40 = vrot.slane %v4573_v16, 1 }
 0x918   : > { %v4606_v62 = vsel %vm2374_vm2, %v4605_v30, %v4566_v28 }
 0x919   : > { %v4608_v33 = vsel %vm2377_vm3, %v4607_v32, %v4606_v62 }
 0x91a   : > { %v4610_v35 = vsel %vm2380_vm4, %v4609_v8, %v4608_v33 }
 0x91b   : > { %v4612_v44 = vsel %vm2383_vm5, %v4611_v9, %v4610_v35 }
 0x91c   : > { %v4614_v5 = vsel %vm2386_vm6, %v4613_v4, %v4612_v44 }
 0x91d   : > { %v4616_v54 = vsel %vm2389_vm7, %v4615_v3, %v4614_v5 }
 0x91e   : > { %v4618_v49 = vsel %vm2392_vm8, %v4617_v40, %v4616_v54 }
 0x91f   : > { %v4633_v7 = vsel %vm4631_vm13, %v4618_v49, 0.0  ;;  %v4622_v10 = vsel %vm4574_vm12, %v4618_v49, 0.0  ;;  %v4644_v0 = vsel %vm4642_vm14, %v4618_v49, 0.0 }
 0x920   : > { %v4637_v6 = vsel %vm4381_vm11, %v4633_v7, 0.0  ;;  %v4626_v59 = vsel %vm4381_vm11, %v4622_v10, 0.0  ;;  %v4648_v41 = vsel %vm4381_vm11, %v4644_v0, 0.0 }
 0x921   : > { %4638 = vadd.xlane.f32.xlu0 %v4637_v6  ;;  %4627 = vadd.xlane.f32.xlu1 %v4626_v59 }
 0x925   : > { %4649 = vadd.xlane.f32.xlu0 %v4648_v41  ;;  %4646 = vadd.xlane.f32.xlu1 %v4645_v24 }
 0x98a   : > { %v4625_v34 = vpop.xlane.xlu1 %4624 }
 0x98b   : > { %v4629_v15 = vsel %vm4574_vm12, %v4625_v34, 0.0 }
 0x98e   : > { %v4636_v37 = vpop.xlane.xlu1 %4635 }
 0x98f   : > { %v4640_v17 = vsel %vm4631_vm13, %v4636_v37, %v4629_v15 }
 0x9aa   : > { %v4639_v29 = vpop.xlane.xlu0 %4638  ;;  %v4628_v11 = vpop.xlane.xlu1 %4627 }
 0x9ab   : > { %v4630_v12 = vsel %vm4574_vm12, %v4628_v11, 0.0 }
 0x9ac   : > { %v4641_v58 = vsel %vm4631_vm13, %v4639_v29, %v4630_v12 }
 0x9ae   : > { %v4650_v22 = vpop.xlane.xlu0 %4649  ;;  %v4647_v46 = vpop.xlane.xlu1 %4646 }
 0x9af   : > { %v4652_v60 = vsel %vm4642_vm14, %v4650_v22, %v4641_v58  ;;  %v4651_v39 = vsel %vm4642_vm14, %v4647_v46, %v4640_v17 }
 0x9b0   : > { %4654 = vst [vmem:[%s372_s25 + $0x8] sm:$0xff] %v4652_v60  ;;  %4653 = vst [vmem:[%s372_s25] sm:$0xff] %v4651_v39 }
 0x9b1   : > { %6445 = shalt.err (!%p6442_p2)
}
 0x9b2   : > { %s6446_s10 = scalar_lea.hbm %s7979_s22, 256  ;;  %s6450_s25 = scalar_lea.hbm %s8038_s8, 512 }
 0x9b3   : > { %p6447_p9 = scmp.ne.s32.totalorder %s7979_s22, %s6446_s10  ;;  %p6451_p6 = scmp.lt.s32.totalorder %s7979_s22, %s8038_s8 }
 0x9b4   : > { %p6452_p11 = scmp.lt.s32.totalorder %s6450_s25, %s6446_s10 }
 0x9b5   : > { %p6448_p1 = pnand %p6447_p9, %p8096_p4 }
 0x9b6   : > { %p6453_p12 = por %p6452_p11, %p6451_p6 }
 0x9b7   : > { %p6449_p3 = pneg %p6448_p1 }
 0x9b9   : > { %p6454_p13 = pnand %p6453_p12, %p6449_p3 }
 0x9bb   : > { %6457 = shalt.err (!%p6454_p13)
}
 0x9bc   : > { %s6506_s13 = smov 128   ;;  %s6507_s21 = smov 8  }
 0x9bd   : > { %6093 = dma.vmem_to_hbm [thread:$0]  (%p8096_p4), %s7972_s20, 256, %s7979_s22, %s4656_s9, %s6506_s13, %s6506_s13, %s6507_s21  }
 0x9be PF: > { %s4684_s15 = sand.u32 1, %s6484_s27   ;;  %p8097_p5 = scmp.ne.s32.totalorder %s8062_s18, 0 }
 0x9bf   : > { %p8098_p7 = scmp.ge.s32.totalorder %s6496_s30, 2  ;;  %s4685_s16 = scalar_lea.sflag [#allocation4], %s4684_s15 }
 0x9c1   : > { %p6100_p8 = pnand %p8098_p7, %p8097_p5 }
 0x9c3   : > { %p6101_p10 = pneg %p6100_p8 }
 0x9c5   : > { %6479 = dma.done.wait (%p6101_p10), %s4685_s16, 256  }
 0x9c6   : > { %6481 = vsyncadd (%p6101_p10), %s4685_s16, 4294967040  ;;  %s8099_s26 = sld [smem:[#allocation8_spill]]  ;;  %p21_p0 = scmp.ge.s32.totalorder %s6578_s11, 4  }
 0x9c7   : > { %s8100_s27 = smov %s6488_s28  ;;  %s8101_s28 = smov %s6492_s29 }
 0x9c8   : > { %s8103_s30 = smov %s6578_s11  ;;  %23 = sbr.rel (!%p21_p0) target bundleno = 5 (0x5), region = 106 }
 0x9cc   : > { %s8102_s29 = smov %s8099_s26 }
 0x9cd   :  { %4690 = vsyncpa [#allocation3], 1 }
 0x9ce   :  { %4692 = vsyncpa [#allocation3 + $0x1], 1 }
 0x9cf   :  { %4693 = vsyncpa [#allocation4], 1 }
 0x9d0   :  { %4695 = vsyncpa [#allocation4 + $0x1], 1 }

</bundles_post_ra>
